<compile_context>
chip_gen: v7x
topology: tpu7x:2x2x1
jax: 0.10.0
libtpu: 0.0.40
codegen_flags: <defaults>
</compile_context>

<pallas_src>
import functools

import numpy as np

import jax
import jax.numpy as jnp
from jax import lax
from jax.experimental import pallas as pl
from jax.experimental.pallas import tpu as pltpu

LN_EPS = 1e-5
LANES = 128          # candidate axis, edge axis and the packed output all live on lanes
VALUE_LANE = 127     # critic value is written to this lane of the output row
META_ROWS = 8        # glue rows 0..7: possible row, qmask row, 1/E scalar
MISC_ROWS = 256

# misc slab: small f32 vectors stored as *columns* (one lane each)
(_C_CB1, _C_CLNG, _C_CLNB, _C_CW1B0, _C_CW1B1, _C_CB2, _C_CB3, _C_CW4,
 _C_B1E, _C_W2, _C_LNG, _C_LNB, _C_AB2, _C_CB4) = range(14)


def _round_up(x, m):
    return ((x + m - 1) // m) * m


def _weight_layout(D, H):
    """Row offsets of each weight block inside the lane-dense bf16 slab (128 lanes)."""
    off, r = {}, 0
    off["w1e"] = r;   r += _round_up(H, 16)   # [H, D]     actor W1 (state_norm affine folded)
    off["cw1a"] = r;  r += 256                # [256, D]   critic W1[:, :D]   (PyTorch [out,in])
    off["cw2lo"] = r; r += 128                # [128, 128] critic W2[:, :128]
    off["cw2hi"] = r; r += 128                # [128, 128] critic W2[:, 128:]
    off["cw3"] = r;   r += 64                 # [64, 128]  critic W3
    return off, r


# ----------------------------------------------------------------------------
# Pallas kernel (one state per grid step)
# ----------------------------------------------------------------------------
def _actor_critic_kernel(glue_ref, w_ref, misc_ref, out_ref, *, D, H, wl):
    f32, bf16 = jnp.float32, jnp.bfloat16

    # ---- per-state data (squeezed [META_ROWS + D, 128] glue block) ----
    poss_f = glue_ref[0:1, :]                       # [1,128] candidate ids (-1 mean cand, -2 pad)
    qmask = glue_ref[1:2, :]                        # [1,128] query mask 0/1 (lanes >= E are 0)
    inv_e = glue_ref[2:3, 0:1]                      # [1,1]   1 / total_edges
    featsT = glue_ref[META_ROWS:META_ROWS + D, :]   # [D,128] features^T (lanes >= E are 0)

    poss = poss_f.astype(jnp.int32)
    cand = poss >= -1                               # real candidate lanes
    is_mean = (poss == -1).astype(f32)              # the appended mean-of-valid candidate

    # ---- gather / mean matrix built in-kernel (no host loops, no per-P recompile) ----
    edge_iota = lax.broadcasted_iota(jnp.int32, (LANES, LANES), 0)
    onehot = (poss == edge_iota).astype(f32)                    # [128,128]  G[edge, cand]
    valid_edge = jnp.max(onehot, axis=1, keepdims=True)         # [128,1] edge appears in possible
    n_valid = jnp.sum(valid_edge, axis=0, keepdims=True)        # [1,1]
    gmat = onehot + (valid_edge / jnp.maximum(n_valid, 1.0)) * is_mean
    # NOTE: when n_valid == 0 the mean column is all-zero; LayerNorm of a constant
    # vector (torch fills 1e-6) equals LayerNorm of the zero vector, so this is exact.

    # ---- actor path: candidates on the lane axis, logits born as a [1,128] row ----
    afT = jnp.dot(featsT, gmat, preferred_element_type=f32)     # [D,128] per-candidate features
    mu = jnp.mean(afT, axis=0, keepdims=True)
    xc = afT - mu
    var = jnp.mean(xc * xc, axis=0, keepdims=True)
    xn = xc * lax.rsqrt(var + LN_EPS)               # state_norm (affine folded into w1e / b1e)

    w1e = w_ref[wl["w1e"]:wl["w1e"] + H, 0:D]                   # bf16 [H,D]
    b1e = misc_ref[0:H, _C_B1E:_C_B1E + 1]                      # f32  [H,1]
    hT = jnp.maximum(
        jnp.dot(w1e, xn.astype(bf16), preferred_element_type=f32) + b1e, 0.0)   # [H,128]

    w2 = misc_ref[0:H, _C_W2:_C_W2 + 1]                         # f32 [H,1]
    ab2 = misc_ref[0:1, _C_AB2:_C_AB2 + 1]                      # f32 [1,1]
    logits = jnp.sum(w2 * hT, axis=0, keepdims=True) + ab2      # [1,128] (VPU+XLU, no MXU)

    lm = jnp.where(cand, logits, jnp.full_like(logits, -1e30))
    m = jnp.max(lm, axis=1, keepdims=True)
    ex = jnp.where(cand, jnp.exp(lm - m), 0.0)
    probs = ex / jnp.sum(ex, axis=1, keepdims=True)             # exact division (policy probs)

    # ---- critic path: column-oriented so PyTorch [out,in] weights are used as-is ----
    n_sel = jnp.sum(qmask, axis=1, keepdims=True)                                    # [1,1]
    sm = jnp.sum(featsT * qmask, axis=1, keepdims=True) / jnp.maximum(n_sel, 1.0)    # [D,1]
    mu2 = jnp.mean(sm, axis=0, keepdims=True)
    sc = sm - mu2
    var2 = jnp.mean(sc * sc, axis=0, keepdims=True)
    ln_g = misc_ref[0:D, _C_LNG:_C_LNG + 1]
    ln_b = misc_ref[0:D, _C_LNB:_C_LNB + 1]
    smn = sc * lax.rsqrt(var2 + LN_EPS) * ln_g + ln_b           # [D,1]  state_norm

    # concat([smn, chosen_ratio, remain_ratio]) @ W1.T
    #   == W1[:, :D] @ smn + chosen_ratio * W1[:, D] + remain_ratio * W1[:, D+1]
    p_cnt = jnp.sum(cand.astype(f32), axis=1, keepdims=True)    # [1,1] = len(possible)
    r_chosen = n_sel * inv_e
    r_remain = p_cnt * inv_e
    cw1a = w_ref[wl["cw1a"]:wl["cw1a"] + 256, 0:D]              # bf16 [256,D]
    c1 = (jnp.dot(cw1a, smn.astype(bf16), preferred_element_type=f32)
          + misc_ref[:, _C_CB1:_C_CB1 + 1]
          + r_chosen * misc_ref[:, _C_CW1B0:_C_CW1B0 + 1]
          + r_remain * misc_ref[:, _C_CW1B1:_C_CW1B1 + 1])      # [256,1]
    mu3 = jnp.mean(c1, axis=0, keepdims=True)
    cc = c1 - mu3
    var3 = jnp.mean(cc * cc, axis=0, keepdims=True)
    c1 = jnp.maximum(cc * lax.rsqrt(var3 + LN_EPS) * misc_ref[:, _C_CLNG:_C_CLNG + 1]
                     + misc_ref[:, _C_CLNB:_C_CLNB + 1], 0.0)

    c1b = c1.astype(bf16)
    cw2lo = w_ref[wl["cw2lo"]:wl["cw2lo"] + 128, :]             # bf16 [128,128]
    cw2hi = w_ref[wl["cw2hi"]:wl["cw2hi"] + 128, :]             # bf16 [128,128]
    c2 = jnp.maximum(
        jnp.dot(cw2lo, c1b[0:128, :], preferred_element_type=f32)
        + jnp.dot(cw2hi, c1b[128:256, :], preferred_element_type=f32)
        + misc_ref[0:128, _C_CB2:_C_CB2 + 1], 0.0)              # [128,1]

    cw3 = w_ref[wl["cw3"]:wl["cw3"] + 64, :]                    # bf16 [64,128]
    c3 = jnp.maximum(
        jnp.dot(cw3, c2.astype(bf16), preferred_element_type=f32)
        + misc_ref[0:64, _C_CB3:_C_CB3 + 1], 0.0)               # [64,1]

    cw4 = misc_ref[0:64, _C_CW4:_C_CW4 + 1]                     # f32 [64,1] (zero-init)
    cb4 = misc_ref[0:1, _C_CB4:_C_CB4 + 1]
    value = jnp.sum(cw4 * c3, axis=0, keepdims=True) + cb4      # [1,1] (VPU+XLU, no MXU)

    # ---- single lane-dense output row: probs on candidate lanes, value on lane 127 ----
    lane = lax.broadcasted_iota(jnp.int32, (1, LANES), 1)
    out_ref[...] = jnp.where(lane == VALUE_LANE, value, probs)


@functools.partial(jax.jit, static_argnums=(0, 1))
def _pallas_forward(D, H, glue, wslab, misc):
    B = glue.shape[0]
    GR = META_ROWS + D
    wl, WR = _weight_layout(D, H)
    kernel = functools.partial(_actor_critic_kernel, D=D, H=H, wl=wl)
    return pl.pallas_call(
        kernel,
        grid=(B,),
        in_specs=[
            pl.BlockSpec((None, GR, LANES), lambda b: (b, 0, 0)),   # per-state glue
            pl.BlockSpec((WR, LANES), lambda b: (0, 0)),            # weights: VMEM-resident
            pl.BlockSpec((MISC_ROWS, LANES), lambda b: (0, 0)),     # misc:    VMEM-resident
        ],
        out_specs=pl.BlockSpec((None, 1, LANES), lambda b: (b, 0, 0)),
        out_shape=jax.ShapeDtypeStruct((B, 1, LANES), jnp.float32),
        compiler_params=pltpu.CompilerParams(
            dimension_semantics=("parallel",)),       # both v7x TensorCores when B > 1
    )(glue, wslab, misc)


# ----------------------------------------------------------------------------
# Parameter construction (packed slabs; mimics PyTorch default init).
# ----------------------------------------------------------------------------
def _bf16_round(x):
    return np.asarray(jnp.asarray(x, jnp.bfloat16).astype(jnp.float32))


def init_params(key, out_dim):
    D, H = out_dim, out_dim // 2
    assert D % 8 == 0 and H % 8 == 0 and 8 <= D <= 128

    def linear(k, fan_in, fan_out):
        kw, kb = jax.random.split(k)
        bound = float(1.0 / np.sqrt(fan_in))
        w = np.asarray(jax.random.uniform(kw, (fan_out, fan_in), jnp.float32, -bound, bound))
        b = np.asarray(jax.random.uniform(kb, (fan_out,), jnp.float32, -bound, bound))
        return w, b                                   # PyTorch layout [out, in]

    keys = jax.random.split(key, 5)
    ln_g = np.ones((D,), np.float32)
    ln_b = np.zeros((D,), np.float32)
    aw1, ab1 = linear(keys[0], D, H)                  # actor Linear(D, H)
    aw2, ab2 = linear(keys[1], H, 1)                  # actor Linear(H, 1)
    cw1, cb1 = linear(keys[2], D + 2, 256)            # critic Linear(D+2, 256)
    cln_g = np.ones((256,), np.float32)
    cln_b = np.zeros((256,), np.float32)
    cw2, cb2 = linear(keys[3], 256, 128)
    cw3, cb3 = linear(keys[4], 128, 64)
    cw4 = np.zeros((1, 64), np.float32)               # nn.init.zeros_
    cb4 = np.zeros((1,), np.float32)

    # Fold state_norm's affine into the first actor Linear (exact, host f32):
    #   W1 @ (xn*g + b) + b1 = (W1*g) @ xn + (b1 + W1@b)
    w1e = aw1 * ln_g[None, :]
    b1e = ab1 + aw1 @ ln_b

    wl, WR = _weight_layout(D, H)
    wslab = np.zeros((WR, LANES), np.float32)
    wslab[wl["w1e"]:wl["w1e"] + H, 0:D] = w1e
    wslab[wl["cw1a"]:wl["cw1a"] + 256, 0:D] = cw1[:, 0:D]
    wslab[wl["cw2lo"]:wl["cw2lo"] + 128, 0:128] = cw2[:, 0:128]
    wslab[wl["cw2hi"]:wl["cw2hi"] + 128, 0:128] = cw2[:, 128:256]
    wslab[wl["cw3"]:wl["cw3"] + 64, 0:128] = cw3

    misc = np.zeros((MISC_ROWS, LANES), np.float32)
    misc[0:256, _C_CB1] = cb1
    misc[0:256, _C_CLNG] = cln_g
    misc[0:256, _C_CLNB] = cln_b
    misc[0:256, _C_CW1B0] = cw1[:, D]
    misc[0:256, _C_CW1B1] = cw1[:, D + 1]
    misc[0:128, _C_CB2] = cb2
    misc[0:64, _C_CB3] = cb3
    misc[0:64, _C_CW4] = cw4[0]
    misc[0:H, _C_B1E] = b1e
    misc[0:H, _C_W2] = aw2[0]
    misc[0:D, _C_LNG] = ln_g
    misc[0:D, _C_LNB] = ln_b
    misc[0, _C_AB2] = ab2[0]
    misc[0, _C_CB4] = cb4[0]

    # f32 reference copies (bf16-rounded where the kernel feeds the MXU in bf16),
    # keeping the original (unfolded) module structure.
    ref = dict(ln_g=ln_g, ln_b=ln_b,
               aw1=_bf16_round(aw1), ab1=ab1, aw2=aw2, ab2=ab2,
               cw1=np.concatenate([_bf16_round(cw1[:, :D]), cw1[:, D:]], axis=1), cb1=cb1,
               cln_g=cln_g, cln_b=cln_b,
               cw2=_bf16_round(cw2), cb2=cb2, cw3=_bf16_round(cw3), cb3=cb3,
               cw4=cw4, cb4=cb4)

    return {"D": D, "H": H,
            "wslab": jnp.asarray(wslab, jnp.bfloat16),   # MXU operands (bf16, lane-dense)
            "misc": jnp.asarray(misc, jnp.float32),      # LN params / biases / VPU vectors
            "ref": ref}


# ----------------------------------------------------------------------------
# Host-side wrappers
# ----------------------------------------------------------------------------
def edge_selection(query_mask, origin_p, chosen_query):
    # TODO(synk): `edge_selection` is external to the reference module and not defined in its
    # source; stand-in = edges not yet selected (mask == False) and not equal to chosen_query.
    return [i for i, m in enumerate(query_mask)
            if (not m) and (chosen_query is None or i != chosen_query)]


def _build_state_glue(feats_np, query_mask, possible, D):
    E = feats_np.shape[0]
    assert feats_np.shape[1] == D and E <= 125, "kernel supports up to 125 edges"
    g = np.zeros((META_ROWS + D, LANES), np.float32)
    g[0, :] = -2.0                                               # pad lanes
    g[0, :len(possible)] = np.asarray(possible, np.float32)      # edge id, or -1 for mean cand
    g[1, :E] = np.asarray(query_mask, np.float32)
    g[2, 0] = 1.0 / E
    g[META_ROWS:META_ROWS + D, :E] = feats_np.T
    return g


def actor_critic_forward_batch(states, params, origin_p=None, chosen_queries=None):
    """Batch of (subquery_features, query_mask) states -> ONE pallas_call, grid=(B,)."""
    D, H = params["D"], params["H"]
    glue, possibles = [], []
    for i, (feats, qmask) in enumerate(states):
        cq = None if chosen_queries is None else chosen_queries[i]
        possible = edge_selection(list(qmask), origin_p, cq)
        if cq is not None:
            possible = possible + [-1]
        assert possible, "no possible edges"
        feats_np = np.asarray(feats, np.float32)
        glue.append(_build_state_glue(feats_np, list(qmask), possible, D))
        possibles.append(possible)
    out = _pallas_forward(D, H, jnp.asarray(np.stack(glue)),
                          params["wslab"], params["misc"])
    values = [out[i, 0, VALUE_LANE:VALUE_LANE + 1] for i in range(len(states))]   # each (1,)
    actions = [out[i, :, 0:len(p)] for i, p in enumerate(possibles)]              # each (1, P_i)
    return values, actions, possibles


def actor_critic_forward(subquery_features, query_mask, origin_p, params, chosen_query=None):
    """Single-state forward matching actor_critic.forward semantics."""
    values, actions, possibles = actor_critic_forward_batch(
        [(subquery_features, query_mask)], params, origin_p,
        None if chosen_query is None else [chosen_query])
    return values[0], actions[0], possibles[0]


# ----------------------------------------------------------------------------
# Pure numpy reference (mirrors the PyTorch module) for validation.
# ----------------------------------------------------------------------------
def _layernorm_np(x, g, b, eps=LN_EPS):
    mu = x.mean(-1, keepdims=True)
    var = ((x - mu) ** 2).mean(-1, keepdims=True)
    return (x - mu) / np.sqrt(var + eps) * g + b


def _reference_forward(feats, query_mask, possible, ref):
    feats = np.asarray(feats, np.float32)
    E = feats.shape[0]
    valid = [e for e in possible if e != -1]
    rows = []
    for eid in possible:
        if eid == -1:
            feat = feats[valid].mean(0) if valid else np.full_like(feats[0], 1e-6)
        else:
            feat = feats[eid]
        rows.append(feat)
    a = _layernorm_np(np.stack(rows), ref["ln_g"], ref["ln_b"])
    h = np.maximum(a @ ref["aw1"].T + ref["ab1"], 0.0)
    logits = (h @ ref["aw2"].T + ref["ab2"]).T                   # [1, P]
    z = logits - logits.max()
    probs = np.exp(z) / np.exp(z).sum()
    selected = [i for i, m in enumerate(query_mask) if m]
    smean = feats[selected].mean(0) if selected else np.zeros_like(feats[0])
    smean = _layernorm_np(smean, ref["ln_g"], ref["ln_b"])
    state = np.concatenate(
        [smean, np.asarray([len(selected) / E, len(possible) / E], np.float32)])
    c = state @ ref["cw1"].T + ref["cb1"]
    c = np.maximum(_layernorm_np(c, ref["cln_g"], ref["cln_b"]), 0.0)
    c = np.maximum(c @ ref["cw2"].T + ref["cb2"], 0.0)
    c = np.maximum(c @ ref["cw3"].T + ref["cb3"], 0.0)
    value = c @ ref["cw4"].T + ref["cb4"]
    return value, probs


# ----------------------------------------------------------------------------
if __name__ == "__main__":
    OUT_DIM = 32          # args.out_dim
    NUM_EDGES = 8

    key = jax.random.PRNGKey(0)
    k_params, k_feats = jax.random.split(key)

    params = init_params(k_params, OUT_DIM)
    feats = jax.random.normal(k_feats, (NUM_EDGES, OUT_DIM), jnp.float32)
    feats_np = np.asarray(feats)

    # --- single-state forward (matches the module's forward signature) ---
    query_mask = [True, False, True, False, False, True, False, False]
    value, origin_action, possible = actor_critic_forward(
        feats, query_mask, None, params, chosen_query=2)
    value = jax.block_until_ready(value)
    origin_action = jax.block_until_ready(origin_action)

    assert origin_action.shape == (1, len(possible))
    assert value.shape == (1,)
    ref_value, ref_probs = _reference_forward(feats_np, query_mask, possible, params["ref"])
    assert abs(float(jnp.sum(origin_action)) - 1.0) < 1e-3
    assert abs(float(value[0]) - float(ref_value[0])) < 1e-5   # zero-init last critic layer
    assert np.allclose(np.asarray(origin_action)[0], ref_probs[0], atol=2e-2)

    # --- batched forward: several states through ONE pallas_call (grid over the batch) ---
    batch_states = [
        (feats, [True, False, True, False, False, True, False, False]),
        (feats, [False] * NUM_EDGES),                            # nothing selected yet
        (feats, [True, True, False, True, False, True, True, True]),
        (feats, [True] * NUM_EDGES),                             # only the "-1" mean candidate
    ]
    chosen = [2, None, None, 0]
    vals, acts, poss_list = actor_critic_forward_batch(batch_states, params, None, chosen)
    jax.block_until_ready(vals[0])

    for i, (st, p) in enumerate(zip(batch_states, poss_list)):
        rv, rp = _reference_forward(np.asarray(st[0]), st[1], p, params["ref"])
        a = np.asarray(jax.block_until_ready(acts[i]))
        v = np.asarray(jax.block_until_ready(vals[i]))
        assert a.shape == (1, len(p))
        assert abs(float(a.sum()) - 1.0) < 1e-3
        assert np.allclose(a[0], rp[0], atol=2e-2), (i, a, rp)
        assert abs(float(v[0]) - float(rv[0])) < 1e-5

    print("KERNEL_OK")
</pallas_src>

<mosaic_0001>
module attributes {stable_mosaic.version = 11 : i64} {
  func.func @_actor_critic_kernel(%arg0: i32, %arg1: memref<1x40x128xf32, #tpu.memory_space<vmem>>, %arg2: memref<592x128xbf16, #tpu.memory_space<vmem>>, %arg3: memref<256x128xf32, #tpu.memory_space<vmem>>, %arg4: memref<1x1x128xf32, #tpu.memory_space<vmem>>) attributes {dimension_semantics = [#tpu.dimension_semantics<parallel>], iteration_bounds = array<i64: 1>, scalar_prefetch = 0 : i64, scratch_operands = 0 : i64, tpu.core_type = #tpu.core_type<tc>, window_params = [{transform_indices = @transform_0, window_bounds = array<i64: 1, 40, 128>}, {pipeline_mode = #tpu.pipeline_mode<synchronous>, transform_indices = @transform_1, window_bounds = array<i64: 592, 128>}, {pipeline_mode = #tpu.pipeline_mode<synchronous>, transform_indices = @transform_2, window_bounds = array<i64: 256, 128>}, {transform_indices = @transform_3, window_bounds = array<i64: 1, 1, 128>}]} {
    %c0 = arith.constant 0 : index
    %c0_0 = arith.constant 0 : index
    %c0_1 = arith.constant 0 : index
    %0 = vector.load %arg1[%c0, %c0_0, %c0_1] : memref<1x40x128xf32, #tpu.memory_space<vmem>>, vector<1x1x128xf32>
    %1 = vector.shape_cast %0 : vector<1x1x128xf32> to vector<1x128xf32>
    %c0_2 = arith.constant 0 : index
    %c1 = arith.constant 1 : index
    %c0_3 = arith.constant 0 : index
    %2 = vector.load %arg1[%c0_2, %c1, %c0_3] : memref<1x40x128xf32, #tpu.memory_space<vmem>>, vector<1x1x128xf32>
    %3 = vector.shape_cast %2 : vector<1x1x128xf32> to vector<1x128xf32>
    %c0_4 = arith.constant 0 : index
    %c2 = arith.constant 2 : index
    %c0_5 = arith.constant 0 : index
    %4 = vector.load %arg1[%c0_4, %c2, %c0_5] : memref<1x40x128xf32, #tpu.memory_space<vmem>>, vector<1x1x1xf32>
    %5 = vector.shape_cast %4 : vector<1x1x1xf32> to vector<1x1xf32>
    %c0_6 = arith.constant 0 : index
    %c8 = arith.constant 8 : index
    %c0_7 = arith.constant 0 : index
    %6 = vector.load %arg1[%c0_6, %c8, %c0_7] : memref<1x40x128xf32, #tpu.memory_space<vmem>>, vector<1x32x128xf32>
    %7 = vector.shape_cast %6 : vector<1x32x128xf32> to vector<32x128xf32>
    %8 = arith.fptosi %1 : vector<1x128xf32> to vector<1x128xi32>
    %c-1_i32 = arith.constant -1 : i32
    %9 = vector.broadcast %c-1_i32 : i32 to vector<1x128xi32>
    %10 = arith.cmpi sge, %8, %9 : vector<1x128xi32>
    %c-1_i32_8 = arith.constant -1 : i32
    %11 = vector.broadcast %c-1_i32_8 : i32 to vector<1x128xi32>
    %12 = arith.cmpi eq, %8, %11 : vector<1x128xi32>
    %13 = arith.extui %12 : vector<1x128xi1> to vector<1x128xi32>
    %14 = arith.sitofp %13 : vector<1x128xi32> to vector<1x128xf32>
    %15 = tpu.iota {dimensions = array<i32: 0>} : vector<128x128xi32>
    %16 = vector.broadcast %8 : vector<1x128xi32> to vector<128x128xi32>
    %17 = arith.cmpi eq, %16, %15 : vector<128x128xi32>
    %18 = arith.extui %17 : vector<128x128xi1> to vector<128x128xi32>
    %19 = arith.sitofp %18 : vector<128x128xi32> to vector<128x128xf32>
    %cst = arith.constant dense<0xFF800000> : vector<128xf32>
    %20 = vector.multi_reduction <maximumf>, %19, %cst [1] : vector<128x128xf32> to vector<128xf32>
    %21 = vector.shape_cast %20 : vector<128xf32> to vector<128x1xf32>
    %cst_9 = arith.constant dense<0.000000e+00> : vector<1xf32>
    %22 = vector.multi_reduction <add>, %21, %cst_9 [0] : vector<128x1xf32> to vector<1xf32>
    %23 = vector.shape_cast %22 : vector<1xf32> to vector<1x1xf32>
    %cst_10 = arith.constant 1.000000e+00 : f32
    %24 = vector.broadcast %cst_10 : f32 to vector<1x1xf32>
    %25 = arith.maximumf %23, %24 : vector<1x1xf32>
    %26 = vector.broadcast %25 : vector<1x1xf32> to vector<128x1xf32>
    %27 = arith.divf %21, %26 : vector<128x1xf32>
    %28 = vector.broadcast %27 : vector<128x1xf32> to vector<128x128xf32>
    %29 = vector.broadcast %14 : vector<1x128xf32> to vector<128x128xf32>
    %30 = arith.mulf %28, %29 : vector<128x128xf32>
    %31 = arith.addf %19, %30 : vector<128x128xf32>
    %cst_11 = arith.constant dense<0.000000e+00> : vector<32x128xf32>
    %32 = tpu.matmul %7, %31, %cst_11 {dimension_numbers = #tpu.dot_dimension_numbers<[1], [0], [0], [1], [0, 0, 1, 1], [], []>} : vector<32x128xf32>, vector<128x128xf32>, vector<32x128xf32> -> vector<32x128xf32>
    %cst_12 = arith.constant dense<0.000000e+00> : vector<128xf32>
    %33 = vector.multi_reduction <add>, %32, %cst_12 [0] : vector<32x128xf32> to vector<128xf32>
    %34 = vector.shape_cast %33 : vector<128xf32> to vector<1x128xf32>
    %cst_13 = arith.constant 3.200000e+01 : f32
    %35 = vector.broadcast %cst_13 : f32 to vector<1x128xf32>
    %36 = arith.divf %34, %35 : vector<1x128xf32>
    %37 = vector.broadcast %36 : vector<1x128xf32> to vector<32x128xf32>
    %38 = arith.subf %32, %37 : vector<32x128xf32>
    %39 = arith.mulf %38, %38 : vector<32x128xf32>
    %cst_14 = arith.constant dense<0.000000e+00> : vector<128xf32>
    %40 = vector.multi_reduction <add>, %39, %cst_14 [0] : vector<32x128xf32> to vector<128xf32>
    %41 = vector.shape_cast %40 : vector<128xf32> to vector<1x128xf32>
    %cst_15 = arith.constant 3.200000e+01 : f32
    %42 = vector.broadcast %cst_15 : f32 to vector<1x128xf32>
    %43 = arith.divf %41, %42 : vector<1x128xf32>
    %cst_16 = arith.constant 9.99999974E-6 : f32
    %44 = vector.broadcast %cst_16 : f32 to vector<1x128xf32>
    %45 = arith.addf %43, %44 : vector<1x128xf32>
    %46 = math.rsqrt %45 : vector<1x128xf32>
    %47 = vector.broadcast %46 : vector<1x128xf32> to vector<32x128xf32>
    %48 = arith.mulf %38, %47 : vector<32x128xf32>
    %c0_17 = arith.constant 0 : index
    %c0_18 = arith.constant 0 : index
    %49 = vector.load %arg2[%c0_17, %c0_18] : memref<592x128xbf16, #tpu.memory_space<vmem>>, vector<16x32xbf16>
    %c0_19 = arith.constant 0 : index
    %c8_20 = arith.constant 8 : index
    %50 = vector.load %arg3[%c0_19, %c8_20] : memref<256x128xf32, #tpu.memory_space<vmem>>, vector<16x1xf32>
    %51 = arith.truncf %48 : vector<32x128xf32> to vector<32x128xbf16>
    %cst_21 = arith.constant dense<0.000000e+00> : vector<16x128xf32>
    %52 = tpu.matmul %49, %51, %cst_21 {dimension_numbers = #tpu.dot_dimension_numbers<[1], [0], [0], [1], [0, 0, 1, 1], [], []>} : vector<16x32xbf16>, vector<32x128xbf16>, vector<16x128xf32> -> vector<16x128xf32>
    %53 = vector.broadcast %50 : vector<16x1xf32> to vector<16x128xf32>
    %54 = arith.addf %52, %53 : vector<16x128xf32>
    %cst_22 = arith.constant 0.000000e+00 : f32
    %55 = vector.broadcast %cst_22 : f32 to vector<16x128xf32>
    %56 = arith.maximumf %54, %55 : vector<16x128xf32>
    %c0_23 = arith.constant 0 : index
    %c9 = arith.constant 9 : index
    %57 = vector.load %arg3[%c0_23, %c9] : memref<256x128xf32, #tpu.memory_space<vmem>>, vector<16x1xf32>
    %c0_24 = arith.constant 0 : index
    %c12 = arith.constant 12 : index
    %58 = vector.load %arg3[%c0_24, %c12] : memref<256x128xf32, #tpu.memory_space<vmem>>, vector<1x1xf32>
    %59 = vector.broadcast %57 : vector<16x1xf32> to vector<16x128xf32>
    %60 = arith.mulf %59, %56 : vector<16x128xf32>
    %cst_25 = arith.constant dense<0.000000e+00> : vector<128xf32>
    %61 = vector.multi_reduction <add>, %60, %cst_25 [0] : vector<16x128xf32> to vector<128xf32>
    %62 = vector.shape_cast %61 : vector<128xf32> to vector<1x128xf32>
    %63 = vector.broadcast %58 : vector<1x1xf32> to vector<1x128xf32>
    %64 = arith.addf %62, %63 : vector<1x128xf32>
    %cst_26 = arith.constant -1.000000e+30 : f32
    %65 = vector.broadcast %cst_26 : f32 to vector<1x128xf32>
    %66 = arith.select %10, %64, %65 : vector<1x128xi1>, vector<1x128xf32>
    %cst_27 = arith.constant dense<0xFF800000> : vector<1xf32>
    %67 = vector.multi_reduction <maximumf>, %66, %cst_27 [1] : vector<1x128xf32> to vector<1xf32>
    %68 = vector.shape_cast %67 : vector<1xf32> to vector<1x1xf32>
    %69 = vector.broadcast %68 : vector<1x1xf32> to vector<1x128xf32>
    %70 = arith.subf %66, %69 : vector<1x128xf32>
    %71 = math.exp %70 : vector<1x128xf32>
    %cst_28 = arith.constant 0.000000e+00 : f32
    %72 = vector.broadcast %cst_28 : f32 to vector<1x128xf32>
    %73 = arith.select %10, %71, %72 : vector<1x128xi1>, vector<1x128xf32>
    %cst_29 = arith.constant dense<0.000000e+00> : vector<1xf32>
    %74 = vector.multi_reduction <add>, %73, %cst_29 [1] : vector<1x128xf32> to vector<1xf32>
    %75 = vector.shape_cast %74 : vector<1xf32> to vector<1x1xf32>
    %76 = vector.broadcast %75 : vector<1x1xf32> to vector<1x128xf32>
    %77 = arith.divf %73, %76 : vector<1x128xf32>
    %cst_30 = arith.constant dense<0.000000e+00> : vector<1xf32>
    %78 = vector.multi_reduction <add>, %3, %cst_30 [1] : vector<1x128xf32> to vector<1xf32>
    %79 = vector.shape_cast %78 : vector<1xf32> to vector<1x1xf32>
    %80 = vector.broadcast %3 : vector<1x128xf32> to vector<32x128xf32>
    %81 = arith.mulf %7, %80 : vector<32x128xf32>
    %cst_31 = arith.constant dense<0.000000e+00> : vector<32xf32>
    %82 = vector.multi_reduction <add>, %81, %cst_31 [1] : vector<32x128xf32> to vector<32xf32>
    %83 = vector.shape_cast %82 : vector<32xf32> to vector<32x1xf32>
    %cst_32 = arith.constant 1.000000e+00 : f32
    %84 = vector.broadcast %cst_32 : f32 to vector<1x1xf32>
    %85 = arith.maximumf %79, %84 : vector<1x1xf32>
    %86 = vector.broadcast %85 : vector<1x1xf32> to vector<32x1xf32>
    %87 = arith.divf %83, %86 : vector<32x1xf32>
    %cst_33 = arith.constant dense<0.000000e+00> : vector<1xf32>
    %88 = vector.multi_reduction <add>, %87, %cst_33 [0] : vector<32x1xf32> to vector<1xf32>
    %89 = vector.shape_cast %88 : vector<1xf32> to vector<1x1xf32>
    %cst_34 = arith.constant 3.200000e+01 : f32
    %90 = vector.broadcast %cst_34 : f32 to vector<1x1xf32>
    %91 = arith.divf %89, %90 : vector<1x1xf32>
    %92 = vector.broadcast %91 : vector<1x1xf32> to vector<32x1xf32>
    %93 = arith.subf %87, %92 : vector<32x1xf32>
    %94 = arith.mulf %93, %93 : vector<32x1xf32>
    %cst_35 = arith.constant dense<0.000000e+00> : vector<1xf32>
    %95 = vector.multi_reduction <add>, %94, %cst_35 [0] : vector<32x1xf32> to vector<1xf32>
    %96 = vector.shape_cast %95 : vector<1xf32> to vector<1x1xf32>
    %cst_36 = arith.constant 3.200000e+01 : f32
    %97 = vector.broadcast %cst_36 : f32 to vector<1x1xf32>
    %98 = arith.divf %96, %97 : vector<1x1xf32>
    %c0_37 = arith.constant 0 : index
    %c10 = arith.constant 10 : index
    %99 = vector.load %arg3[%c0_37, %c10] : memref<256x128xf32, #tpu.memory_space<vmem>>, vector<32x1xf32>
    %c0_38 = arith.constant 0 : index
    %c11 = arith.constant 11 : index
    %100 = vector.load %arg3[%c0_38, %c11] : memref<256x128xf32, #tpu.memory_space<vmem>>, vector<32x1xf32>
    %cst_39 = arith.constant 9.99999974E-6 : f32
    %101 = vector.broadcast %cst_39 : f32 to vector<1x1xf32>
    %102 = arith.addf %98, %101 : vector<1x1xf32>
    %103 = math.rsqrt %102 : vector<1x1xf32>
    %104 = vector.broadcast %103 : vector<1x1xf32> to vector<32x1xf32>
    %105 = arith.mulf %93, %104 : vector<32x1xf32>
    %106 = arith.mulf %105, %99 : vector<32x1xf32>
    %107 = arith.addf %106, %100 : vector<32x1xf32>
    %108 = arith.extui %10 : vector<1x128xi1> to vector<1x128xi32>
    %109 = arith.sitofp %108 : vector<1x128xi32> to vector<1x128xf32>
    %cst_40 = arith.constant dense<0.000000e+00> : vector<1xf32>
    %110 = vector.multi_reduction <add>, %109, %cst_40 [1] : vector<1x128xf32> to vector<1xf32>
    %111 = vector.shape_cast %110 : vector<1xf32> to vector<1x1xf32>
    %112 = arith.mulf %79, %5 : vector<1x1xf32>
    %113 = arith.mulf %111, %5 : vector<1x1xf32>
    %c16 = arith.constant 16 : index
    %c0_41 = arith.constant 0 : index
    %114 = vector.load %arg2[%c16, %c0_41] : memref<592x128xbf16, #tpu.memory_space<vmem>>, vector<256x32xbf16>
    %115 = arith.truncf %107 : vector<32x1xf32> to vector<32x1xbf16>
    %cst_42 = arith.constant dense<0.000000e+00> : vector<256x1xf32>
    %116 = tpu.matmul %114, %115, %cst_42 {dimension_numbers = #tpu.dot_dimension_numbers<[1], [0], [0], [1], [0, 0, 1, 1], [], []>} : vector<256x32xbf16>, vector<32x1xbf16>, vector<256x1xf32> -> vector<256x1xf32>
    %c0_43 = arith.constant 0 : index
    %c0_44 = arith.constant 0 : index
    %117 = vector.load %arg3[%c0_43, %c0_44] : memref<256x128xf32, #tpu.memory_space<vmem>>, vector<256x1xf32>
    %118 = arith.addf %116, %117 : vector<256x1xf32>
    %c0_45 = arith.constant 0 : index
    %c3 = arith.constant 3 : index
    %119 = vector.load %arg3[%c0_45, %c3] : memref<256x128xf32, #tpu.memory_space<vmem>>, vector<256x1xf32>
    %120 = vector.broadcast %112 : vector<1x1xf32> to vector<256x1xf32>
    %121 = arith.mulf %120, %119 : vector<256x1xf32>
    %122 = arith.addf %118, %121 : vector<256x1xf32>
    %c0_46 = arith.constant 0 : index
    %c4 = arith.constant 4 : index
    %123 = vector.load %arg3[%c0_46, %c4] : memref<256x128xf32, #tpu.memory_space<vmem>>, vector<256x1xf32>
    %124 = vector.broadcast %113 : vector<1x1xf32> to vector<256x1xf32>
    %125 = arith.mulf %124, %123 : vector<256x1xf32>
    %126 = arith.addf %122, %125 : vector<256x1xf32>
    %cst_47 = arith.constant dense<0.000000e+00> : vector<1xf32>
    %127 = vector.multi_reduction <add>, %126, %cst_47 [0] : vector<256x1xf32> to vector<1xf32>
    %128 = vector.shape_cast %127 : vector<1xf32> to vector<1x1xf32>
    %cst_48 = arith.constant 2.560000e+02 : f32
    %129 = vector.broadcast %cst_48 : f32 to vector<1x1xf32>
    %130 = arith.divf %128, %129 : vector<1x1xf32>
    %131 = vector.broadcast %130 : vector<1x1xf32> to vector<256x1xf32>
    %132 = arith.subf %126, %131 : vector<256x1xf32>
    %133 = arith.mulf %132, %132 : vector<256x1xf32>
    %cst_49 = arith.constant dense<0.000000e+00> : vector<1xf32>
    %134 = vector.multi_reduction <add>, %133, %cst_49 [0] : vector<256x1xf32> to vector<1xf32>
    %135 = vector.shape_cast %134 : vector<1xf32> to vector<1x1xf32>
    %cst_50 = arith.constant 2.560000e+02 : f32
    %136 = vector.broadcast %cst_50 : f32 to vector<1x1xf32>
    %137 = arith.divf %135, %136 : vector<1x1xf32>
    %cst_51 = arith.constant 9.99999974E-6 : f32
    %138 = vector.broadcast %cst_51 : f32 to vector<1x1xf32>
    %139 = arith.addf %137, %138 : vector<1x1xf32>
    %140 = math.rsqrt %139 : vector<1x1xf32>
    %141 = vector.broadcast %140 : vector<1x1xf32> to vector<256x1xf32>
    %142 = arith.mulf %132, %141 : vector<256x1xf32>
    %c0_52 = arith.constant 0 : index
    %c1_53 = arith.constant 1 : index
    %143 = vector.load %arg3[%c0_52, %c1_53] : memref<256x128xf32, #tpu.memory_space<vmem>>, vector<256x1xf32>
    %144 = arith.mulf %142, %143 : vector<256x1xf32>
    %c0_54 = arith.constant 0 : index
    %c2_55 = arith.constant 2 : index
    %145 = vector.load %arg3[%c0_54, %c2_55] : memref<256x128xf32, #tpu.memory_space<vmem>>, vector<256x1xf32>
    %146 = arith.addf %144, %145 : vector<256x1xf32>
    %cst_56 = arith.constant 0.000000e+00 : f32
    %147 = vector.broadcast %cst_56 : f32 to vector<256x1xf32>
    %148 = arith.maximumf %146, %147 : vector<256x1xf32>
    %149 = arith.truncf %148 : vector<256x1xf32> to vector<256x1xbf16>
    %c272 = arith.constant 272 : index
    %c0_57 = arith.constant 0 : index
    %150 = vector.load %arg2[%c272, %c0_57] : memref<592x128xbf16, #tpu.memory_space<vmem>>, vector<128x128xbf16>
    %c400 = arith.constant 400 : index
    %c0_58 = arith.constant 0 : index
    %151 = vector.load %arg2[%c400, %c0_58] : memref<592x128xbf16, #tpu.memory_space<vmem>>, vector<128x128xbf16>
    %152 = vector.extract_strided_slice %149 {offsets = [0, 0], sizes = [128, 1], strides = [1, 1]} : vector<256x1xbf16> to vector<128x1xbf16>
    %cst_59 = arith.constant dense<0.000000e+00> : vector<128x1xf32>
    %153 = tpu.matmul %150, %152, %cst_59 {dimension_numbers = #tpu.dot_dimension_numbers<[1], [0], [0], [1], [0, 0, 1, 1], [], []>} : vector<128x128xbf16>, vector<128x1xbf16>, vector<128x1xf32> -> vector<128x1xf32>
    %154 = vector.extract_strided_slice %149 {offsets = [128, 0], sizes = [128, 1], strides = [1, 1]} : vector<256x1xbf16> to vector<128x1xbf16>
    %cst_60 = arith.constant dense<0.000000e+00> : vector<128x1xf32>
    %155 = tpu.matmul %151, %154, %cst_60 {dimension_numbers = #tpu.dot_dimension_numbers<[1], [0], [0], [1], [0, 0, 1, 1], [], []>} : vector<128x128xbf16>, vector<128x1xbf16>, vector<128x1xf32> -> vector<128x1xf32>
    %156 = arith.addf %153, %155 : vector<128x1xf32>
    %c0_61 = arith.constant 0 : index
    %c5 = arith.constant 5 : index
    %157 = vector.load %arg3[%c0_61, %c5] : memref<256x128xf32, #tpu.memory_space<vmem>>, vector<128x1xf32>
    %158 = arith.addf %156, %157 : vector<128x1xf32>
    %cst_62 = arith.constant 0.000000e+00 : f32
    %159 = vector.broadcast %cst_62 : f32 to vector<128x1xf32>
    %160 = arith.maximumf %158, %159 : vector<128x1xf32>
    %c528 = arith.constant 528 : index
    %c0_63 = arith.constant 0 : index
    %161 = vector.load %arg2[%c528, %c0_63] : memref<592x128xbf16, #tpu.memory_space<vmem>>, vector<64x128xbf16>
    %162 = arith.truncf %160 : vector<128x1xf32> to vector<128x1xbf16>
    %cst_64 = arith.constant dense<0.000000e+00> : vector<64x1xf32>
    %163 = tpu.matmul %161, %162, %cst_64 {dimension_numbers = #tpu.dot_dimension_numbers<[1], [0], [0], [1], [0, 0, 1, 1], [], []>} : vector<64x128xbf16>, vector<128x1xbf16>, vector<64x1xf32> -> vector<64x1xf32>
    %c0_65 = arith.constant 0 : index
    %c6 = arith.constant 6 : index
    %164 = vector.load %arg3[%c0_65, %c6] : memref<256x128xf32, #tpu.memory_space<vmem>>, vector<64x1xf32>
    %165 = arith.addf %163, %164 : vector<64x1xf32>
    %cst_66 = arith.constant 0.000000e+00 : f32
    %166 = vector.broadcast %cst_66 : f32 to vector<64x1xf32>
    %167 = arith.maximumf %165, %166 : vector<64x1xf32>
    %c0_67 = arith.constant 0 : index
    %c7 = arith.constant 7 : index
    %168 = vector.load %arg3[%c0_67, %c7] : memref<256x128xf32, #tpu.memory_space<vmem>>, vector<64x1xf32>
    %c0_68 = arith.constant 0 : index
    %c13 = arith.constant 13 : index
    %169 = vector.load %arg3[%c0_68, %c13] : memref<256x128xf32, #tpu.memory_space<vmem>>, vector<1x1xf32>
    %170 = arith.mulf %168, %167 : vector<64x1xf32>
    %cst_69 = arith.constant dense<0.000000e+00> : vector<1xf32>
    %171 = vector.multi_reduction <add>, %170, %cst_69 [0] : vector<64x1xf32> to vector<1xf32>
    %172 = vector.shape_cast %171 : vector<1xf32> to vector<1x1xf32>
    %173 = arith.addf %172, %169 : vector<1x1xf32>
    %174 = tpu.iota {dimensions = array<i32: 1>} : vector<1x128xi32>
    %c127_i32 = arith.constant 127 : i32
    %175 = vector.broadcast %c127_i32 : i32 to vector<1x128xi32>
    %176 = arith.cmpi eq, %174, %175 : vector<1x128xi32>
    %177 = vector.shape_cast %173 : vector<1x1xf32> to vector<1x1xf32>
    %178 = vector.broadcast %177 : vector<1x1xf32> to vector<1x128xf32>
    %179 = arith.select %176, %178, %77 : vector<1x128xi1>, vector<1x128xf32>
    %c0_70 = arith.constant 0 : index
    %c0_71 = arith.constant 0 : index
    %c0_72 = arith.constant 0 : index
    %180 = vector.load %arg4[%c0_70, %c0_71, %c0_72] : memref<1x1x128xf32, #tpu.memory_space<vmem>>, vector<1x1x128xf32>
    %181 = vector.shape_cast %180 : vector<1x1x128xf32> to vector<1x128xf32>
    %182 = vector.shape_cast %179 : vector<1x128xf32> to vector<1x1x128xf32>
    tpu.vector_store %arg4[%c0_70, %c0_71, %c0_72], %182 {strides = array<i32>} : memref<1x1x128xf32, #tpu.memory_space<vmem>>, vector<1x1x128xf32>,
    return
  }
  func.func @transform_0(%arg0: i32) -> (i32, i32, i32) {
    %c0_i32 = arith.constant 0 : i32
    %c0_i32_0 = arith.constant 0 : i32
    %c0_i32_1 = arith.constant 0 : i32
    return %arg0, %c0_i32, %c0_i32_0 : i32, i32, i32
  }
  func.func @transform_1(%arg0: i32) -> (i32, i32) {
    %c0_i32 = arith.constant 0 : i32
    %c0_i32_0 = arith.constant 0 : i32
    %c0_i32_1 = arith.constant 0 : i32
    return %c0_i32, %c0_i32_0 : i32, i32
  }
  func.func @transform_2(%arg0: i32) -> (i32, i32) {
    %c0_i32 = arith.constant 0 : i32
    %c0_i32_0 = arith.constant 0 : i32
    %c0_i32_1 = arith.constant 0 : i32
    return %c0_i32, %c0_i32_0 : i32, i32
  }
  func.func @transform_3(%arg0: i32) -> (i32, i32, i32) {
    %c0_i32 = arith.constant 0 : i32
    %c0_i32_0 = arith.constant 0 : i32
    %c0_i32_1 = arith.constant 0 : i32
    return %arg0, %c0_i32, %c0_i32_0 : i32, i32, i32
  }
}

</mosaic_0001>

<bundles_post_ra>
// kernel: _pallas_forward.1
= control target key start
LH: loop header
LB: loop body
LE: loop exit
PB: predicated region body
PF: predicated region fallthrough
CT: control target
= control target key end

     0   :  { %8 = vsyncpa [#allocation3], 0  ;;  %s4725_s0 = inlined_call_operand.hbm [shape: f32[1,40,128], index: 0, kind: input, shape index: {}]   ;;  %s4726_s1 = inlined_call_operand.hbm [shape: bf16[592,128], index: 1, kind: input, shape index: {}]   ;;  %s4727_s2 = inlined_call_operand.hbm [shape: f32[256,128], index: 2, kind: input, shape index: {}]   ;;  %s4728_s3 = inlined_call_operand.hbm [shape: f32[1,1,128], index: 3, kind: output, shape index: {}]  }
   0x1   :  { %9 = vsyncpa [#allocation6], 0 }
   0x2   :  { %10 = vsyncpa [#allocation4], 0  ;;  %s3083_s12 = smov [#allocation5]   ;;  %s2989_s16 = scalar_lea.hbm %s4726_s1, 4736 }
   0x3   :  { %s28_s13 = sshll.u32 %s3083_s12, 4  ;;  %p2990_p0 = scmp.ne.s32.totalorder %s4726_s1, %s2989_s16  ;;  %s29_s13 = int_to_ptr.vmem [resolvable:$true] %s28_s13 }
   0x4   :  { %p2993_p1 = scmp.lt.u32.totalorder %s2989_s16, %s4726_s1 }
   0x6   :  { %p2995_p2 = pnand %p2993_p1, %p2990_p0 }
   0x8   :  { %2998 = shalt.err (!%p2995_p2)
}
   0x9   :  { %s2999_s21 = scalar_lea.vmem %s29_s13, 4736  ;;  %p3004_p4 = scmp.lt.s32.totalorder %s29_s13, %s29_s13 }
   0xa   :  { %p3000_p3 = scmp.ne.s32.totalorder %s29_s13, %s2999_s21  ;;  %p3005_p5 = scmp.lt.s32.totalorder %s2999_s21, %s2999_s21 }
   0xc   :  { %p3006_p6 = por %p3005_p5, %p3004_p4 }
   0xe   :  { %p3007_p7 = pnand %p3006_p6, %p3000_p3 }
  0x10   :  { %3010 = shalt.err (!%p3007_p7)
}
  0x11   :  { %s3084_s22 = smov 64   ;;  %s3085_s23 = smov 4  }
  0x12   :  { %34 = dma.hbm_to_vmem [thread:$0]  %s4726_s1, 4736, %s29_s13, [#allocation6], %s3084_s22, %s3084_s22, %s3085_s23  }
  0x13   :  { %s3086_s26 = smov [#allocation2]   ;;  %s3011_s30 = scalar_lea.hbm %s4725_s0, 640 }
  0x14   :  { %s16_s27 = sshll.u32 %s3086_s26, 4  ;;  %p3012_p8 = scmp.ne.s32.totalorder %s4725_s0, %s3011_s30  ;;  %s17_s27 = int_to_ptr.vmem [resolvable:$true] %s16_s27 }
  0x15   :  { %p3015_p9 = scmp.lt.u32.totalorder %s3011_s30, %s4725_s0 }
  0x17   :  { %p3017_p10 = pnand %p3015_p9, %p3012_p8 }
  0x19   :  { %3020 = shalt.err (!%p3017_p10)
}
  0x1a   :  { %s3021_s8 = scalar_lea.vmem %s17_s27, 640  ;;  %p3026_p12 = scmp.lt.s32.totalorder %s17_s27, %s17_s27 }
  0x1b   :  { %p3022_p11 = scmp.ne.s32.totalorder %s17_s27, %s3021_s8  ;;  %p3027_p13 = scmp.lt.s32.totalorder %s3021_s8, %s3021_s8 }
  0x1d   :  { %p3028_p0 = por %p3027_p13, %p3026_p12 }
  0x1f   :  { %p3029_p1 = pnand %p3028_p0, %p3022_p11 }
  0x21   :  { %3032 = shalt.err (!%p3029_p1)
}
  0x22   :  { %s3087_s1 = smov 128   ;;  %s3088_s9 = smov 8  }
  0x23   :  { %22 = dma.hbm_to_vmem [thread:$0]  %s4725_s0, 640, %s17_s27, [#allocation3], %s3087_s1, %s3087_s1, %s3088_s9  }
  0x24   :  { %s3089_s12 = smov [#allocation7]   ;;  %s3033_s16 = scalar_lea.hbm %s4727_s2, 4096 }
  0x25   :  { %s40_s13 = sshll.u32 %s3089_s12, 4  ;;  %p3034_p2 = scmp.ne.s32.totalorder %s4727_s2, %s3033_s16  ;;  %s41_s13 = int_to_ptr.vmem [resolvable:$true] %s40_s13 }
  0x26   :  { %p3037_p3 = scmp.lt.u32.totalorder %s3033_s16, %s4727_s2 }
  0x28   :  { %p3039_p4 = pnand %p3037_p3, %p3034_p2 }
  0x2a   :  { %3042 = shalt.err (!%p3039_p4)
}
  0x2b   :  { %s3043_s21 = scalar_lea.vmem %s41_s13, 4096  ;;  %p3048_p6 = scmp.lt.s32.totalorder %s41_s13, %s41_s13 }
  0x2c   :  { %p3044_p5 = scmp.ne.s32.totalorder %s41_s13, %s3043_s21  ;;  %p3049_p7 = scmp.lt.s32.totalorder %s3043_s21, %s3043_s21 }
  0x2e   :  { %p3050_p8 = por %p3049_p7, %p3048_p6 }
  0x30   :  { %p3051_p9 = pnand %p3050_p8, %p3044_p5 }
  0x32   :  { %3054 = shalt.err (!%p3051_p9)
}
  0x33   :  { %46 = dma.hbm_to_vmem [thread:$0]  %s4727_s2, 4096, %s41_s13, [#allocation6], %s3087_s1, %s3087_s1, %s3088_s9  }
  0x34   :  { %3077 = dma.done.wait [#allocation3], 640  }
  0x35   :  { %3078 = vsyncadd [#allocation3], 4294966656 }
  0x36   :  { %3079 = dma.done.wait [#allocation6], 8832  }
  0x37   :  { %3080 = vsyncadd [#allocation6], 4294958464  ;;  %v4729_v0 = vlaneseq  ;;  %v4730_v1 = vmov 0.0   ;;  %v57_v3 = vld [vmem:[#allocation2] sm:$0x1]  ;;  %v3165_v10 = vld [vmem:[#allocation2 + $0x8] sm:$0xff] }
  0x38   :  { %2694 = vmatprep.subr.bf16.mxu1 %v4730_v1  ;;  %v2874_v6 = vtrunc.f32 %v57_v3  ;;  %2688 = vmatprep.mubr.f32.mxu0 %v3165_v10  ;;  %v58_v38 = vld [vmem:[#allocation2 + $0x1] sm:$0x1]  ;;  %v3239_v44 = vld [vmem:[#allocation2 + $0x10] sm:$0xff]  ;;  %v3241_v45 = vld [vmem:[#allocation2 + $0x18] sm:$0xff]  ;;  %s3091_s2 = smov 127   ;;  %s3092_s23 = smov 118  }
  0x39   :  { %v70_v2 = vshrl.u32 %v4729_v0, 7  ;;  %v3245_v48 = vld [vmem:[#allocation2 + $0x20] sm:$0xff]  ;;  %v3248_v50 = vld [vmem:[#allocation7] sm:$0xff]  ;;  %v3256_v52 = vld [vmem:[#allocation7 + $0x18] sm:$0xff]  ;;  %s3093_s24 = smov 125   ;;  %s3094_s25 = smov 124  }
  0x3a   :  { %v3168_v15 = vcvt.f32.s32 %v2874_v6  ;;  %v3252_v51 = vld [vmem:[#allocation7 + $0x10] sm:$0xff]  ;;  %v3258_v53 = vld [vmem:[#allocation7 + $0x8] sm:$0xff]  ;;  %s3096_s26 = smov 126   ;;  %s3098_s27 = smov 123  }
  0x3b   :  { %v3163_v4 = vsub.s32 0, %v70_v2  ;;  %v72_v5 = vadd.s32 16, %v70_v2  ;;  %v71_v7 = vadd.s32 8, %v70_v2  ;;  %v73_v8 = vadd.s32 24, %v70_v2  ;;  %s3100_s28 = smov 122   ;;  %s3102_s29 = smov 7  }
  0x3c   :  { %v74_v9 = vadd.s32 32, %v70_v2  ;;  %v75_v11 = vadd.s32 40, %v70_v2  ;;  %v76_v12 = vadd.s32 48, %v70_v2  ;;  %v77_v13 = vadd.s32 56, %v70_v2  ;;  %s3104_s30 = smov [#allocation8]  }
  0x3d   :  { %v78_v14 = vadd.s32 64, %v70_v2  ;;  %v79_v16 = vadd.s32 72, %v70_v2  ;;  %v80_v17 = vadd.s32 80, %v70_v2  ;;  %v81_v18 = vadd.s32 88, %v70_v2  ;;  %s2489_s4 = sshll.u32 %s3104_s30, 4  ;;  %s2490_s4 = int_to_ptr.vmem [resolvable:$true] %s2489_s4 }
  0x3e   :  { %v89_v19 = vrot.slane %v3168_v15, %v3163_v4  ;;  %v82_v22 = vadd.s32 96, %v70_v2  ;;  %v83_v23 = vadd.s32 104, %v70_v2  ;;  %v84_v26 = vadd.s32 112, %v70_v2  ;;  %s3055_s5 = scalar_lea.vmem %s2490_s4, 16  ;;  %s3059_s6 = scalar_lea.vmem %s2490_s4, 32 }
  0x3f   :  { %v85_v29 = vadd.s32 120, %v70_v2  ;;  %v477_v39 = vrot.slane %v58_v38, %v3163_v4  ;;  %p3056_p10 = scmp.ne.s32.totalorder %s2490_s4, %s3055_s5  ;;  %p3060_p11 = scmp.lt.s32.totalorder %s2490_s4, %s2490_s4 }
  0x40   :  { %vm90_vm0 = vcmp.eq.s32.totalorder %v89_v19, %v70_v2  ;;  %vm92_vm1 = vcmp.eq.s32.totalorder %v89_v19, %v72_v5  ;;  %vm91_vm2 = vcmp.eq.s32.totalorder %v89_v19, %v71_v7  ;;  %vm93_vm3 = vcmp.eq.s32.totalorder %v89_v19, %v73_v8  ;;  %p3061_p12 = scmp.lt.s32.totalorder %s3059_s6, %s3055_s5 }
  0x41   :  { %v3173_v20 = vsel %vm90_vm0, 1.0, %v4730_v1  ;;  %v3176_v21 = vsel %vm92_vm1, 1.0, %v4730_v1  ;;  %vm94_vm4 = vcmp.eq.s32.totalorder %v89_v19, %v74_v9  ;;  %vm95_vm5 = vcmp.eq.s32.totalorder %v89_v19, %v75_v11 }
  0x42   :  { %138 = vmax.xlane.f32.xlu0 %v3173_v20  ;;  %142 = vmax.xlane.f32.xlu1 %v3176_v21  ;;  %v3181_v24 = vsel %vm91_vm2, 1.0, %v4730_v1  ;;  %v3184_v25 = vsel %vm93_vm3, 1.0, %v4730_v1  ;;  %vm96_vm6 = vcmp.eq.s32.totalorder %v89_v19, %v76_v12  ;;  %vm97_vm7 = vcmp.eq.s32.totalorder %v89_v19, %v77_v13  ;;  %p3062_p13 = por %p3061_p12, %p3060_p11 }
  0x43   :  { %vm98_vm8 = vcmp.eq.s32.totalorder %v89_v19, %v78_v14  ;;  %vm99_vm9 = vcmp.eq.s32.totalorder %v89_v19, %v79_v16  ;;  %vm100_vm10 = vcmp.eq.s32.totalorder %v89_v19, %v80_v17  ;;  %v3187_v27 = vsel %vm94_vm4, 1.0, %v4730_v1 }
  0x44   :  { %v3190_v28 = vsel %vm95_vm5, 1.0, %v4730_v1  ;;  %vm101_vm11 = vcmp.eq.s32.totalorder %v89_v19, %v81_v18  ;;  %v3195_v30 = vsel %vm96_vm6, 1.0, %v4730_v1  ;;  %v3198_v31 = vsel %vm97_vm7, 1.0, %v4730_v1  ;;  %p3063_p0 = pnand %p3062_p13, %p3056_p10 }
  0x45   :  { %vm102_vm12 = vcmp.eq.s32.totalorder %v89_v19, %v82_v22  ;;  %vm103_vm13 = vcmp.eq.s32.totalorder %v89_v19, %v83_v23  ;;  %v3201_v32 = vsel %vm98_vm8, 1.0, %v4730_v1  ;;  %v3204_v33 = vsel %vm99_vm9, 1.0, %v4730_v1 }
  0x46   :  { %140 = vmax.xlane.f32.xlu0 %v3181_v24  ;;  %144 = vmax.xlane.f32.xlu1 %v3184_v25  ;;  %v3207_v34 = vsel %vm100_vm10, 1.0, %v4730_v1  ;;  %v3210_v35 = vsel %vm101_vm11, 1.0, %v4730_v1  ;;  %v3213_v36 = vsel %vm102_vm12, 1.0, %v4730_v1  ;;  %v3216_v37 = vsel %vm103_vm13, 1.0, %v4730_v1 }
  0x47   :  { %vm104_vm14 = vcmp.eq.s32.totalorder %v89_v19, %v84_v26  ;;  %vm105_vm15 = vcmp.eq.s32.totalorder %v89_v19, %v85_v29  ;;  %vm458_vm0 = vcmask 1040384   ;;  %v478_v42 = vmul.f32 %v477_v39, %v3165_v10 }
  0x48   :  { %v3230_v40 = vsel %vm104_vm14, 1.0, %v4730_v1  ;;  %v3233_v41 = vsel %vm105_vm15, 1.0, %v4730_v1  ;;  %v471_v43 = vsel %vm458_vm0, %v58_v38, 0.0  ;;  %v479_v46 = vmul.f32 %v477_v39, %v3239_v44 }
  0x49   :  { %v480_v47 = vmul.f32 %v477_v39, %v3241_v45  ;;  %v481_v49 = vmul.f32 %v477_v39, %v3245_v48  ;;  %vm66_vm1 = vcmp.eq.s32.totalorder %v3168_v15, 4294967295  ;;  %vm65_vm2 = vcmp.ge.s32.totalorder %v3168_v15, 4294967295 }
  0x4a   :  { %146 = vmax.xlane.f32.xlu0 %v3187_v27  ;;  %148 = vmax.xlane.f32.xlu1 %v3190_v28  ;;  %vm3095_vm3 = vmmov 0   ;;  %vm386_vm4 = vcmask 261120   ;;  %vm1292_vm5 = vcmask 7168   ;;  %vm2447_vm6 = vcmask 64568  }
  0x4b   :  { %2698 = vmatprep.mubr.msk.bf16.mxu1 %vm3095_vm3, %v4730_v1 }
  0x4e   :  { %150 = vmax.xlane.f32.xlu0 %v3195_v30  ;;  %152 = vmax.xlane.f32.xlu1 %v3198_v31 }
  0x52   :  { %154 = vmax.xlane.f32.xlu0 %v3201_v32  ;;  %156 = vmax.xlane.f32.xlu1 %v3204_v33 }
  0x56   :  { %158 = vmax.xlane.f32.xlu0 %v3207_v34  ;;  %160 = vmax.xlane.f32.xlu1 %v3210_v35 }
  0x5a   :  { %162 = vmax.xlane.f32.xlu0 %v3213_v36  ;;  %164 = vmax.xlane.f32.xlu1 %v3216_v37 }
  0x5e   :  { %166 = vmax.xlane.f32.xlu0 %v3230_v40  ;;  %168 = vmax.xlane.f32.xlu1 %v3233_v41 }
  0x62   :  { %472 = vadd.xlane.f32.xlu0 %v471_v43  ;;  %482 = vadd.xlane.f32.xlu1 %v478_v42 }
  0x66   :  { %484 = vadd.xlane.f32.xlu0 %v479_v46  ;;  %486 = vadd.xlane.f32.xlu1 %v480_v47 }
  0x6a   :  { %488 = vadd.xlane.f32.xlu0 %v481_v49 }
  0x77   :  { %546 = vrot.lane.b32.xlu1 %v3248_v50, %s3091_s2 }
  0x7b   :  { %550 = vrot.lane.b32.xlu1 %v3252_v51, %s3091_s2 }
  0x7f   :  { %552 = vrot.lane.b32.xlu1 %v3256_v52, %s3091_s2 }
  0x80   :  { %548 = vrot.lane.b32.xlu0 %v3258_v53, %s3091_s2 }
  0xcf   :  { %v139_v54 = vpop.xlane.xlu0 %138  ;;  %v3264_v55 = vpop.xlane.xlu1 %142 }
  0xd3   :  { %v141_v56 = vpop.xlane.xlu0 %140  ;;  %v145_v57 = vpop.xlane.xlu1 %144 }
  0xd4   :  { %v170_v58 = vadd.f32 %v141_v56, %v139_v54 }
  0xd6   :  { %v171_v59 = vadd.f32 %v170_v58, %v3264_v55 }
  0xd7   :  { %v147_v60 = vpop.xlane.xlu0 %146  ;;  %v149_v61 = vpop.xlane.xlu1 %148 }
  0xd8   :  { %v172_v62 = vadd.f32 %v171_v59, %v145_v57 }
  0xda   :  { %v173_v63 = vadd.f32 %v172_v62, %v147_v60 }
  0xdb   :  { %v3267_v2 = vpop.xlane.xlu0 %150  ;;  %v3269_v3 = vpop.xlane.xlu1 %152 }
  0xdc   :  { %v174_v5 = vadd.f32 %v173_v63, %v149_v61 }
  0xde   :  { %v175_v6 = vadd.f32 %v174_v5, %v3267_v2 }
  0xdf   :  { %v3272_v7 = vpop.xlane.xlu0 %154  ;;  %v3274_v8 = vpop.xlane.xlu1 %156 }
  0xe0   :  { %v176_v9 = vadd.f32 %v175_v6, %v3269_v3 }
  0xe2   :  { %v177_v10 = vadd.f32 %v176_v9, %v3272_v7 }
  0xe3   :  { %v3278_v11 = vpop.xlane.xlu0 %158  ;;  %v3280_v12 = vpop.xlane.xlu1 %160 }
  0xe4   :  { %v178_v13 = vadd.f32 %v177_v10, %v3274_v8 }
  0xe6   :  { %v179_v14 = vadd.f32 %v178_v13, %v3278_v11 }
  0xe7   :  { %v3284_v16 = vpop.xlane.xlu0 %162  ;;  %v3286_v17 = vpop.xlane.xlu1 %164 }
  0xe8   :  { %v180_v18 = vadd.f32 %v179_v14, %v3280_v12 }
  0xea   :  { %v181_v19 = vadd.f32 %v180_v18, %v3284_v16 }
  0xeb   :  { %v3290_v22 = vpop.xlane.xlu0 %166  ;;  %v3293_v26 = vpop.xlane.xlu1 %168 }
  0xec   :  { %v182_v23 = vadd.f32 %v181_v19, %v3286_v17 }
  0xee   :  { %v183_v29 = vadd.f32 %v182_v23, %v3290_v22 }
  0xef   :  { %v3296_v38 = vpop.xlane.xlu0 %472  ;;  %v483_v58 = vpop.xlane.xlu1 %482 }
  0xf0   :  { %v184_v39 = vadd.f32 %v183_v29, %v3293_v26  ;;  %v490_v42 = vmax.f32 %v3296_v38, 1.0 }
  0xf2   :  { %v185_v43 = vrot.slane %v184_v39, 4  ;;  %v494_v46 = vrot.slane %v490_v42, %v3163_v4 }
  0xf3   :  { %v485_v62 = vpop.xlane.xlu0 %484  ;;  %v487_v6 = vpop.xlane.xlu1 %486 }
  0xf4   :  { %v186_v47 = vadd.f32 %v185_v43, %v184_v39  ;;  %2941 = vrcp.f32 %v494_v46  ;;  %v2499_v43 = vsel %vm66_vm1, 1.0, %v4730_v1 }
  0xf6   :  { %v187_v49 = vrot.slane %v186_v47, 2 }
  0xf7   :  { %v489_v13 = vpop.xlane.xlu0 %488 }
  0xf8   :  { %v188_v59 = vadd.f32 %v187_v49, %v186_v47  ;;  %v3304_v47 = vrot.slane %v2499_v43, %v3163_v4 }
  0xfa   :  { %v189_v63 = vrot.slane %v188_v59, 1 }
  0xfc   :  { %v190_v5 = vadd.f32 %v189_v63, %v188_v59 }
  0xfe   :  { %v2942_v9 = vpop.eup %2941  ;;  %v191_v10 = vmax.f32 %v190_v5, 1.0 }
  0xff   :  { %v496_v14 = vmul.f32 %v2942_v9, %v483_v58  ;;  %v497_v18 = vmul.f32 %v2942_v9, %v485_v62  ;;  %v498_v19 = vmul.f32 %v2942_v9, %v487_v6  ;;  %v499_v29 = vmul.f32 %v2942_v9, %v489_v13 }
 0x100   :  { %2943 = vrcp.f32 %v191_v10 }
 0x101   :  { %v500_v23 = vadd.f32 %v497_v18, %v496_v14 }
 0x103   :  { %v501_v39 = vadd.f32 %v500_v23, %v498_v19 }
 0x105   :  { %v502_v42 = vadd.f32 %v501_v39, %v499_v29 }
 0x107   :  { %v503_v46 = vrot.slane %v502_v42, 4 }
 0x109   :  { %v504_v49 = vadd.f32 %v503_v46, %v502_v42 }
 0x10a   :  { %v3306_v59 = vpop.eup %2943 }
 0x10b   :  { %v505_v63 = vrot.slane %v504_v49, 2  ;;  %v193_v58 = vmul.f32 %v3306_v59, %v139_v54  ;;  %v194_v62 = vmul.f32 %v3306_v59, %v141_v56  ;;  %v195_v5 = vmul.f32 %v3306_v59, %v3264_v55 }
 0x10c   :  { %v196_v6 = vmul.f32 %v3306_v59, %v145_v57  ;;  %v197_v9 = vmul.f32 %v3306_v59, %v147_v60  ;;  %v198_v10 = vmul.f32 %v3306_v59, %v149_v61  ;;  %v199_v61 = vmul.f32 %v3306_v59, %v3267_v2 }
 0x10d   :  { %v506_v13 = vadd.f32 %v505_v63, %v504_v49  ;;  %v213_v23 = vmul.f32 %v3304_v47, %v193_v58  ;;  %v214_v39 = vmul.f32 %v3304_v47, %v194_v62  ;;  %v215_v42 = vmul.f32 %v3304_v47, %v195_v5 }
 0x10e   :  { %v216_v54 = vmul.f32 %v3304_v47, %v196_v6  ;;  %v217_v56 = vmul.f32 %v3304_v47, %v197_v9  ;;  %v218_v43 = vmul.f32 %v3304_v47, %v198_v10  ;;  %v200_v6 = vmul.f32 %v3306_v59, %v3269_v3 }
 0x10f   :  { %v507_v55 = vrot.slane %v506_v13, 1  ;;  %v229_v57 = vadd.f32 %v3173_v20, %v213_v23  ;;  %v230_v60 = vadd.f32 %v3181_v24, %v214_v39  ;;  %v231_v46 = vadd.f32 %v3176_v21, %v215_v42 }
 0x110   :  { %v232_v49 = vadd.f32 %v3184_v25, %v216_v54  ;;  %v233_v63 = vadd.f32 %v3187_v27, %v217_v56  ;;  %v234_v58 = vadd.f32 %v3190_v28, %v218_v43  ;;  %v219_v20 = vmul.f32 %v3304_v47, %v199_v61 }
 0x111   :  { %v508_v62 = vadd.f32 %v507_v55, %v506_v13  ;;  %v2826_v5 = vpack.c.bf16 %v230_v60, %v229_v57  ;;  %v201_v24 = vmul.f32 %v3306_v59, %v3272_v7  ;;  %v202_v2 = vmul.f32 %v3306_v59, %v3274_v8 }
 0x112   :  { %v2830_v25 = vpack.c.bf16 %v232_v49, %v231_v46  ;;  %v220_v27 = vmul.f32 %v3304_v47, %v200_v6  ;;  %v2834_v28 = vpack.c.bf16 %v234_v58, %v233_v63  ;;  %v235_v9 = vadd.f32 %v3195_v30, %v219_v20 }
 0x113   :  { %v509_v21 = vmul.f32 0.03125, %v508_v62  ;;  %2827 = vmatprep.subr.bf16.mxu0 %v2826_v5  ;;  %v221_v7 = vmul.f32 %v3304_v47, %v201_v24  ;;  %v222_v8 = vmul.f32 %v3304_v47, %v202_v2  ;;  %v203_v39 = vmul.f32 %v3306_v59, %v3278_v11 }
 0x114   :  { %2829 = vmatpush3.bf16.msra.mxu0 %v2826_v5  ;;  %v204_v42 = vmul.f32 %v3306_v59, %v3280_v12  ;;  %v205_v43 = vmul.f32 %v3306_v59, %v3284_v16  ;;  %v207_v62 = vmul.f32 %v3306_v59, %v3290_v22 }
 0x115   :  { %v3338_v10 = vsub.f32 %v496_v14, %v509_v21  ;;  %v3340_v3 = vsub.f32 %v497_v18, %v509_v21  ;;  %v3342_v13 = vsub.f32 %v498_v19, %v509_v21  ;;  %v3344_v23 = vsub.f32 %v499_v29, %v509_v21  ;;  %2831 = vmatprep.subr.bf16.mxu0 %v2830_v25 }
 0x116   :  { %v236_v19 = vadd.f32 %v3198_v31, %v220_v27  ;;  %v237_v11 = vadd.f32 %v3201_v32, %v221_v7  ;;  %v238_v12 = vadd.f32 %v3204_v33, %v222_v8  ;;  %v223_v56 = vmul.f32 %v3304_v47, %v203_v39 }
 0x117   :  { %v514_v30 = vmul.f32 %v3338_v10, %v3338_v10  ;;  %v515_v14 = vmul.f32 %v3340_v3, %v3340_v3  ;;  %v516_v18 = vmul.f32 %v3342_v13, %v3342_v13  ;;  %v517_v29 = vmul.f32 %v3344_v23, %v3344_v23 }
 0x118   :  { %2833 = vmatpush3.bf16.msra.mxu0 %v2830_v25  ;;  %v2838_v57 = vpack.c.bf16 %v236_v19, %v235_v9  ;;  %v224_v60 = vmul.f32 %v3304_v47, %v204_v42  ;;  %v206_v31 = vmul.f32 %v3306_v59, %v3286_v17  ;;  %v208_v32 = vmul.f32 %v3306_v59, %v3293_v26  ;;  %v549_v42 = vpop.permute.xlu0 %548 }
 0x119   :  { %v518_v54 = vadd.f32 %v515_v14, %v514_v30  ;;  %2835 = vmatprep.subr.bf16.mxu0 %v2834_v28  ;;  %v2842_v46 = vpack.c.bf16 %v238_v12, %v237_v11  ;;  %v239_v33 = vadd.f32 %v3207_v34, %v223_v56  ;;  %v225_v49 = vmul.f32 %v3304_v47, %v205_v43  ;;  %v3421_v11 = vld [vmem:[#allocation7 + $0x30] sm:$0xff]  ;;  %v3425_v12 = vld [vmem:[#allocation7 + $0x28] sm:$0xff]  ;;  %v3429_v56 = vld [vmem:[#allocation7 + $0x38] sm:$0xff] }
 0x11a   :  { %v240_v16 = vadd.f32 %v3210_v35, %v224_v60  ;;  %v226_v58 = vmul.f32 %v3304_v47, %v206_v31  ;;  %v228_v5 = vmul.f32 %v3304_v47, %v208_v32  ;;  %v227_v24 = vmul.f32 %v3304_v47, %v207_v62  ;;  %v3435_v43 = vld [vmem:[#allocation7 + $0x40] sm:$0xff]  ;;  %v3453_v60 = vld [vmem:[#allocation7 + $0x58] sm:$0xff]  ;;  %v3471_v32 = vld [vmem:[#allocation7 + $0x70] sm:$0xff] }
 0x11b   :  { %v519_v55 = vadd.f32 %v518_v54, %v516_v18  ;;  %v241_v26 = vadd.f32 %v3213_v36, %v225_v49  ;;  %v3459_v31 = vld [vmem:[#allocation7 + $0x60] sm:$0xff]  ;;  %v3489_v49 = vld [vmem:[#allocation7 + $0x88] sm:$0xff] }
 0x11c   :  { %2837 = vmatpush3.bf16.msra.mxu0 %v2834_v28  ;;  %v2846_v20 = vpack.c.bf16 %v240_v16, %v239_v33  ;;  %v242_v34 = vadd.f32 %v3216_v37, %v226_v58  ;;  %v243_v22 = vadd.f32 %v3230_v40, %v227_v24  ;;  %v244_v59 = vadd.f32 %v3233_v41, %v228_v5  ;;  %v547_v37 = vpop.permute.xlu1 %546  ;;  %v3483_v33 = vld [vmem:[#allocation7 + $0x80] sm:$0xff]  ;;  %v3501_v16 = vld [vmem:[#allocation7 + $0x98] sm:$0xff]  ;;  %v3513_v62 = vld [vmem:[#allocation7 + $0xa8] sm:$0xff] }
 0x11d   :  { %v520_v61 = vadd.f32 %v519_v55, %v517_v29  ;;  %2839 = vmatprep.subr.bf16.mxu0 %v2838_v57  ;;  %v3441_v55 = vld [vmem:[#allocation7 + $0x48] sm:$0xff]  ;;  %v3507_v58 = vld [vmem:[#allocation7 + $0xa0] sm:$0xff] }
 0x11e   :  { %v2850_v21 = vpack.c.bf16 %v242_v34, %v241_v26  ;;  %v2854_v36 = vpack.c.bf16 %v244_v59, %v243_v22  ;;  %v3527_v26 = vld [vmem:[#allocation7 + $0xb8] sm:$0xff]  ;;  %v3543_v24 = vld [vmem:[#allocation7 + $0xc8] sm:$0xff] }
 0x11f   :  { %v521_v63 = vrot.slane %v520_v61, 4  ;;  %v3559_v22 = vld [vmem:[#allocation7 + $0xd8] sm:$0xff] }
 0x120   :  { %2841 = vmatpush3.bf16.msra.mxu0 %v2838_v57  ;;  %v551_v47 = vpop.permute.xlu1 %550  ;;  %v3447_v57 = vld [vmem:[#allocation7 + $0x50] sm:$0xff] }
 0x121   :  { %v522_v17 = vadd.f32 %v521_v63, %v520_v61  ;;  %2843 = vmatprep.subr.bf16.mxu0 %v2842_v46  ;;  %v3465_v61 = vld [vmem:[#allocation7 + $0x68] sm:$0xff]  ;;  %v3495_v63 = vld [vmem:[#allocation7 + $0x90] sm:$0xff] }
 0x123   :  { %v523_v6 = vrot.slane %v522_v17, 2 }
 0x124   :  { %2845 = vmatpush3.bf16.msra.mxu0 %v2842_v46  ;;  %v553_v39 = vpop.permute.xlu1 %552  ;;  %v3477_v46 = vld [vmem:[#allocation7 + $0x78] sm:$0xff] }
 0x125   :  { %v524_v35 = vadd.f32 %v523_v6, %v522_v17  ;;  %2847 = vmatprep.subr.bf16.mxu0 %v2846_v20  ;;  %v3519_v17 = vld [vmem:[#allocation7 + $0xb0] sm:$0xff] }
 0x127   :  { %v525_v2 = vrot.slane %v524_v35, 1 }
 0x128   :  { %2849 = vmatpush3.bf16.msra.mxu0 %v2846_v20  ;;  %v3535_v20 = vld [vmem:[#allocation7 + $0xc0] sm:$0xff] }
 0x129   :  { %v526_v25 = vadd.f32 %v525_v2, %v524_v35  ;;  %2851 = vmatprep.subr.bf16.mxu0 %v2850_v21  ;;  %v3551_v2 = vld [vmem:[#allocation7 + $0xd0] sm:$0xff] }
 0x12b   :  { %v527_v27 = vmul.f32 0.03125, %v526_v25  ;;  %v3567_v25 = vld [vmem:[#allocation7 + $0xe0] sm:$0xff] }
 0x12c   :  { %2853 = vmatpush3.bf16.msra.mxu0 %v2850_v21 }
 0x12d   :  { %v532_v28 = vadd.f32 1e-05, %v527_v27  ;;  %2855 = vmatprep.subr.bf16.mxu0 %v2854_v36 }
 0x12f   :  { %2945 = vrsqrt.f32 %v532_v28 }
 0x130   :  { %2857 = vmatpush3.bf16.msra.mxu0 %v2854_v36  ;;  %v3575_v36 = vld [vmem:[#allocation7 + $0xe8] sm:$0xff] }
 0x133   :  { %2689 = vmatmul.mubr.f32.vlgmr.msra.gmra.mrb[0].mxu0 %v3239_v44 }
 0x134   :  { %2691 = vmatprep.mubr.f32.mxu0 %v3241_v45 }
 0x137   :  { %2692 = vmatmul.mubr.f32.gmra.mrb[2].mxu0 %v3245_v48 }
 0x139   :  { %v2946_v40 = vpop.eup %2945 }
 0x13a   :  { %v534_v41 = vmul.f32 %v2946_v40, %v3338_v10  ;;  %v536_v9 = vmul.f32 %v2946_v40, %v3342_v13  ;;  %v537_v7 = vmul.f32 %v2946_v40, %v3344_v23  ;;  %v535_v8 = vmul.f32 %v2946_v40, %v3340_v3  ;;  %v3409_v3 = vld [vmem:[#allocation7 + $0x20] sm:$0xff]  ;;  %v3592_v40 = vld [vmem:[#allocation7 + $0xf8] sm:$0xff] }
 0x13b   :  { %v2518_v23 = vsel %vm65_vm2, 1.0, %v4730_v1 }
 0x13c   :  { %v538_v30 = vmul.f32 %v534_v41, %v3248_v50  ;;  %v540_v44 = vmul.f32 %v536_v9, %v3252_v51  ;;  %v541_v45 = vmul.f32 %v537_v7, %v3256_v52  ;;  %v539_v14 = vmul.f32 %v535_v8, %v3258_v53 }
 0x13d   :  { %v564_v54 = vsel %vm458_vm0, %v2518_v23, 0.0 }
 0x13e   :  { %v558_v48 = vadd.f32 %v547_v37, %v538_v30  ;;  %v560_v18 = vadd.f32 %v551_v47, %v540_v44  ;;  %v561_v19 = vadd.f32 %v553_v39, %v541_v45  ;;  %v559_v10 = vadd.f32 %v549_v42, %v539_v14  ;;  %v3584_v37 = vld [vmem:[#allocation7 + $0xf0] sm:$0xff] }
 0x140   :  { %v602_v29 = vpack.c.bf16 %v561_v19, %v560_v18  ;;  %v601_v13 = vpack.c.bf16 %v559_v10, %v558_v48 }
 0x142   :  { %719 = vrot.lane.b32.xlu0 %v602_v29, %s3092_s23  ;;  %717 = vrot.lane.b32.xlu1 %v601_v13, %s3092_s23 }
 0x146   :  { %968 = vrot.lane.b32.xlu0 %v3248_v50, %s3093_s24 }
 0x14a   :  { %970 = vrot.lane.b32.xlu0 %v3258_v53, %s3093_s24 }
 0x14e   :  { %972 = vrot.lane.b32.xlu0 %v3252_v51, %s3093_s24 }
 0x152   :  { %1132 = vrot.lane.b32.xlu0 %v3248_v50, %s3094_s25 }
 0x156   :  { %1134 = vrot.lane.b32.xlu0 %v3258_v53, %s3094_s25 }
 0x15a   :  { %974 = vrot.lane.b32.xlu0 %v3256_v52, %s3093_s24 }
 0x15e   :  { %1136 = vrot.lane.b32.xlu0 %v3252_v51, %s3094_s25 }
 0x162   :  { %976 = vrot.lane.b32.xlu0 %v3409_v3, %s3093_s24 }
 0x166   :  { %1138 = vrot.lane.b32.xlu0 %v3256_v52, %s3094_s25  ;;  %565 = vadd.xlane.f32.xlu1 %v564_v54 }
 0x16a   :  { %1140 = vrot.lane.b32.xlu0 %v3409_v3, %s3094_s25 }
 0x16e   :  { %980 = vrot.lane.b32.xlu0 %v3421_v11, %s3093_s24 }
 0x172   :  { %1142 = vrot.lane.b32.xlu0 %v3425_v12, %s3094_s25 }
 0x176   :  { %982 = vrot.lane.b32.xlu0 %v3429_v56, %s3093_s24 }
 0x177   :  { %978 = vrot.lane.b32.xlu1 %v3425_v12, %s3093_s24 }
 0x17a   :  { %1144 = vrot.lane.b32.xlu0 %v3421_v11, %s3094_s25 }
 0x17b   :  { %984 = vrot.lane.b32.xlu1 %v3435_v43, %s3093_s24 }
 0x17e   :  { %1146 = vrot.lane.b32.xlu0 %v3429_v56, %s3094_s25 }
 0x17f   :  { %986 = vrot.lane.b32.xlu1 %v3441_v55, %s3093_s24 }
 0x182   :  { %1148 = vrot.lane.b32.xlu0 %v3435_v43, %s3094_s25 }
 0x183   :  { %988 = vrot.lane.b32.xlu1 %v3447_v57, %s3093_s24 }
 0x186   :  { %1150 = vrot.lane.b32.xlu0 %v3441_v55, %s3094_s25 }
 0x187   :  { %990 = vrot.lane.b32.xlu1 %v3453_v60, %s3093_s24 }
 0x18a   :  { %1152 = vrot.lane.b32.xlu0 %v3447_v57, %s3094_s25 }
 0x18b   :  { %992 = vrot.lane.b32.xlu1 %v3459_v31, %s3093_s24 }
 0x18e   :  { %1154 = vrot.lane.b32.xlu0 %v3453_v60, %s3094_s25 }
 0x18f   :  { %994 = vrot.lane.b32.xlu1 %v3465_v61, %s3093_s24 }
 0x192   :  { %1156 = vrot.lane.b32.xlu0 %v3459_v31, %s3094_s25 }
 0x193   :  { %996 = vrot.lane.b32.xlu1 %v3471_v32, %s3093_s24 }
 0x196   :  { %1158 = vrot.lane.b32.xlu0 %v3465_v61, %s3094_s25 }
 0x197   :  { %998 = vrot.lane.b32.xlu1 %v3477_v46, %s3093_s24 }
 0x19a   :  { %1160 = vrot.lane.b32.xlu0 %v3471_v32, %s3094_s25 }
 0x19b   :  { %1000 = vrot.lane.b32.xlu1 %v3483_v33, %s3093_s24 }
 0x19e   :  { %1162 = vrot.lane.b32.xlu0 %v3477_v46, %s3094_s25 }
 0x19f   :  { %1002 = vrot.lane.b32.xlu1 %v3489_v49, %s3093_s24 }
 0x1a2   :  { %1164 = vrot.lane.b32.xlu0 %v3483_v33, %s3094_s25 }
 0x1a3   :  { %1004 = vrot.lane.b32.xlu1 %v3495_v63, %s3093_s24 }
 0x1a6   :  { %1166 = vrot.lane.b32.xlu0 %v3489_v49, %s3094_s25 }
 0x1a7   :  { %1006 = vrot.lane.b32.xlu1 %v3501_v16, %s3093_s24 }
 0x1aa   :  { %1168 = vrot.lane.b32.xlu0 %v3495_v63, %s3094_s25 }
 0x1ab   :  { %1008 = vrot.lane.b32.xlu1 %v3507_v58, %s3093_s24 }
 0x1ae   :  { %1170 = vrot.lane.b32.xlu0 %v3501_v16, %s3094_s25 }
 0x1af   :  { %1010 = vrot.lane.b32.xlu1 %v3513_v62, %s3093_s24 }
 0x1b2   :  { %1172 = vrot.lane.b32.xlu0 %v3507_v58, %s3094_s25 }
 0x1b3   :  { %1012 = vrot.lane.b32.xlu1 %v3519_v17, %s3093_s24 }
 0x1b4   :  { %v3525_v5 = vpop.permute.xlu0 %719  ;;  %v3630_v30 = vpop.permute.xlu1 %717 }
 0x1b6   :  { %1174 = vrot.lane.b32.xlu0 %v3513_v62, %s3094_s25 }
 0x1b7   :  { %1014 = vrot.lane.b32.xlu1 %v3527_v26, %s3093_s24 }
 0x1b8   :  { %v3533_v6 = vpop.permute.xlu0 %968 }
 0x1ba   :  { %1176 = vrot.lane.b32.xlu0 %v3519_v17, %s3094_s25 }
 0x1bb   :  { %1016 = vrot.lane.b32.xlu1 %v3535_v20, %s3093_s24 }
 0x1bc   :  { %v3541_v34 = vpop.permute.xlu0 %970 }
 0x1be   :  { %1178 = vrot.lane.b32.xlu0 %v3527_v26, %s3094_s25 }
 0x1bf   :  { %1018 = vrot.lane.b32.xlu1 %v3543_v24, %s3093_s24 }
 0x1c0   :  { %v3549_v35 = vpop.permute.xlu0 %972 }
 0x1c2   :  { %1180 = vrot.lane.b32.xlu0 %v3535_v20, %s3094_s25 }
 0x1c3   :  { %1020 = vrot.lane.b32.xlu1 %v3551_v2, %s3093_s24 }
 0x1c4   :  { %v3557_v21 = vpop.permute.xlu0 %1132 }
 0x1c6   :  { %1182 = vrot.lane.b32.xlu0 %v3543_v24, %s3094_s25 }
 0x1c7   :  { %1022 = vrot.lane.b32.xlu1 %v3559_v22, %s3093_s24 }
 0x1c8   :  { %v3565_v59 = vpop.permute.xlu0 %1134 }
 0x1ca   :  { %1184 = vrot.lane.b32.xlu0 %v3551_v2, %s3094_s25 }
 0x1cb   :  { %1024 = vrot.lane.b32.xlu1 %v3567_v25, %s3093_s24 }
 0x1cc   :  { %v3573_v27 = vpop.permute.xlu0 %974 }
 0x1ce   :  { %1186 = vrot.lane.b32.xlu0 %v3559_v22, %s3094_s25 }
 0x1cf   :  { %1026 = vrot.lane.b32.xlu1 %v3575_v36, %s3093_s24 }
 0x1d0   :  { %v3582_v28 = vpop.permute.xlu0 %1136 }
 0x1d2   :  { %1188 = vrot.lane.b32.xlu0 %v3567_v25, %s3094_s25 }
 0x1d3   :  { %1028 = vrot.lane.b32.xlu1 %v3584_v37, %s3093_s24 }
 0x1d4   :  { %v3590_v47 = vpop.permute.xlu0 %976 }
 0x1d6   :  { %1190 = vrot.lane.b32.xlu0 %v3575_v36, %s3094_s25 }
 0x1d7   :  { %1030 = vrot.lane.b32.xlu1 %v3592_v40, %s3093_s24 }
 0x1d8   :  { %v3598_v41 = vpop.permute.xlu0 %1138 }
 0x1da   :  { %1192 = vrot.lane.b32.xlu0 %v3584_v37, %s3094_s25 }
 0x1db   :  { %1194 = vrot.lane.b32.xlu1 %v3592_v40, %s3094_s25 }
 0x1dc   :  { %v3604_v9 = vpop.permute.xlu0 %1140 }
 0x1de   :  { %1564 = vrot.lane.b32.xlu0 %v3483_v33, %s3091_s2 }
 0x1df   :  { %1566 = vrot.lane.b32.xlu1 %v3489_v49, %s3091_s2 }
 0x1e0   :  { %v3610_v7 = vpop.permute.xlu0 %980 }
 0x1e2   :  { %1692 = vrot.lane.b32.xlu0 %v3483_v33, %s3096_s26 }
 0x1e3   :  { %1694 = vrot.lane.b32.xlu1 %v3489_v49, %s3096_s26 }
 0x1e4   :  { %v3616_v8 = vpop.permute.xlu0 %1142 }
 0x1e6   :  { %1568 = vrot.lane.b32.xlu0 %v3495_v63, %s3091_s2 }
 0x1e7   :  { %1570 = vrot.lane.b32.xlu1 %v3501_v16, %s3091_s2 }
 0x1e8   :  { %v3622_v39 = vpop.permute.xlu0 %982 }
 0x1ea   :  { %1696 = vrot.lane.b32.xlu0 %v3495_v63, %s3096_s26 }
 0x1eb   :  { %1698 = vrot.lane.b32.xlu1 %v3501_v16, %s3096_s26 }
 0x1ec   :  { %v3628_v42 = vpop.permute.xlu0 %1144 }
 0x1ee   :  { %1572 = vrot.lane.b32.xlu0 %v3507_v58, %s3091_s2 }
 0x1ef   :  { %1574 = vrot.lane.b32.xlu1 %v3513_v62, %s3091_s2 }
 0x1f0   :  { %v3636_v44 = vpop.permute.xlu0 %1146 }
 0x1f2   :  { %1700 = vrot.lane.b32.xlu0 %v3507_v58, %s3096_s26 }
 0x1f3   :  { %v3640_v45 = vpop.xlane.xlu1 %565  ;;  %1702 = vrot.lane.b32.xlu1 %v3513_v62, %s3096_s26 }
 0x1f4   :  { %v3644_v14 = vpop.permute.xlu0 %1148 }
 0x1f6   :  { %1576 = vrot.lane.b32.xlu0 %v3519_v17, %s3091_s2 }
 0x1f7   :  { %v3648_v48 = vpop.permute.xlu1 %978  ;;  %1578 = vrot.lane.b32.xlu1 %v3527_v26, %s3091_s2 }
 0x1f8   :  { %v3652_v18 = vpop.permute.xlu0 %1150 }
 0x1fa   :  { %1704 = vrot.lane.b32.xlu0 %v3519_v17, %s3096_s26 }
 0x1fb   :  { %v3656_v19 = vpop.permute.xlu1 %984  ;;  %1706 = vrot.lane.b32.xlu1 %v3527_v26, %s3096_s26 }
 0x1fc   :  { %v3660_v10 = vpop.permute.xlu0 %1152 }
 0x1fe   :  { %1580 = vrot.lane.b32.xlu0 %v3535_v20, %s3091_s2 }
 0x1ff   :  { %v3664_v29 = vpop.permute.xlu1 %986  ;;  %1582 = vrot.lane.b32.xlu1 %v3543_v24, %s3091_s2 }
 0x200   :  { %v3668_v13 = vpop.permute.xlu0 %1154 }
 0x202   :  { %1708 = vrot.lane.b32.xlu0 %v3535_v20, %s3096_s26 }
 0x203   :  { %v3672_v23 = vpop.permute.xlu1 %988  ;;  %1710 = vrot.lane.b32.xlu1 %v3543_v24, %s3096_s26 }
 0x204   :  { %v3676_v54 = vpop.permute.xlu0 %1156 }
 0x205   :  { %4731 = vst [vmem:[#allocation12_spill] sm:$0xff] %v3676_v54 }
 0x206   :  { %v2690_v33 = vpop.f32.mrb[0].mxu0  ;;  %1584 = vrot.lane.b32.xlu0 %v3551_v2, %s3091_s2 }
 0x207   :  { %v311_v49 = vpop.f32.mrb[1].mxu0  ;;  %v3680_v63 = vpop.permute.xlu1 %990  ;;  %1586 = vrot.lane.b32.xlu1 %v3559_v22, %s3091_s2 }
 0x208   :  { %v330_v16 = vadd.f32 %v2690_v33, %v311_v49  ;;  %v3684_v58 = vpop.permute.xlu0 %1158 }
 0x209   :  { %4732 = vst [vmem:[#allocation13_spill] sm:$0xff] %v3684_v58  ;;  %v3097_v58 = vmov 8  }
 0x20a   :  { %v2693_v62 = vpop.f32.mrb[2].mxu0  ;;  %1712 = vrot.lane.b32.xlu0 %v3551_v2, %s3096_s26  ;;  %2899 = vset.pattern.permute.xlu1 %v3097_v58 }
 0x20b   :  { %v321_v17 = vpop.f32.mrb[3].mxu0  ;;  %v3688_v26 = vpop.permute.xlu1 %992  ;;  %1714 = vrot.lane.b32.xlu1 %v3559_v22, %s3096_s26  ;;  %2898 = vset.pattern.permute.xlu0 %v3097_v58 }
 0x20c   :  { %4733 = vst [vmem:[#allocation14_spill] sm:$0xff] %v3688_v26  ;;  %v331_v20 = vadd.f32 %v330_v16, %v321_v17  ;;  %v3692_v24 = vpop.permute.xlu0 %1160 }
 0x20d   :  { %4734 = vst [vmem:[#allocation15_spill] sm:$0xff] %v3692_v24 }
 0x20e   :  { %v332_v0 = vadd.f32 %v2693_v62, %v331_v20  ;;  %1588 = vrot.lane.b32.xlu0 %v3567_v25, %s3091_s2 }
 0x20f   :  { %v3696_v1 = vpop.permute.xlu1 %994  ;;  %1590 = vrot.lane.b32.xlu1 %v3575_v36, %s3091_s2 }
 0x210   :  { %4735 = vst [vmem:[#allocation16_spill] sm:$0xff] %v3696_v1  ;;  %v333_v2 = vrot.slane %v332_v0, 4  ;;  %v3700_v54 = vpop.permute.xlu0 %1162 }
 0x211   :  { %4736 = vst [vmem:[#allocation17_spill] sm:$0xff] %v3700_v54 }
 0x212   :  { %v334_v26 = vadd.f32 %v333_v2, %v332_v0  ;;  %1716 = vrot.lane.b32.xlu0 %v3567_v25, %s3096_s26 }
 0x213   :  { %v3704_v22 = vpop.permute.xlu1 %996  ;;  %1718 = vrot.lane.b32.xlu1 %v3575_v36, %s3096_s26 }
 0x214   :  { %v335_v16 = vrot.slane %v334_v26, 2  ;;  %v3708_v20 = vpop.permute.xlu0 %1164 }
 0x215   :  { %4737 = vst [vmem:[#allocation18_spill] sm:$0xff] %v3708_v20 }
 0x216   :  { %v336_v24 = vadd.f32 %v335_v16, %v334_v26  ;;  %1592 = vrot.lane.b32.xlu0 %v3584_v37, %s3091_s2 }
 0x217   :  { %v3712_v1 = vpop.permute.xlu1 %998  ;;  %1594 = vrot.lane.b32.xlu1 %v3592_v40, %s3091_s2 }
 0x218   :  { %4738 = vst [vmem:[#allocation19_spill] sm:$0xff] %v3712_v1  ;;  %v337_v0 = vrot.slane %v336_v24, 1  ;;  %v3716_v58 = vpop.permute.xlu0 %1166 }
 0x219   :  { %4739 = vst [vmem:[#allocation20_spill] sm:$0xff] %v3716_v58 }
 0x21a   :  { %v338_v25 = vadd.f32 %v337_v0, %v336_v24  ;;  %1720 = vrot.lane.b32.xlu0 %v3584_v37, %s3096_s26 }
 0x21b   :  { %v3720_v36 = vpop.permute.xlu1 %1000  ;;  %1722 = vrot.lane.b32.xlu1 %v3592_v40, %s3096_s26 }
 0x21c   :  { %v340_v26 = vmul.f32 0.03125, %v338_v25  ;;  %v3724_v2 = vpop.permute.xlu0 %1168 }
 0x21d   :  { %4740 = vst [vmem:[#allocation21_spill] sm:$0xff] %v3724_v2 }
 0x21e   :  { %v341_v16 = vsub.f32 %v311_v49, %v340_v26  ;;  %v342_v20 = vsub.f32 %v2690_v33, %v340_v26  ;;  %v343_v54 = vsub.f32 %v321_v17, %v340_v26  ;;  %v344_v1 = vsub.f32 %v2693_v62, %v340_v26  ;;  %1532 = vrot.lane.b32.xlu0 %v3248_v50, %s3091_s2 }
 0x21f   :  { %v3728_v58 = vpop.permute.xlu1 %1002  ;;  %1534 = vrot.lane.b32.xlu1 %v3258_v53, %s3091_s2 }
 0x220   :  { %v345_v37 = vmul.f32 %v341_v16, %v341_v16  ;;  %v346_v24 = vmul.f32 %v342_v20, %v342_v20  ;;  %v3732_v0 = vpop.permute.xlu0 %1170  ;;  %v347_v40 = vmul.f32 %v343_v54, %v343_v54  ;;  %v348_v49 = vmul.f32 %v344_v1, %v344_v1 }
 0x222   :  { %v349_v25 = vadd.f32 %v346_v24, %v345_v37  ;;  %1660 = vrot.lane.b32.xlu0 %v3248_v50, %s3096_s26 }
 0x223   :  { %v3736_v33 = vpop.permute.xlu1 %1004  ;;  %1662 = vrot.lane.b32.xlu1 %v3258_v53, %s3096_s26 }
 0x224   :  { %v350_v62 = vadd.f32 %v349_v25, %v347_v40  ;;  %v3740_v17 = vpop.permute.xlu0 %1172 }
 0x226   :  { %v351_v26 = vadd.f32 %v350_v62, %v348_v49  ;;  %1536 = vrot.lane.b32.xlu0 %v3252_v51, %s3091_s2 }
 0x227   :  { %v3744_v2 = vpop.permute.xlu1 %1006  ;;  %1538 = vrot.lane.b32.xlu1 %v3256_v52, %s3091_s2 }
 0x228   :  { %v352_v37 = vrot.slane %v351_v26, 4  ;;  %v3748_v50 = vpop.permute.xlu0 %1174 }
 0x229   :  { %4741 = vst [vmem:[#allocation22_spill] sm:$0xff] %v3748_v50 }
 0x22a   :  { %v353_v24 = vadd.f32 %v352_v37, %v351_v26  ;;  %1664 = vrot.lane.b32.xlu0 %v3252_v51, %s3096_s26 }
 0x22b   :  { %v3752_v53 = vpop.permute.xlu1 %1008  ;;  %1666 = vrot.lane.b32.xlu1 %v3256_v52, %s3096_s26 }
 0x22c   :  { %v354_v40 = vrot.slane %v353_v24, 2  ;;  %v3756_v25 = vpop.permute.xlu0 %1176 }
 0x22d   :  { %4742 = vst [vmem:[#allocation23_spill] sm:$0xff] %v3756_v25 }
 0x22e   :  { %v355_v49 = vadd.f32 %v354_v40, %v353_v24  ;;  %1540 = vrot.lane.b32.xlu0 %v3409_v3, %s3091_s2 }
 0x22f   :  { %v3760_v62 = vpop.permute.xlu1 %1010  ;;  %1542 = vrot.lane.b32.xlu1 %v3425_v12, %s3091_s2 }
 0x230   :  { %4743 = vst [vmem:[#allocation24_spill] sm:$0xff] %v3760_v62  ;;  %v356_v26 = vrot.slane %v355_v49, 1  ;;  %v3764_v37 = vpop.permute.xlu0 %1178 }
 0x231   :  { %4744 = vst [vmem:[#allocation25_spill] sm:$0xff] %v3764_v37 }
 0x232   :  { %v357_v51 = vadd.f32 %v356_v26, %v355_v49  ;;  %1668 = vrot.lane.b32.xlu0 %v3409_v3, %s3096_s26 }
 0x233   :  { %v3768_v52 = vpop.permute.xlu1 %1012  ;;  %1670 = vrot.lane.b32.xlu1 %v3425_v12, %s3096_s26 }
 0x234   :  { %4745 = vst [vmem:[#allocation26_spill] sm:$0xff] %v3768_v52  ;;  %v358_v24 = vmul.f32 0.03125, %v357_v51  ;;  %v3772_v40 = vpop.permute.xlu0 %1180 }
 0x235   :  { %4746 = vst [vmem:[#allocation27_spill] sm:$0xff] %v3772_v40 }
 0x236   :  { %v359_v25 = vadd.f32 1e-05, %v358_v24  ;;  %1544 = vrot.lane.b32.xlu0 %v3421_v11, %s3091_s2 }
 0x237   :  { %v3776_v50 = vpop.permute.xlu1 %1014  ;;  %1546 = vrot.lane.b32.xlu1 %v3429_v56, %s3091_s2 }
 0x238   :  { %4747 = vst [vmem:[#allocation28_spill] sm:$0xff] %v3776_v50  ;;  %2947 = vrsqrt.f32 %v359_v25  ;;  %v3780_v49 = vpop.permute.xlu0 %1182 }
 0x239   :  { %4748 = vst [vmem:[#allocation29_spill] sm:$0xff] %v3780_v49 }
 0x23a   :  { %1672 = vrot.lane.b32.xlu0 %v3421_v11, %s3096_s26 }
 0x23b   :  { %v3784_v26 = vpop.permute.xlu1 %1016  ;;  %1674 = vrot.lane.b32.xlu1 %v3429_v56, %s3096_s26 }
 0x23c   :  { %4749 = vst [vmem:[#allocation30_spill] sm:$0xff] %v3784_v26  ;;  %v3788_v51 = vpop.permute.xlu0 %1184 }
 0x23d   :  { %4750 = vst [vmem:[#allocation31_spill] sm:$0xff] %v3788_v51 }
 0x23e   :  { %1548 = vrot.lane.b32.xlu0 %v3435_v43, %s3091_s2 }
 0x23f   :  { %v3792_v24 = vpop.permute.xlu1 %1018  ;;  %1550 = vrot.lane.b32.xlu1 %v3441_v55, %s3091_s2 }
 0x240   :  { %4751 = vst [vmem:[#allocation32_spill] sm:$0xff] %v3792_v24  ;;  %v3796_v25 = vpop.permute.xlu0 %1186 }
 0x241   :  { %4752 = vst [vmem:[#allocation33_spill] sm:$0xff] %v3796_v25 }
 0x242   :  { %v2948_v49 = vpop.eup %2947  ;;  %1676 = vrot.lane.b32.xlu0 %v3435_v43, %s3096_s26 }
 0x243   :  { %v363_v40 = vmul.f32 %v2948_v49, %v343_v54  ;;  %v3800_v26 = vpop.permute.xlu1 %1020  ;;  %v361_v37 = vmul.f32 %v2948_v49, %v341_v16  ;;  %v362_v50 = vmul.f32 %v2948_v49, %v342_v20  ;;  %v364_v51 = vmul.f32 %v2948_v49, %v344_v1  ;;  %1678 = vrot.lane.b32.xlu1 %v3441_v55, %s3096_s26  ;;  %v2904_v1 = vld [vmem:[#allocation5] sm:$0xff]   ;;  %v2906_v49 = vld [vmem:[#allocation5 + $0x10] sm:$0xff]  }
 0x244   :  { %v3804_v62 = vpop.permute.xlu0 %1188  ;;  %v4754_v54 = vmov 0.0  }
 0x245   :  { %4753 = vst [vmem:[#allocation34_spill] sm:$0xff] %v3804_v62  ;;  %v369_v24 = vpack.c.bf16 %v362_v50, %v361_v37  ;;  %v370_v52 = vpack.c.bf16 %v364_v51, %v363_v40  ;;  %v2905_v50 = vld [vmem:[#allocation5 + $0x8] sm:$0xff]  }
 0x246   :  { %1552 = vrot.lane.b32.xlu0 %v3447_v57, %s3091_s2 }
 0x247   :  { %2695 = vmatpush3.bf16.msra.mxu1 %v369_v24  ;;  %v3808_v25 = vpop.permute.xlu1 %1022  ;;  %1554 = vrot.lane.b32.xlu1 %v3453_v60, %s3091_s2 }
 0x248   :  { %2696 = vmatprep.subr.bf16.mxu1 %v4754_v54  ;;  %v3813_v20 = vpop.permute.xlu0 %1190 }
 0x249   :  { %4755 = vst [vmem:[#allocation35_spill] sm:$0xff] %v3813_v20  ;;  %v2910_v20 = vld [vmem:[#allocation5 + $0x30] sm:$0xff]  }
 0x24a   :  { %1680 = vrot.lane.b32.xlu0 %v3447_v57, %s3096_s26 }
 0x24b   :  { %2697 = vmatpush3.bf16.msra.mxu1 %v370_v52  ;;  %v3817_v16 = vpop.permute.xlu1 %1024  ;;  %1682 = vrot.lane.b32.xlu1 %v3453_v60, %s3096_s26 }
 0x24c   :  { %4756 = vst [vmem:[#allocation36_spill] sm:$0xff] %v3817_v16  ;;  %2702 = vmatprep.subr.bf16.mxu1 %v3630_v30  ;;  %v3822_v37 = vpop.permute.xlu0 %1192 }
 0x24d   :  { %4757 = vst [vmem:[#allocation37_spill] sm:$0xff] %v3822_v37 }
 0x24e   :  { %2699 = vmatmul.mubr.msk.bf16.vlgmr.msra.gmra.mrb[0].mxu1 %vm386_vm4, %v2904_v1  ;;  %1556 = vrot.lane.b32.xlu0 %v3459_v31, %s3091_s2  ;;  %v2908_v1 = vld [vmem:[#allocation5 + $0x20] sm:$0xff]  }
 0x24f   :  { %2703 = vmatpush3.bf16.msra.mxu1 %v3630_v30  ;;  %v3828_v40 = vpop.permute.xlu1 %1026  ;;  %2706 = vmatprep.mubr.msk.bf16.mxu1 %vm386_vm4, %v2905_v50  ;;  %v2907_v30 = vld [vmem:[#allocation5 + $0x18] sm:$0xff]   ;;  %v2909_v50 = vld [vmem:[#allocation5 + $0x28] sm:$0xff]  }
 0x250   :  { %4758 = vst [vmem:[#allocation38_spill] sm:$0xff] %v3828_v40  ;;  %2704 = vmatprep.subr.bf16.mxu1 %v3525_v5  ;;  %1558 = vrot.lane.b32.xlu1 %v3465_v61, %s3091_s2  ;;  %v3834_v52 = vpop.permute.xlu0 %1564  ;;  %v2913_v40 = vld [vmem:[#allocation5 + $0x48] sm:$0xff]  }
 0x251   :  { %4759 = vst [vmem:[#allocation39_spill] sm:$0xff] %v3834_v52 }
 0x252   :  { %1684 = vrot.lane.b32.xlu0 %v3459_v31, %s3096_s26 }
 0x253   :  { %2705 = vmatpush3.bf16.msra.mxu1 %v3525_v5  ;;  %v3839_v51 = vpop.permute.xlu1 %1028 }
 0x254   :  { %4760 = vst [vmem:[#allocation40_spill] sm:$0xff] %v3839_v51  ;;  %1686 = vrot.lane.b32.xlu1 %v3465_v61, %s3096_s26  ;;  %v3843_v24 = vpop.permute.xlu0 %1692 }
 0x255   :  { %4761 = vst [vmem:[#allocation41_spill] sm:$0xff] %v3843_v24 }
 0x256   :  { %2707 = vmatmul.mubr.msk.bf16.vlgmr.msra.gmra.mrb[4].mxu1 %vm386_vm4, %v2906_v49  ;;  %1560 = vrot.lane.b32.xlu0 %v3471_v32, %s3091_s2  ;;  %v3859_v49 = vld [vmem:[#allocation7] sm:$0xff] }
 0x257   :  { %v3848_v54 = vpop.permute.xlu1 %1030  ;;  %2710 = vmatprep.mubr.msk.bf16.mxu1 %vm386_vm4, %v2907_v30  ;;  %v3865_v30 = vld [vmem:[#allocation7 + $0x8] sm:$0xff] }
 0x258   :  { %4762 = vst [vmem:[#allocation42_spill] sm:$0xff] %v3848_v54  ;;  %1562 = vrot.lane.b32.xlu1 %v3477_v46, %s3091_s2  ;;  %v3853_v5 = vpop.permute.xlu0 %1568 }
 0x259   :  { %4763 = vst [vmem:[#allocation43_spill] sm:$0xff] %v3853_v5 }
 0x25a   :  { %1688 = vrot.lane.b32.xlu0 %v3471_v32, %s3096_s26 }
 0x25b   :  { %v3857_v24 = vpop.permute.xlu1 %1194 }
 0x25c   :  { %4764 = vst [vmem:[#allocation44_spill] sm:$0xff] %v3857_v24  ;;  %1690 = vrot.lane.b32.xlu1 %v3477_v46, %s3096_s26  ;;  %v3863_v52 = vpop.permute.xlu0 %1696  ;;  %v3873_v24 = vld [vmem:[#allocation7 + $0x10] sm:$0xff] }
 0x25d   :  { %4765 = vst [vmem:[#allocation45_spill] sm:$0xff] %v3863_v52  ;;  %v3879_v52 = vld [vmem:[#allocation7 + $0x18] sm:$0xff] }
 0x25e   :  { %2711 = vmatmul.mubr.msk.bf16.gmra.mrb[8].mxu1 %vm386_vm4, %v2908_v1  ;;  %2190 = vrot.lane.b32.xlu0 %v3859_v49, %s3098_s27  ;;  %v2911_v1 = vld [vmem:[#allocation5 + $0x38] sm:$0xff]  }
 0x25f   :  { %2714 = vmatprep.mubr.msk.bf16.mxu1 %vm386_vm4, %v2909_v50  ;;  %v3871_v5 = vpop.permute.xlu1 %1566 }
 0x260   :  { %4766 = vst [vmem:[#allocation46_spill] sm:$0xff] %v3871_v5  ;;  %2192 = vrot.lane.b32.xlu1 %v3865_v30, %s3098_s27  ;;  %v3877_v37 = vpop.permute.xlu0 %1572 }
 0x261   :  { %4767 = vst [vmem:[#allocation47_spill] sm:$0xff] %v3877_v37 }
 0x262   :  { %2194 = vrot.lane.b32.xlu0 %v3873_v24, %s3098_s27 }
 0x263   :  { %v3883_v54 = vpop.permute.xlu1 %1694 }
 0x264   :  { %4768 = vst [vmem:[#allocation48_spill] sm:$0xff] %v3883_v54  ;;  %2196 = vrot.lane.b32.xlu1 %v3879_v52, %s3098_s27  ;;  %v3887_v50 = vpop.permute.xlu0 %1700  ;;  %v2912_v54 = vld [vmem:[#allocation5 + $0x40] sm:$0xff]  }
 0x265   :  { %4769 = vst [vmem:[#allocation49_spill] sm:$0xff] %v3887_v50 }
 0x266   :  { %2715 = vmatmul.mubr.msk.bf16.gmra.mrb[12].mxu1 %vm386_vm4, %v2910_v20  ;;  %2198 = vrot.lane.b32.xlu0 %v3409_v3, %s3098_s27 }
 0x267   :  { %2718 = vmatprep.mubr.msk.bf16.mxu1 %vm386_vm4, %v2911_v1  ;;  %v3893_v37 = vpop.permute.xlu1 %1570 }
 0x268   :  { %4770 = vst [vmem:[#allocation50_spill] sm:$0xff] %v3893_v37  ;;  %2200 = vrot.lane.b32.xlu1 %v3425_v12, %s3098_s27  ;;  %v3897_v5 = vpop.permute.xlu0 %1576  ;;  %v2915_v37 = vld [vmem:[#allocation5 + $0x58] sm:$0xff]  }
 0x269   :  { %4771 = vst [vmem:[#allocation51_spill] sm:$0xff] %v3897_v5 }
 0x26a   :  { %2202 = vrot.lane.b32.xlu0 %v3421_v11, %s3098_s27 }
 0x26b   :  { %v3901_v50 = vpop.permute.xlu1 %1698 }
 0x26c   :  { %4772 = vst [vmem:[#allocation52_spill] sm:$0xff] %v3901_v50  ;;  %2204 = vrot.lane.b32.xlu1 %v3429_v56, %s3098_s27  ;;  %v3905_v20 = vpop.permute.xlu0 %1704  ;;  %v2914_v50 = vld [vmem:[#allocation5 + $0x50] sm:$0xff]  }
 0x26d   :  { %4773 = vst [vmem:[#allocation53_spill] sm:$0xff] %v3905_v20 }
 0x26e   :  { %2719 = vmatmul.mubr.msk.bf16.gmra.mrb[16].mxu1 %vm386_vm4, %v2912_v54  ;;  %2206 = vrot.lane.b32.xlu0 %v3435_v43, %s3098_s27 }
 0x26f   :  { %2722 = vmatprep.mubr.msk.bf16.mxu1 %vm386_vm4, %v2913_v40  ;;  %v3911_v1 = vpop.permute.xlu1 %1574 }
 0x270   :  { %4774 = vst [vmem:[#allocation54_spill] sm:$0xff] %v3911_v1  ;;  %2208 = vrot.lane.b32.xlu1 %v3441_v55, %s3098_s27  ;;  %v3915_v5 = vpop.permute.xlu0 %1580 }
 0x271   :  { %4775 = vst [vmem:[#allocation55_spill] sm:$0xff] %v3915_v5  ;;  %v2916_v5 = vld [vmem:[#allocation5 + $0x60] sm:$0xff]  }
 0x272   :  { %2210 = vrot.lane.b32.xlu0 %v3447_v57, %s3098_s27 }
 0x273   :  { %v3919_v20 = vpop.permute.xlu1 %1702 }
 0x274   :  { %4776 = vst [vmem:[#allocation56_spill] sm:$0xff] %v3919_v20  ;;  %2212 = vrot.lane.b32.xlu1 %v3453_v60, %s3098_s27  ;;  %v3923_v54 = vpop.permute.xlu0 %1708  ;;  %v2917_v20 = vld [vmem:[#allocation5 + $0x68] sm:$0xff]  }
 0x275   :  { %4777 = vst [vmem:[#allocation57_spill] sm:$0xff] %v3923_v54 }
 0x276   :  { %2723 = vmatmul.mubr.msk.bf16.gmra.mrb[20].mxu1 %vm386_vm4, %v2914_v50  ;;  %2214 = vrot.lane.b32.xlu0 %v3459_v31, %s3098_s27  ;;  %v3099_v50 = vmov 9  }
 0x277   :  { %2726 = vmatprep.mubr.msk.bf16.mxu1 %vm386_vm4, %v2915_v37  ;;  %v3929_v55 = vpop.permute.xlu1 %1578 }
 0x278   :  { %4778 = vst [vmem:[#allocation58_spill] sm:$0xff] %v3929_v55  ;;  %2216 = vrot.lane.b32.xlu1 %v3465_v61, %s3098_s27  ;;  %v3933_v40 = vpop.permute.xlu0 %1584 }
 0x279   :  { %4779 = vst [vmem:[#allocation59_spill] sm:$0xff] %v3933_v40  ;;  %v2919_v40 = vld [vmem:[#allocation5 + $0x78] sm:$0xff]  }
 0x27a   :  { %2218 = vrot.lane.b32.xlu0 %v3471_v32, %s3098_s27  ;;  %v2918_v32 = vld [vmem:[#allocation5 + $0x70] sm:$0xff]  }
 0x27b   :  { %v3937_v54 = vpop.permute.xlu1 %1706 }
 0x27c   :  { %4780 = vst [vmem:[#allocation60_spill] sm:$0xff] %v3937_v54  ;;  %2220 = vrot.lane.b32.xlu1 %v3477_v46, %s3098_s27  ;;  %v3941_v31 = vpop.permute.xlu0 %1712 }
 0x27d   :  { %4781 = vst [vmem:[#allocation61_spill] sm:$0xff] %v3941_v31 }
 0x27e   :  { %2727 = vmatmul.mubr.msk.bf16.gmra.mrb[24].mxu1 %vm386_vm4, %v2916_v5  ;;  %373 = vperm.xlu0 %2898, %v3859_v49  }
 0x27f   :  { %2730 = vmatprep.mubr.msk.bf16.mxu1 %vm386_vm4, %v2917_v20  ;;  %v3946_v61 = vpop.permute.xlu1 %1582  ;;  %v433_v20 = vld [vmem:[#allocation7] sm:$0x1] }
 0x280   :  { %4782 = vst [vmem:[#allocation62_spill] sm:$0xff] %v3946_v61  ;;  %378 = vperm.xlu1 %2899, %v3865_v30   ;;  %v3949_v37 = vpop.permute.xlu0 %1588 }
 0x281   :  { %4783 = vst [vmem:[#allocation63_spill] sm:$0xff] %v3949_v37  ;;  %v3101_v37 = vmov 12  }
 0x282   :  { %2901 = vset.pattern.permute.xlu0 %v3099_v50 }
 0x283   :  { %v3951_v54 = vpop.permute.xlu1 %1710  ;;  %439 = vperm.xlu0 %2901, %v3865_v30  }
 0x284   :  { %4784 = vst [vmem:[#allocation64_spill] sm:$0xff] %v3951_v54  ;;  %2900 = vset.pattern.permute.xlu1 %v3099_v50  ;;  %v3954_v46 = vpop.permute.xlu0 %1716  ;;  %v2920_v50 = vld [vmem:[#allocation5 + $0x80] sm:$0xff]  }
 0x285   :  { %4785 = vst [vmem:[#allocation65_spill] sm:$0xff] %v3954_v46  ;;  %435 = vperm.xlu1 %2900, %v3859_v49  }
 0x286   :  { %2731 = vmatmul.mubr.msk.bf16.gmra.mrb[28].mxu1 %vm386_vm4, %v2918_v32 }
 0x287   :  { %2734 = vmatprep.mubr.msk.bf16.mxu1 %vm386_vm4, %v2919_v40  ;;  %v3959_v5 = vpop.permute.xlu1 %1586  ;;  %2312 = vrot.lane.b32.xlu0 %v3865_v30, %s3100_s28 }
 0x288   :  { %4786 = vst [vmem:[#allocation66_spill] sm:$0xff] %v3959_v5  ;;  %v3963_v31 = vpop.permute.xlu0 %1592 }
 0x289   :  { %4787 = vst [vmem:[#allocation67_spill] sm:$0xff] %v3963_v31  ;;  %2902 = vset.pattern.permute.xlu1 %v3101_v37 }
 0x28a   :  { %453 = vperm.xlu1 %2902, %v433_v20  }
 0x28b   :  { %v3965_v46 = vpop.permute.xlu1 %1714  ;;  %2316 = vrot.lane.b32.xlu0 %v3879_v52, %s3100_s28 }
 0x28c   :  { %4788 = vst [vmem:[#allocation68_spill] sm:$0xff] %v3965_v46  ;;  %v3969_v32 = vpop.permute.xlu0 %1720 }
 0x28d   :  { %4789 = vst [vmem:[#allocation69_spill] sm:$0xff] %v3969_v32 }
 0x28e   :  { %2735 = vmatmul.mubr.msk.bf16.gmra.mrb[32].mxu1 %vm386_vm4, %v2920_v50  ;;  %2310 = vrot.lane.b32.xlu1 %v3859_v49, %s3100_s28 }
 0x28f   :  { %v3974_v40 = vpop.permute.xlu1 %1590  ;;  %2320 = vrot.lane.b32.xlu0 %v3425_v12, %s3100_s28 }
 0x290   :  { %4790 = vst [vmem:[#allocation70_spill] sm:$0xff] %v3974_v40  ;;  %v3978_v30 = vpop.permute.xlu0 %1532 }
 0x291   :  { %4791 = vst [vmem:[#allocation71_spill] sm:$0xff] %v3978_v30 }
 0x292   :  { %2314 = vrot.lane.b32.xlu1 %v3873_v24, %s3100_s28 }
 0x293   :  { %v3982_v37 = vpop.permute.xlu1 %1718  ;;  %2324 = vrot.lane.b32.xlu0 %v3429_v56, %s3100_s28 }
 0x294   :  { %4792 = vst [vmem:[#allocation72_spill] sm:$0xff] %v3982_v37  ;;  %v3986_v52 = vpop.permute.xlu0 %1660 }
 0x295   :  { %4793 = vst [vmem:[#allocation73_spill] sm:$0xff] %v3986_v52 }
 0x296   :  { %2318 = vrot.lane.b32.xlu1 %v3409_v3, %s3100_s28 }
 0x297   :  { %v3990_v49 = vpop.permute.xlu1 %1594 }
 0x298   :  { %4794 = vst [vmem:[#allocation74_spill] sm:$0xff] %v3990_v49  ;;  %v3996_v50 = vpop.permute.xlu0 %1536 }
 0x299   :  { %4796 = vst [vmem:[#allocation76_spill] sm:$0xff] %v3996_v50 }
 0x29a   :  { %2322 = vrot.lane.b32.xlu1 %v3421_v11, %s3100_s28 }
 0x29b   :  { %v3994_v20 = vpop.permute.xlu1 %1722 }
 0x29c   :  { %4795 = vst [vmem:[#allocation75_spill] sm:$0xff] %v3994_v20  ;;  %v4000_v30 = vpop.permute.xlu0 %1664 }
 0x29d   :  { %4798 = vst [vmem:[#allocation78_spill] sm:$0xff] %v4000_v30 }
 0x29f   :  { %v3998_v24 = vpop.permute.xlu1 %1534 }
 0x2a0   :  { %4797 = vst [vmem:[#allocation77_spill] sm:$0xff] %v3998_v24  ;;  %v4006_v52 = vpop.permute.xlu0 %1540 }
 0x2a1   :  { %4801 = vst [vmem:[#allocation81_spill] sm:$0xff] %v4006_v52 }
 0x2a3   :  { %v4002_v32 = vpop.permute.xlu1 %1662 }
 0x2a4   :  { %4799 = vst [vmem:[#allocation79_spill] sm:$0xff] %v4002_v32  ;;  %v4010_v49 = vpop.permute.xlu0 %1668 }
 0x2a5   :  { %4803 = vst [vmem:[#allocation83_spill] sm:$0xff] %v4010_v49 }
 0x2a7   :  { %v4004_v37 = vpop.permute.xlu1 %1538 }
 0x2a8   :  { %4800 = vst [vmem:[#allocation80_spill] sm:$0xff] %v4004_v37  ;;  %v4016_v20 = vpop.permute.xlu0 %1544 }
 0x2a9   :  { %4806 = vst [vmem:[#allocation86_spill] sm:$0xff] %v4016_v20 }
 0x2ab   :  { %v4008_v31 = vpop.permute.xlu1 %1666 }
 0x2ac   :  { %4802 = vst [vmem:[#allocation82_spill] sm:$0xff] %v4008_v31  ;;  %v4020_v24 = vpop.permute.xlu0 %1672 }
 0x2ad   :  { %4808 = vst [vmem:[#allocation88_spill] sm:$0xff] %v4020_v24 }
 0x2af   :  { %v4012_v46 = vpop.permute.xlu1 %1542 }
 0x2b0   :  { %4804 = vst [vmem:[#allocation84_spill] sm:$0xff] %v4012_v46  ;;  %v4024_v32 = vpop.permute.xlu0 %1548 }
 0x2b1   :  { %4810 = vst [vmem:[#allocation90_spill] sm:$0xff] %v4024_v32 }
 0x2b3   :  { %v4014_v40 = vpop.permute.xlu1 %1670 }
 0x2b4   :  { %4805 = vst [vmem:[#allocation85_spill] sm:$0xff] %v4014_v40  ;;  %v4028_v52 = vpop.permute.xlu0 %1676 }
 0x2b5   :  { %4812 = vst [vmem:[#allocation92_spill] sm:$0xff] %v4028_v52 }
 0x2b7   :  { %v4018_v50 = vpop.permute.xlu1 %1546 }
 0x2b8   :  { %4807 = vst [vmem:[#allocation87_spill] sm:$0xff] %v4018_v50  ;;  %v4032_v49 = vpop.permute.xlu0 %1552 }
 0x2b9   :  { %4814 = vst [vmem:[#allocation94_spill] sm:$0xff] %v4032_v49 }
 0x2bb   :  { %v4022_v30 = vpop.permute.xlu1 %1674 }
 0x2bc   :  { %4809 = vst [vmem:[#allocation89_spill] sm:$0xff] %v4022_v30  ;;  %v4036_v40 = vpop.permute.xlu0 %1680 }
 0x2bd   :  { %4816 = vst [vmem:[#allocation96_spill] sm:$0xff] %v4036_v40 }
 0x2bf   :  { %v4026_v37 = vpop.permute.xlu1 %1550 }
 0x2c0   :  { %4811 = vst [vmem:[#allocation91_spill] sm:$0xff] %v4026_v37  ;;  %v4040_v50 = vpop.permute.xlu0 %1556 }
 0x2c1   :  { %4818 = vst [vmem:[#allocation98_spill] sm:$0xff] %v4040_v50 }
 0x2c3   :  { %v4030_v31 = vpop.permute.xlu1 %1678 }
 0x2c4   :  { %4813 = vst [vmem:[#allocation93_spill] sm:$0xff] %v4030_v31  ;;  %v4044_v30 = vpop.permute.xlu0 %1684 }
 0x2c5   :  { %4820 = vst [vmem:[#allocation100_spill] sm:$0xff] %v4044_v30 }
 0x2c7   :  { %v4034_v46 = vpop.permute.xlu1 %1554 }
 0x2c8   :  { %4815 = vst [vmem:[#allocation95_spill] sm:$0xff] %v4034_v46  ;;  %v4048_v37 = vpop.permute.xlu0 %1560 }
 0x2c9   :  { %4822 = vst [vmem:[#allocation102_spill] sm:$0xff] %v4048_v37 }
 0x2cb   :  { %v4038_v20 = vpop.permute.xlu1 %1682 }
 0x2cc   :  { %4817 = vst [vmem:[#allocation97_spill] sm:$0xff] %v4038_v20  ;;  %v4052_v31 = vpop.permute.xlu0 %1688 }
 0x2cd   :  { %4824 = vst [vmem:[#allocation104_spill] sm:$0xff] %v4052_v31 }
 0x2cf   :  { %v4042_v24 = vpop.permute.xlu1 %1558 }
 0x2d0   :  { %4819 = vst [vmem:[#allocation99_spill] sm:$0xff] %v4042_v24  ;;  %v4056_v46 = vpop.permute.xlu0 %2190 }
 0x2d1   :  { %4826 = vst [vmem:[#allocation106_spill] sm:$0xff] %v4056_v46 }
 0x2d3   :  { %v4046_v32 = vpop.permute.xlu1 %1686 }
 0x2d4   :  { %4821 = vst [vmem:[#allocation101_spill] sm:$0xff] %v4046_v32  ;;  %v4060_v20 = vpop.permute.xlu0 %2194 }
 0x2d5   :  { %4828 = vst [vmem:[#allocation108_spill] sm:$0xff] %v4060_v20 }
 0x2d7   :  { %v4050_v52 = vpop.permute.xlu1 %1562 }
 0x2d8   :  { %4823 = vst [vmem:[#allocation103_spill] sm:$0xff] %v4050_v52  ;;  %v4064_v24 = vpop.permute.xlu0 %2198 }
 0x2d9   :  { %4830 = vst [vmem:[#allocation110_spill] sm:$0xff] %v4064_v24 }
 0x2db   :  { %v4054_v49 = vpop.permute.xlu1 %1690 }
 0x2dc   :  { %4825 = vst [vmem:[#allocation105_spill] sm:$0xff] %v4054_v49  ;;  %v4068_v32 = vpop.permute.xlu0 %2202 }
 0x2dd   :  { %4832 = vst [vmem:[#allocation112_spill] sm:$0xff] %v4068_v32 }
 0x2df   :  { %v4058_v40 = vpop.permute.xlu1 %2192 }
 0x2e0   :  { %4827 = vst [vmem:[#allocation107_spill] sm:$0xff] %v4058_v40  ;;  %v4072_v52 = vpop.permute.xlu0 %2206 }
 0x2e1   :  { %4834 = vst [vmem:[#allocation114_spill] sm:$0xff] %v4072_v52 }
 0x2e3   :  { %v4062_v50 = vpop.permute.xlu1 %2196 }
 0x2e4   :  { %4829 = vst [vmem:[#allocation109_spill] sm:$0xff] %v4062_v50  ;;  %v4076_v49 = vpop.permute.xlu0 %2210 }
 0x2e5   :  { %4836 = vst [vmem:[#allocation116_spill] sm:$0xff] %v4076_v49 }
 0x2e7   :  { %v4066_v30 = vpop.permute.xlu1 %2200 }
 0x2e8   :  { %4831 = vst [vmem:[#allocation111_spill] sm:$0xff] %v4066_v30  ;;  %v4080_v40 = vpop.permute.xlu0 %2214 }
 0x2e9   :  { %4838 = vst [vmem:[#allocation118_spill] sm:$0xff] %v4080_v40 }
 0x2eb   :  { %v4070_v37 = vpop.permute.xlu1 %2204 }
 0x2ec   :  { %4833 = vst [vmem:[#allocation113_spill] sm:$0xff] %v4070_v37  ;;  %v4084_v50 = vpop.permute.xlu0 %2218  ;;  %v59_v37 = vld [vmem:[#allocation2 + $0x2] sm:$0x1] }
 0x2ed   :  { %4840 = vst [vmem:[#allocation120_spill] sm:$0xff] %v4084_v50  ;;  %v568_v40 = vmul.f32 %v3640_v45, %v59_v37 }
 0x2ef   :  { %v4074_v31 = vpop.permute.xlu1 %2208  ;;  %v4094_v16 = vrot.slane %v568_v40, %v3163_v4 }
 0x2f0   :  { %4835 = vst [vmem:[#allocation115_spill] sm:$0xff] %v4074_v31 }
 0x2f3   :  { %v4078_v46 = vpop.permute.xlu1 %2212 }
 0x2f4   :  { %4837 = vst [vmem:[#allocation117_spill] sm:$0xff] %v4078_v46  ;;  %v567_v46 = vmul.f32 %v3296_v38, %v59_v37 }
 0x2f7   :  { %v4082_v20 = vpop.permute.xlu1 %2216 }
 0x2f8   :  { %4839 = vst [vmem:[#allocation119_spill] sm:$0xff] %v4082_v20 }
 0x2fb   :  { %v4086_v24 = vpop.permute.xlu1 %2220 }
 0x2fc   :  { %4841 = vst [vmem:[#allocation121_spill] sm:$0xff] %v4086_v24  ;;  %v4091_v24 = vrot.slane %v567_v46, %v3163_v4 }
 0x2fd   :  { %v374_v30 = vpop.permute.xlu0 %373 }
 0x2fe   :  { %v1064_v38 = vmul.f32 %v3533_v6, %v4091_v24  ;;  %v1066_v45 = vmul.f32 %v3549_v35, %v4091_v24  ;;  %v1067_v4 = vmul.f32 %v3573_v27, %v4091_v24 }
 0x2ff   :  { %v379_v32 = vpop.permute.xlu1 %378 }
 0x302   :  { %v440_v20 = vpop.permute.xlu0 %439 }
 0x304   :  { %v436_v1 = vpop.permute.xlu1 %435 }
 0x321   :  { %v424_v54 = vpop.f32.mrb[0].mxu1 }
 0x322   :  { %v425_v5 = vadd.f32 %v424_v54, %v374_v30  ;;  %v2700_v52 = vpop.f32.mrb[1].mxu1 }
 0x323   :  { %v427_v61 = vpop.f32.mrb[2].mxu1  ;;  %v1228_v52 = vmul.f32 %v3557_v21, %v4094_v16 }
 0x324   :  { %v431_v31 = vmax.f32 %v425_v5, 0.0  ;;  %v428_v55 = vadd.f32 %v427_v61, %v379_v32  ;;  %v2701_v49 = vpop.f32.mrb[3].mxu1  ;;  %v2955_v5 = vld [vmem:[#allocation7 + $0x10] sm:$0xff] }
 0x326   :  { %v432_v51 = vmax.f32 %v428_v55, 0.0  ;;  %v442_v50 = vmul.f32 %v436_v1, %v431_v31  ;;  %v2956_v55 = vld [vmem:[#allocation7] sm:$0xff]  ;;  %v1065_v31 = vmul.f32 %v3541_v34, %v4091_v24  ;;  %v1230_v34 = vmul.f32 %v3582_v28, %v4094_v16 }
 0x328   :  { %v443_v62 = vmul.f32 %v440_v20, %v432_v51  ;;  %v2958_v20 = vld [vmem:[#allocation7 + $0x8] sm:$0xff] }
 0x329   :  { %v2708_v54 = vpop.f32.mrb[4].mxu1 }
 0x32a   :  { %v444_v30 = vadd.f32 %v443_v62, %v442_v50  ;;  %v814_v61 = vadd.f32 %v2955_v5, %v2708_v54  ;;  %v805_v32 = vpop.f32.mrb[5].mxu1  ;;  %v2957_v62 = vld [vmem:[#allocation7 + $0x18] sm:$0xff]  ;;  %v1229_v50 = vmul.f32 %v3565_v59, %v4094_v16 }
 0x32b   :  { %v806_v1 = vadd.f32 %v2956_v55, %v805_v32  ;;  %v2709_v51 = vpop.f32.mrb[6].mxu1  ;;  %v1068_v55 = vmul.f32 %v3590_v47, %v4091_v24 }
 0x32c   :  { %v445_v46 = vrot.slane %v444_v30, 4  ;;  %v817_v40 = vadd.f32 %v2957_v62, %v2709_v51  ;;  %v808_v37 = vpop.f32.mrb[7].mxu1  ;;  %v1098_v6 = vadd.f32 %v1066_v45, %v814_v61  ;;  %v1070_v61 = vmul.f32 %v3610_v7, %v4091_v24 }
 0x32d   :  { %v1096_v49 = vadd.f32 %v1064_v38, %v806_v1  ;;  %v809_v35 = vadd.f32 %v2958_v20, %v808_v37  ;;  %v1231_v38 = vmul.f32 %v3598_v41, %v4094_v16  ;;  %v1071_v45 = vmul.f32 %v3622_v39, %v4091_v24 }
 0x32e   :  { %v446_v54 = vadd.f32 %v445_v46, %v444_v30  ;;  %v1099_v27 = vadd.f32 %v1067_v4, %v817_v40  ;;  %v4118_v59 = vadd.f32 %v1230_v34, %v1098_v6  ;;  %v1232_v1 = vmul.f32 %v3604_v9, %v4094_v16 }
 0x32f   :  { %v4110_v5 = vadd.f32 %v1228_v52, %v1096_v49  ;;  %v1097_v32 = vadd.f32 %v1065_v31, %v809_v35  ;;  %v1069_v39 = vmul.f32 %v3648_v48, %v4091_v24  ;;  %v454_v35 = vpop.permute.xlu1 %453 }
 0x330   :  { %v447_v21 = vrot.slane %v446_v54, 2  ;;  %v4129_v4 = vadd.f32 %v1231_v38, %v1099_v27  ;;  %v1296_v52 = vsel %vm1292_vm5, %v4118_v59, 0.0 }
 0x331   :  { %v4120_v30 = vadd.f32 %v1229_v50, %v1097_v32  ;;  %v2712_v28 = vpop.f32.mrb[8].mxu1  ;;  %v1293_v7 = vsel %vm1292_vm5, %v4110_v5, 0.0  ;;  %v1234_v50 = vmul.f32 %v3628_v42, %v4094_v16  ;;  %v1072_v42 = vmul.f32 %v3656_v19, %v4091_v24 }
 0x332   :  { %v830_v47 = vadd.f32 %v2712_v28, %v3421_v11  ;;  %v821_v51 = vpop.f32.mrb[9].mxu1  ;;  %v448_v31 = vadd.f32 %v447_v21, %v446_v54 }
 0x333   :  { %v1294_v41 = vsel %vm1292_vm5, %v4120_v30, 0.0  ;;  %v822_v46 = vadd.f32 %v821_v51, %v3409_v3  ;;  %v2713_v62 = vpop.f32.mrb[10].mxu1  ;;  %v1233_v3 = vmul.f32 %v3616_v8, %v4094_v16 }
 0x334   :  { %v1295_v40 = vadd.f32 %v1294_v41, %v1293_v7  ;;  %v833_v9 = vadd.f32 %v2713_v62, %v3429_v56  ;;  %v824_v11 = vpop.f32.mrb[11].mxu1  ;;  %v449_v37 = vrot.slane %v448_v31, 1  ;;  %v1102_v6 = vadd.f32 %v1070_v61, %v830_v47 }
 0x335   :  { %v1100_v49 = vadd.f32 %v1068_v55, %v822_v46  ;;  %v825_v20 = vadd.f32 %v824_v11, %v3425_v12  ;;  %v1298_v56 = vsel %vm1292_vm5, %v4129_v4, 0.0  ;;  %v1235_v55 = vmul.f32 %v3636_v44, %v4094_v16 }
 0x336   :  { %v1297_v48 = vadd.f32 %v1296_v52, %v1295_v40  ;;  %v450_v54 = vadd.f32 %v449_v37, %v448_v31  ;;  %v1103_v27 = vadd.f32 %v1071_v45, %v833_v9  ;;  %v1236_v12 = vmul.f32 %v3644_v14, %v4094_v16  ;;  %v2959_v37 = vld [vmem:[#allocation7 + $0x48] sm:$0xff] }
 0x337   :  { %v4146_v34 = vadd.f32 %v1232_v1, %v1100_v49  ;;  %v1101_v32 = vadd.f32 %v1069_v39, %v825_v20  ;;  %v4154_v61 = vadd.f32 %v1234_v50, %v1102_v6  ;;  %v1074_v1 = vmul.f32 %v3672_v23, %v4091_v24 }
 0x338   :  { %v1299_v21 = vadd.f32 %v1298_v56, %v1297_v48  ;;  %v456_v8 = vadd.f32 %v454_v35, %v450_v54  ;;  %v4167_v19 = vadd.f32 %v1235_v55, %v1103_v27  ;;  %v1073_v23 = vmul.f32 %v3664_v29, %v4091_v24  ;;  %v4842_v56 = vld [vmem:[#allocation14_spill] sm:$0xff] }
 0x339   :  { %v1300_v38 = vsel %vm1292_vm5, %v4146_v34, 0.0  ;;  %v4158_v28 = vadd.f32 %v1233_v3, %v1101_v32  ;;  %v2716_v45 = vpop.f32.mrb[12].mxu1  ;;  %v1075_v62 = vmul.f32 %v3680_v63, %v4091_v24  ;;  %v1304_v9 = vsel %vm1292_vm5, %v4154_v61, 0.0  ;;  %v4843_v32 = vld [vmem:[#allocation12_spill] sm:$0xff] }
 0x33a   :  { %v1301_v44 = vadd.f32 %v1300_v38, %v1299_v21  ;;  %v4164_v14 = vsel %vm65_vm2, %v456_v8, -1e+30  ;;  %v846_v47 = vadd.f32 %v2716_v45, %v3447_v57  ;;  %v837_v51 = vpop.f32.mrb[13].mxu1  ;;  %v1237_v6 = vmul.f32 %v3652_v18, %v4094_v16  ;;  %v2960_v21 = vld [vmem:[#allocation7 + $0x70] sm:$0xff] }
 0x33b   :  { %v1302_v31 = vsel %vm1292_vm5, %v4158_v28, 0.0  ;;  %v838_v7 = vadd.f32 %v837_v51, %v3435_v43  ;;  %v2717_v41 = vpop.f32.mrb[14].mxu1  ;;  %v459_v46 = vsel %vm458_vm0, %v4164_v14, -inf  ;;  %v1238_v29 = vmul.f32 %v3660_v10, %v4094_v16  ;;  %v4844_v51 = vld [vmem:[#allocation16_spill] sm:$0xff] }
 0x33c   :  { %v1303_v39 = vadd.f32 %v1302_v31, %v1301_v44  ;;  %v849_v57 = vadd.f32 %v2717_v41, %v3453_v60  ;;  %v840_v40 = vpop.f32.mrb[15].mxu1  ;;  %460 = vmax.xlane.f32.xlu1 %v459_v46  ;;  %v1106_v11 = vadd.f32 %v1074_v1, %v846_v47  ;;  %v1306_v63 = vsel %vm1292_vm5, %v4167_v19, 0.0  ;;  %v2961_v1 = vld [vmem:[#allocation7 + $0x60] sm:$0xff] }
 0x33d   :  { %v1104_v43 = vadd.f32 %v1072_v42, %v838_v7  ;;  %v841_v52 = vadd.f32 %v2959_v37, %v840_v40  ;;  %v1239_v50 = vmul.f32 %v3668_v13, %v4094_v16  ;;  %v1076_v27 = vmul.f32 %v4842_v56, %v4091_v24  ;;  %v4845_v7 = vld [vmem:[#allocation19_spill] sm:$0xff] }
 0x33e   :  { %v1305_v49 = vadd.f32 %v1304_v9, %v1303_v39  ;;  %v1107_v20 = vadd.f32 %v1075_v62, %v849_v57  ;;  %v4191_v48 = vadd.f32 %v1238_v29, %v1106_v11  ;;  %v1240_v55 = vmul.f32 %v4843_v32, %v4094_v16  ;;  %v2963_v9 = vld [vmem:[#allocation7 + $0x68] sm:$0xff] }
 0x33f   :  { %v4187_v60 = vadd.f32 %v1236_v12, %v1104_v43  ;;  %v1105_v35 = vadd.f32 %v1073_v23, %v841_v52  ;;  %v1078_v13 = vmul.f32 %v3704_v22, %v4091_v24  ;;  %v1077_v31 = vmul.f32 %v4844_v51, %v4091_v24  ;;  %v2962_v23 = vld [vmem:[#allocation7 + $0x78] sm:$0xff]  ;;  %v4846_v43 = vld [vmem:[#allocation13_spill] sm:$0xff]  ;;  %v2965_v51 = vld [vmem:[#allocation7 + $0x80] sm:$0xff] }
 0x340   :  { %v1307_v3 = vadd.f32 %v1306_v63, %v1305_v49  ;;  %v4203_v38 = vadd.f32 %v1239_v50, %v1107_v20  ;;  %v1079_v41 = vmul.f32 %v4845_v7, %v4091_v24  ;;  %v1312_v22 = vsel %vm1292_vm5, %v4191_v48, 0.0  ;;  %v4847_v52 = vld [vmem:[#allocation15_spill] sm:$0xff]  ;;  %v4848_v50 = vld [vmem:[#allocation17_spill] sm:$0xff] }
 0x341   :  { %v1308_v18 = vsel %vm1292_vm5, %v4187_v60, 0.0  ;;  %v4195_v54 = vadd.f32 %v1237_v6, %v1105_v35  ;;  %v2720_v10 = vpop.f32.mrb[16].mxu1  ;;  %v1241_v37 = vmul.f32 %v4846_v43, %v4094_v16  ;;  %v1242_v6 = vmul.f32 %v4847_v52, %v4094_v16 }
 0x342   :  { %v1309_v12 = vadd.f32 %v1308_v18, %v1307_v3  ;;  %v862_v8 = vadd.f32 %v2960_v21, %v2720_v10  ;;  %v853_v42 = vpop.f32.mrb[17].mxu1  ;;  %v1314_v49 = vsel %vm1292_vm5, %v4203_v38, 0.0  ;;  %v1243_v18 = vmul.f32 %v4848_v50, %v4094_v16 }
 0x343   :  { %v1310_v45 = vsel %vm1292_vm5, %v4195_v54, 0.0  ;;  %v854_v44 = vadd.f32 %v2961_v1, %v853_v42  ;;  %v2721_v47 = vpop.f32.mrb[18].mxu1  ;;  %v2964_v42 = vld [vmem:[#allocation7 + $0x90] sm:$0xff]  ;;  %v1082_v1 = vmul.f32 %v3736_v33, %v4091_v24 }
 0x344   :  { %v1311_v46 = vadd.f32 %v1310_v45, %v1309_v12  ;;  %v865_v62 = vadd.f32 %v2962_v23, %v2721_v47  ;;  %v856_v39 = vpop.f32.mrb[19].mxu1  ;;  %v1110_v57 = vadd.f32 %v1078_v13, %v862_v8  ;;  %v1080_v12 = vmul.f32 %v3720_v36, %v4091_v24  ;;  %v2966_v23 = vld [vmem:[#allocation7 + $0x98] sm:$0xff] }
 0x345   :  { %v1108_v40 = vadd.f32 %v1076_v27, %v854_v44  ;;  %v857_v11 = vadd.f32 %v2963_v9, %v856_v39  ;;  %v1081_v36 = vmul.f32 %v3728_v58, %v4091_v24 }
 0x346   :  { %v1313_v29 = vadd.f32 %v1312_v22, %v1311_v46  ;;  %v1111_v20 = vadd.f32 %v1079_v41, %v865_v62  ;;  %v4223_v10 = vadd.f32 %v1242_v6, %v1110_v57  ;;  %v1083_v41 = vmul.f32 %v3744_v2, %v4091_v24 }
 0x347   :  { %v4219_v63 = vadd.f32 %v1240_v55, %v1108_v40  ;;  %v1109_v35 = vadd.f32 %v1077_v31, %v857_v11  ;;  %v4849_v55 = vld [vmem:[#allocation18_spill] sm:$0xff]  ;;  %v2967_v40 = vld [vmem:[#allocation7 + $0x88] sm:$0xff] }
 0x348   :  { %v1315_v3 = vadd.f32 %v1314_v49, %v1313_v29  ;;  %v1244_v21 = vmul.f32 %v4849_v55, %v4094_v16  ;;  %v4235_v44 = vadd.f32 %v1243_v18, %v1111_v20  ;;  %v1320_v33 = vsel %vm1292_vm5, %v4223_v10, 0.0  ;;  %v4850_v11 = vld [vmem:[#allocation20_spill] sm:$0xff] }
 0x349   :  { %v1316_v56 = vsel %vm1292_vm5, %v4219_v63, 0.0  ;;  %v4227_v27 = vadd.f32 %v1241_v37, %v1109_v35  ;;  %v2724_v32 = vpop.f32.mrb[20].mxu1  ;;  %v1245_v43 = vmul.f32 %v4850_v11, %v4094_v16  ;;  %v4851_v37 = vld [vmem:[#allocation21_spill] sm:$0xff]  ;;  %v1247_v35 = vmul.f32 %v3732_v0, %v4094_v16  ;;  %v4852_v0 = vld [vmem:[#allocation26_spill] sm:$0xff] }
 0x34a   :  { %v1317_v8 = vadd.f32 %v1316_v56, %v1315_v3  ;;  %v878_v13 = vadd.f32 %v2964_v42, %v2724_v32  ;;  %v869_v45 = vpop.f32.mrb[21].mxu1  ;;  %v1246_v58 = vmul.f32 %v4851_v37, %v4094_v16  ;;  %v1322_v2 = vsel %vm1292_vm5, %v4235_v44, 0.0 }
 0x34b   :  { %v1318_v47 = vsel %vm1292_vm5, %v4227_v27, 0.0  ;;  %v870_v31 = vadd.f32 %v2965_v51, %v869_v45  ;;  %v2725_v7 = vpop.f32.mrb[22].mxu1  ;;  %v1084_v32 = vmul.f32 %v3752_v53, %v4091_v24  ;;  %v4853_v53 = vld [vmem:[#allocation24_spill] sm:$0xff] }
 0x34c   :  { %v1319_v46 = vadd.f32 %v1318_v47, %v1317_v8  ;;  %v881_v62 = vadd.f32 %v2966_v23, %v2725_v7  ;;  %v872_v39 = vpop.f32.mrb[23].mxu1  ;;  %v1114_v22 = vadd.f32 %v1082_v1, %v878_v13  ;;  %v1086_v13 = vmul.f32 %v4852_v0, %v4091_v24  ;;  %v2969_v47 = vld [vmem:[#allocation7 + $0xa0] sm:$0xff] }
 0x34d   :  { %v1112_v57 = vadd.f32 %v1080_v12, %v870_v31  ;;  %v873_v9 = vadd.f32 %v2967_v40, %v872_v39  ;;  %v1248_v12 = vmul.f32 %v3740_v17, %v4094_v16  ;;  %v1085_v7 = vmul.f32 %v4853_v53, %v4091_v24  ;;  %v4854_v17 = vld [vmem:[#allocation28_spill] sm:$0xff] }
 0x34e   :  { %v1321_v52 = vadd.f32 %v1320_v33, %v1319_v46  ;;  %v1115_v29 = vadd.f32 %v1083_v41, %v881_v62  ;;  %v4255_v3 = vadd.f32 %v1246_v58, %v1114_v22  ;;  %v2970_v46 = vld [vmem:[#allocation7 + $0xb8] sm:$0xff] }
 0x34f   :  { %v4251_v6 = vadd.f32 %v1244_v21, %v1112_v57  ;;  %v1113_v49 = vadd.f32 %v1081_v36, %v873_v9  ;;  %v2968_v21 = vld [vmem:[#allocation7 + $0xb0] sm:$0xff]  ;;  %v1087_v36 = vmul.f32 %v4854_v17, %v4091_v24  ;;  %v2971_v57 = vld [vmem:[#allocation7 + $0xa8] sm:$0xff]  ;;  %v2973_v17 = vld [vmem:[#allocation7 + $0xc0] sm:$0xff] }
 0x350   :  { %v1323_v20 = vadd.f32 %v1322_v2, %v1321_v52  ;;  %v4267_v45 = vadd.f32 %v1247_v35, %v1115_v29  ;;  %v1328_v39 = vsel %vm1292_vm5, %v4255_v3, 0.0  ;;  %v4855_v9 = vld [vmem:[#allocation22_spill] sm:$0xff]  ;;  %v4857_v35 = vld [vmem:[#allocation25_spill] sm:$0xff] }
 0x351   :  { %v1324_v50 = vsel %vm1292_vm5, %v4251_v6, 0.0  ;;  %v4259_v18 = vadd.f32 %v1245_v43, %v1113_v49  ;;  %v2728_v56 = vpop.f32.mrb[24].mxu1  ;;  %v1249_v11 = vmul.f32 %v4855_v9, %v4094_v16  ;;  %v4856_v43 = vld [vmem:[#allocation23_spill] sm:$0xff] }
 0x352   :  { %v1325_v55 = vadd.f32 %v1324_v50, %v1323_v20  ;;  %v894_v8 = vadd.f32 %v2968_v21, %v2728_v56  ;;  %v885_v42 = vpop.f32.mrb[25].mxu1  ;;  %v1250_v37 = vmul.f32 %v4856_v43, %v4094_v16  ;;  %v1330_v52 = vsel %vm1292_vm5, %v4267_v45, 0.0 }
 0x353   :  { %v1326_v1 = vsel %vm1292_vm5, %v4259_v18, 0.0  ;;  %v886_v51 = vadd.f32 %v2969_v47, %v885_v42  ;;  %v2729_v31 = vpop.f32.mrb[26].mxu1  ;;  %v1251_v50 = vmul.f32 %v4857_v35, %v4094_v16 }
 0x354   :  { %v1327_v41 = vadd.f32 %v1326_v1, %v1325_v55  ;;  %v897_v23 = vadd.f32 %v2970_v46, %v2729_v31  ;;  %v888_v62 = vpop.f32.mrb[27].mxu1  ;;  %v1118_v33 = vadd.f32 %v1086_v13, %v894_v8  ;;  %v4858_v8 = vld [vmem:[#allocation30_spill] sm:$0xff]  ;;  %v1090_v31 = vmul.f32 %v3800_v26, %v4091_v24  ;;  %v4860_v46 = vld [vmem:[#allocation32_spill] sm:$0xff] }
 0x355   :  { %v1116_v22 = vadd.f32 %v1084_v32, %v886_v51  ;;  %v889_v40 = vadd.f32 %v2971_v57, %v888_v62  ;;  %v1088_v42 = vmul.f32 %v4858_v8, %v4091_v24  ;;  %v2972_v1 = vld [vmem:[#allocation7 + $0xd0] sm:$0xff]  ;;  %v1091_v62 = vmul.f32 %v3808_v25, %v4091_v24 }
 0x356   :  { %v1329_v58 = vadd.f32 %v1328_v39, %v1327_v41  ;;  %v1119_v29 = vadd.f32 %v1087_v36, %v897_v23  ;;  %v4287_v56 = vadd.f32 %v1250_v37, %v1118_v33  ;;  %v1089_v23 = vmul.f32 %v4860_v46, %v4091_v24  ;;  %v2974_v33 = vld [vmem:[#allocation7 + $0xd8] sm:$0xff]  ;;  %v4861_v37 = vld [vmem:[#allocation29_spill] sm:$0xff]  ;;  %v4866_v46 = vld [vmem:[#allocation40_spill] sm:$0xff] }
 0x357   :  { %v4283_v2 = vadd.f32 %v1248_v12, %v1116_v22  ;;  %v1117_v49 = vadd.f32 %v1085_v7, %v889_v40  ;;  %v4859_v12 = vld [vmem:[#allocation27_spill] sm:$0xff] }
 0x358   :  { %v1331_v20 = vadd.f32 %v1330_v52, %v1329_v58  ;;  %v1252_v0 = vmul.f32 %v4859_v12, %v4094_v16  ;;  %v4299_v53 = vadd.f32 %v1251_v50, %v1119_v29  ;;  %v1336_v26 = vsel %vm1292_vm5, %v4287_v56, 0.0  ;;  %v4862_v52 = vld [vmem:[#allocation31_spill] sm:$0xff] }
 0x359   :  { %v1332_v32 = vsel %vm1292_vm5, %v4283_v2, 0.0  ;;  %v4291_v55 = vadd.f32 %v1249_v11, %v1117_v49  ;;  %v2732_v21 = vpop.f32.mrb[28].mxu1  ;;  %v2975_v11 = vld [vmem:[#allocation7 + $0xc8] sm:$0xff]  ;;  %v1253_v58 = vmul.f32 %v4861_v37, %v4094_v16  ;;  %v1254_v29 = vmul.f32 %v4862_v52, %v4094_v16  ;;  %v2978_v37 = vld [vmem:[#allocation7 + $0xf8] sm:$0xff] }
 0x35a   :  { %v1333_v13 = vadd.f32 %v1332_v32, %v1331_v20  ;;  %v910_v47 = vadd.f32 %v2972_v1, %v2732_v21  ;;  %v901_v51 = vpop.f32.mrb[29].mxu1  ;;  %v1338_v25 = vsel %vm1292_vm5, %v4299_v53, 0.0  ;;  %v4863_v21 = vld [vmem:[#allocation33_spill] sm:$0xff] }
 0x35b   :  { %v1334_v7 = vsel %vm1292_vm5, %v4291_v55, 0.0  ;;  %v902_v36 = vadd.f32 %v2973_v17, %v901_v51  ;;  %v2733_v41 = vpop.f32.mrb[30].mxu1  ;;  %v1255_v8 = vmul.f32 %v4863_v21, %v4094_v16  ;;  %v2976_v17 = vld [vmem:[#allocation7 + $0xf0] sm:$0xff] }
 0x35c   :  { %v1335_v39 = vadd.f32 %v1334_v7, %v1333_v13  ;;  %v913_v22 = vadd.f32 %v2974_v33, %v2733_v41  ;;  %v904_v57 = vpop.f32.mrb[31].mxu1  ;;  %v1122_v40 = vadd.f32 %v1090_v31, %v910_v47  ;;  %v4864_v47 = vld [vmem:[#allocation36_spill] sm:$0xff] }
 0x35d   :  { %v1120_v9 = vadd.f32 %v1088_v42, %v902_v36  ;;  %v905_v43 = vadd.f32 %v2975_v11, %v904_v57  ;;  %v1092_v51 = vmul.f32 %v4864_v47, %v4091_v24  ;;  %v2977_v33 = vld [vmem:[#allocation7 + $0xe0] sm:$0xff] }
 0x35e   :  { %v1337_v49 = vadd.f32 %v1336_v26, %v1335_v39  ;;  %v1123_v35 = vadd.f32 %v1091_v62, %v913_v22  ;;  %v4319_v42 = vadd.f32 %v1254_v29, %v1122_v40  ;;  %v4867_v26 = vld [vmem:[#allocation38_spill] sm:$0xff] }
 0x35f   :  { %v4315_v20 = vadd.f32 %v1252_v0, %v1120_v9  ;;  %v1121_v50 = vadd.f32 %v1089_v23, %v905_v43  ;;  %v4865_v0 = vld [vmem:[#allocation34_spill] sm:$0xff]  ;;  %v1094_v23 = vmul.f32 %v4866_v46, %v4091_v24  ;;  %v1093_v40 = vmul.f32 %v4867_v26, %v4091_v24 }
 0x360   :  { %v1339_v32 = vadd.f32 %v1338_v25, %v1337_v49  ;;  %v1256_v31 = vmul.f32 %v4865_v0, %v4094_v16  ;;  %v1287_v62 = vadd.f32 %v1255_v8, %v1123_v35  ;;  %v4868_v9 = vld [vmem:[#allocation42_spill] sm:$0xff]  ;;  %v1344_v29 = vsel %vm1292_vm5, %v4319_v42, 0.0  ;;  %v2979_v35 = vld [vmem:[#allocation7 + $0xe8] sm:$0xff] }
 0x361   :  { %v1340_v12 = vsel %vm1292_vm5, %v4315_v20, 0.0  ;;  %v4323_v13 = vadd.f32 %v1253_v58, %v1121_v50  ;;  %v2736_v1 = vpop.f32.mrb[32].mxu1  ;;  %v1095_v11 = vmul.f32 %v4868_v9, %v4091_v24  ;;  %v4870_v8 = vld [vmem:[#allocation37_spill] sm:$0xff] }
 0x362   :  { %v1341_v7 = vadd.f32 %v1340_v12, %v1339_v32  ;;  %v926_v36 = vadd.f32 %v2976_v17, %v2736_v1  ;;  %v917_v41 = vpop.f32.mrb[33].mxu1  ;;  %v4869_v32 = vld [vmem:[#allocation35_spill] sm:$0xff]  ;;  %v1258_v12 = vmul.f32 %v4870_v8, %v4094_v16  ;;  %v1346_v24 = vsel %vm1292_vm5, %v1287_v62, 0.0 }
 0x363   :  { %v1342_v39 = vsel %vm1292_vm5, %v4323_v13, 0.0  ;;  %v918_v22 = vadd.f32 %v2977_v33, %v917_v41  ;;  %v2737_v57 = vpop.f32.mrb[34].mxu1  ;;  %v1257_v21 = vmul.f32 %v4869_v32, %v4094_v16  ;;  %v4871_v41 = vld [vmem:[#allocation44_spill] sm:$0xff] }
 0x364   :  { %v1343_v43 = vadd.f32 %v1342_v39, %v1341_v7  ;;  %v929_v58 = vadd.f32 %v2978_v37, %v2737_v57  ;;  %v920_v52 = vpop.f32.mrb[35].mxu1  ;;  %v1126_v49 = vadd.f32 %v1094_v23, %v926_v36  ;;  %v1259_v46 = vmul.f32 %v4871_v41, %v4094_v16 }
 0x365   :  { %v1124_v25 = vadd.f32 %v1092_v51, %v918_v22  ;;  %v921_v50 = vadd.f32 %v2979_v35, %v920_v52 }
 0x366   :  { %v1345_v1 = vadd.f32 %v1344_v29, %v1343_v43  ;;  %v1127_v0 = vadd.f32 %v1095_v11, %v929_v58  ;;  %v1290_v36 = vadd.f32 %v1258_v12, %v1126_v49 }
 0x367   :  { %v1288_v47 = vadd.f32 %v1256_v31, %v1124_v25  ;;  %v1125_v7 = vadd.f32 %v1093_v40, %v921_v50 }
 0x368   :  { %v1347_v17 = vadd.f32 %v1346_v24, %v1345_v1  ;;  %v1291_v33 = vadd.f32 %v1259_v46, %v1127_v0  ;;  %v1352_v26 = vsel %vm1292_vm5, %v1290_v36, 0.0 }
 0x369   :  { %v1348_v51 = vsel %vm1292_vm5, %v1288_v47, 0.0  ;;  %v1289_v23 = vadd.f32 %v1257_v21, %v1125_v7 }
 0x36a   :  { %v1349_v39 = vadd.f32 %v1348_v51, %v1347_v17  ;;  %v1354_v31 = vsel %vm1292_vm5, %v1291_v33, 0.0 }
 0x36b   :  { %v1350_v22 = vsel %vm1292_vm5, %v1289_v23, 0.0 }
 0x36c   :  { %v1351_v57 = vadd.f32 %v1350_v22, %v1349_v39 }
 0x36e   :  { %v1353_v9 = vadd.f32 %v1352_v26, %v1351_v57  ;;  %v2921_v26 = vld [vmem:[#allocation5 + $0xc8] sm:$0xff]  }
 0x36f   :  { %2754 = vmatprep.mubr.bf16.mxu0 %v2921_v26 }
 0x370   :  { %v1355_v11 = vadd.f32 %v1354_v31, %v1353_v9 }
 0x372   :  { %v1356_v40 = vrot.slane %v1355_v11, 4 }
 0x374   :  { %v1357_v43 = vadd.f32 %v1356_v40, %v1355_v11 }
 0x376   :  { %v1358_v37 = vrot.slane %v1357_v43, 2 }
 0x378   :  { %v1359_v58 = vadd.f32 %v1358_v37, %v1357_v43 }
 0x37a   :  { %v1360_v16 = vrot.slane %v1359_v58, 1 }
 0x37c   :  { %v1361_v52 = vadd.f32 %v1360_v16, %v1359_v58 }
 0x37e   :  { %v1363_v29 = vmul.f32 0.00390625, %v1361_v52 }
 0x380   :  { %v4351_v49 = vsub.f32 %v4195_v54, %v1363_v29  ;;  %v4354_v25 = vsub.f32 %v4203_v38, %v1363_v29  ;;  %v4357_v35 = vsub.f32 %v4219_v63, %v1363_v29  ;;  %v4360_v50 = vsub.f32 %v4227_v27, %v1363_v29 }
 0x381   :  { %v4363_v32 = vsub.f32 %v4223_v10, %v1363_v29  ;;  %v4366_v21 = vsub.f32 %v4235_v44, %v1363_v29  ;;  %v4369_v8 = vsub.f32 %v4251_v6, %v1363_v29  ;;  %v4372_v54 = vsub.f32 %v4259_v18, %v1363_v29 }
 0x382   :  { %v4375_v38 = vsub.f32 %v4255_v3, %v1363_v29  ;;  %v4378_v63 = vsub.f32 %v4267_v45, %v1363_v29  ;;  %v4381_v27 = vsub.f32 %v4283_v2, %v1363_v29  ;;  %v4384_v10 = vsub.f32 %v4291_v55, %v1363_v29 }
 0x383   :  { %v4387_v44 = vsub.f32 %v4287_v56, %v1363_v29  ;;  %v4390_v6 = vsub.f32 %v4299_v53, %v1363_v29  ;;  %v4393_v18 = vsub.f32 %v4315_v20, %v1363_v29  ;;  %v4396_v3 = vsub.f32 %v4323_v13, %v1363_v29 }
 0x384   :  { %v4399_v45 = vsub.f32 %v4319_v42, %v1363_v29  ;;  %v4401_v2 = vsub.f32 %v1287_v62, %v1363_v29  ;;  %v4403_v12 = vsub.f32 %v1288_v47, %v1363_v29  ;;  %v4405_v55 = vsub.f32 %v1289_v23, %v1363_v29 }
 0x385   :  { %v4407_v56 = vsub.f32 %v1290_v36, %v1363_v29  ;;  %v4409_v1 = vsub.f32 %v1291_v33, %v1363_v29  ;;  %v4412_v53 = vsub.f32 %v4110_v5, %v1363_v29  ;;  %v4415_v20 = vsub.f32 %v4120_v30, %v1363_v29 }
 0x386   :  { %v4418_v13 = vsub.f32 %v4118_v59, %v1363_v29  ;;  %v4421_v42 = vsub.f32 %v4129_v4, %v1363_v29  ;;  %v4428_v47 = vsub.f32 %v4146_v34, %v1363_v29  ;;  %v4433_v30 = vsub.f32 %v4158_v28, %v1363_v29 }
 0x387   :  { %v1396_v62 = vmul.f32 %v4412_v53, %v4412_v53  ;;  %v1397_v24 = vmul.f32 %v4415_v20, %v4415_v20  ;;  %v4440_v17 = vsub.f32 %v4154_v61, %v1363_v29  ;;  %v4446_v28 = vsub.f32 %v4167_v19, %v1363_v29 }
 0x388   :  { %v1398_v5 = vmul.f32 %v4418_v13, %v4418_v13  ;;  %v1399_v59 = vmul.f32 %v4421_v42, %v4421_v42  ;;  %v1400_v34 = vmul.f32 %v4428_v47, %v4428_v47  ;;  %v1401_v36 = vmul.f32 %v4433_v30, %v4433_v30 }
 0x389   :  { %v1428_v4 = vsel %vm1292_vm5, %v1396_v62, 0.0  ;;  %v1429_v0 = vsel %vm1292_vm5, %v1397_v24, 0.0  ;;  %v4452_v39 = vsub.f32 %v4187_v60, %v1363_v29  ;;  %v1402_v61 = vmul.f32 %v4440_v17, %v4440_v17 }
 0x38a   :  { %v1430_v7 = vadd.f32 %v1429_v0, %v1428_v4  ;;  %v1431_v41 = vsel %vm1292_vm5, %v1398_v5, 0.0  ;;  %v1433_v51 = vsel %vm1292_vm5, %v1399_v59, 0.0  ;;  %v1435_v33 = vsel %vm1292_vm5, %v1400_v34, 0.0 }
 0x38b   :  { %v1403_v57 = vmul.f32 %v4446_v28, %v4446_v28  ;;  %v1437_v19 = vsel %vm1292_vm5, %v1401_v36, 0.0  ;;  %v4461_v31 = vsub.f32 %v4191_v48, %v1363_v29  ;;  %v1404_v60 = vmul.f32 %v4452_v39, %v4452_v39 }
 0x38c   :  { %v1432_v46 = vadd.f32 %v1431_v41, %v1430_v7  ;;  %v1439_v11 = vsel %vm1292_vm5, %v1402_v61, 0.0  ;;  %v1405_v43 = vmul.f32 %v4351_v49, %v4351_v49  ;;  %v1407_v29 = vmul.f32 %v4354_v25, %v4354_v25 }
 0x38d   :  { %v1441_v37 = vsel %vm1292_vm5, %v1403_v57, 0.0  ;;  %v1406_v16 = vmul.f32 %v4461_v31, %v4461_v31  ;;  %v1443_v52 = vsel %vm1292_vm5, %v1404_v60, 0.0  ;;  %v1408_v5 = vmul.f32 %v4357_v35, %v4357_v35 }
 0x38e   :  { %v1434_v23 = vadd.f32 %v1433_v51, %v1432_v46  ;;  %v1445_v62 = vsel %vm1292_vm5, %v1405_v43, 0.0  ;;  %v1409_v0 = vmul.f32 %v4360_v50, %v4360_v50  ;;  %v1449_v7 = vsel %vm1292_vm5, %v1407_v29, 0.0 }
 0x38f   :  { %v1447_v59 = vsel %vm1292_vm5, %v1406_v16, 0.0  ;;  %v1410_v41 = vmul.f32 %v4363_v32, %v4363_v32  ;;  %v1451_v46 = vsel %vm1292_vm5, %v1408_v5, 0.0  ;;  %v1411_v51 = vmul.f32 %v4366_v21, %v4366_v21  ;;  %v4499_v16 = vpop.permute.xlu1 %2310 }
 0x390   :  { %v1436_v22 = vadd.f32 %v1435_v33, %v1434_v23  ;;  %v1453_v23 = vsel %vm1292_vm5, %v1409_v0, 0.0  ;;  %v1412_v33 = vmul.f32 %v4369_v8, %v4369_v8  ;;  %v1414_v60 = vmul.f32 %v4375_v38, %v4375_v38 }
 0x391   :  { %v1457_v26 = vsel %vm1292_vm5, %v1411_v51, 0.0  ;;  %v1415_v43 = vmul.f32 %v4378_v63, %v4378_v63 }
 0x392   :  { %v1438_v9 = vadd.f32 %v1437_v19, %v1436_v22  ;;  %v1455_v22 = vsel %vm1292_vm5, %v1410_v41, 0.0  ;;  %v1413_v19 = vmul.f32 %v4372_v54, %v4372_v54 }
 0x394   :  { %v1440_v40 = vadd.f32 %v1439_v11, %v1438_v9  ;;  %v1459_v11 = vsel %vm1292_vm5, %v1412_v33, 0.0 }
 0x396   :  { %v1442_v58 = vadd.f32 %v1441_v37, %v1440_v40  ;;  %v1461_v37 = vsel %vm1292_vm5, %v1413_v19, 0.0  ;;  %v1422_v19 = vmul.f32 %v4399_v45, %v4399_v45 }
 0x398   :  { %v1444_v48 = vadd.f32 %v1443_v52, %v1442_v58  ;;  %v1416_v52 = vmul.f32 %v4381_v27, %v4381_v27 }
 0x39a   :  { %v1446_v24 = vadd.f32 %v1445_v62, %v1444_v48  ;;  %v1463_v48 = vsel %vm1292_vm5, %v1414_v60, 0.0  ;;  %v1417_v62 = vmul.f32 %v4384_v10, %v4384_v10  ;;  %v1423_v60 = vmul.f32 %v4401_v2, %v4401_v2 }
 0x39c   :  { %v1448_v4 = vadd.f32 %v1447_v59, %v1446_v24  ;;  %v1465_v24 = vsel %vm1292_vm5, %v1415_v43, 0.0  ;;  %v1418_v59 = vmul.f32 %v4387_v44, %v4387_v44  ;;  %v1469_v41 = vsel %vm1292_vm5, %v1417_v62, 0.0 }
 0x39d   :  { %v1424_v43 = vmul.f32 %v4403_v12, %v4403_v12 }
 0x39e   :  { %v1450_v34 = vadd.f32 %v1449_v7, %v1448_v4  ;;  %v1467_v4 = vsel %vm1292_vm5, %v1416_v52, 0.0  ;;  %v4510_v7 = vpop.permute.xlu1 %2314  ;;  %v1471_v51 = vsel %vm1292_vm5, %v1418_v59, 0.0 }
 0x3a0   :  { %v1452_v36 = vadd.f32 %v1451_v46, %v1450_v34  ;;  %v1419_v34 = vmul.f32 %v4390_v6, %v4390_v6 }
 0x3a2   :  { %v1454_v61 = vadd.f32 %v1453_v23, %v1452_v36  ;;  %v1420_v36 = vmul.f32 %v4393_v18, %v4393_v18  ;;  %v1473_v33 = vsel %vm1292_vm5, %v1419_v34, 0.0 }
 0x3a4   :  { %v1456_v57 = vadd.f32 %v1455_v22, %v1454_v61  ;;  %v1421_v61 = vmul.f32 %v4396_v3, %v4396_v3 }
 0x3a6   :  { %v1458_v9 = vadd.f32 %v1457_v26, %v1456_v57  ;;  %v4521_v57 = vpop.permute.xlu1 %2318  ;;  %v1475_v26 = vsel %vm1292_vm5, %v1420_v36, 0.0 }
 0x3a8   :  { %v1460_v40 = vadd.f32 %v1459_v11, %v1458_v9  ;;  %v1477_v11 = vsel %vm1292_vm5, %v1421_v61, 0.0 }
 0x3aa   :  { %v1462_v58 = vadd.f32 %v1461_v37, %v1460_v40  ;;  %v1479_v37 = vsel %vm1292_vm5, %v1422_v19, 0.0  ;;  %v4532_v52 = vpop.permute.xlu1 %2322 }
 0x3ac   :  { %v1464_v29 = vadd.f32 %v1463_v48, %v1462_v58  ;;  %v1425_v48 = vmul.f32 %v4405_v55, %v4405_v55 }
 0x3ae   :  { %v1466_v5 = vadd.f32 %v1465_v24, %v1464_v29  ;;  %v1481_v29 = vsel %vm1292_vm5, %v1423_v60, 0.0  ;;  %v1426_v24 = vmul.f32 %v4407_v56, %v4407_v56 }
 0x3b0   :  { %v1468_v0 = vadd.f32 %v1467_v4, %v1466_v5  ;;  %v1483_v5 = vsel %vm1292_vm5, %v1424_v43, 0.0  ;;  %v1427_v4 = vmul.f32 %v4409_v1, %v4409_v1 }
 0x3b2   :  { %v1470_v46 = vadd.f32 %v1469_v41, %v1468_v0  ;;  %v1485_v0 = vsel %vm1292_vm5, %v1425_v48, 0.0 }
 0x3b4   :  { %v1472_v23 = vadd.f32 %v1471_v51, %v1470_v46  ;;  %v1487_v46 = vsel %vm1292_vm5, %v1426_v24, 0.0 }
 0x3b6   :  { %v1474_v22 = vadd.f32 %v1473_v33, %v1472_v23  ;;  %v1489_v23 = vsel %vm1292_vm5, %v1427_v4, 0.0 }
 0x3b8   :  { %v1476_v9 = vadd.f32 %v1475_v26, %v1474_v22 }
 0x3ba   :  { %v1478_v40 = vadd.f32 %v1477_v11, %v1476_v9 }
 0x3bc   :  { %v1480_v58 = vadd.f32 %v1479_v37, %v1478_v40 }
 0x3be   :  { %v1482_v62 = vadd.f32 %v1481_v29, %v1480_v58 }
 0x3c0   :  { %v1484_v59 = vadd.f32 %v1483_v5, %v1482_v62 }
 0x3c2   :  { %v1486_v34 = vadd.f32 %v1485_v0, %v1484_v59  ;;  %v4872_v0 = vld [vmem:[#allocation39_spill] sm:$0xff] }
 0x3c4   :  { %v1488_v51 = vadd.f32 %v1487_v46, %v1486_v34  ;;  %v4873_v34 = vld [vmem:[#allocation46_spill] sm:$0xff] }
 0x3c6   :  { %v1490_v33 = vadd.f32 %v1489_v23, %v1488_v51  ;;  %v4876_v51 = vld [vmem:[#allocation47_spill] sm:$0xff] }
 0x3c8   :  { %v1491_v22 = vrot.slane %v1490_v33, 4 }
 0x3c9   :  { %v461_v41 = vpop.xlane.xlu1 %460 }
 0x3ca   :  { %v462_v36 = vsub.f32 %v4164_v14, %v461_v41  ;;  %v1492_v19 = vadd.f32 %v1491_v22, %v1490_v33  ;;  %v4878_v33 = vld [vmem:[#allocation51_spill] sm:$0xff]  ;;  %v4879_v22 = vld [vmem:[#allocation58_spill] sm:$0xff] }
 0x3cc   :  { %v463_v61 = vmul.f32 1.442695, %v462_v36  ;;  %v1493_v26 = vrot.slane %v1492_v19, 2  ;;  %v4875_v36 = vld [vmem:[#allocation50_spill] sm:$0xff] }
 0x3ce   :  { %2949 = vpow2.f32 %v463_v61  ;;  %v1494_v9 = vadd.f32 %v1493_v26, %v1492_v19 }
 0x3d0   :  { %v1495_v60 = vrot.slane %v1494_v9, 1 }
 0x3d2   :  { %v1496_v40 = vadd.f32 %v1495_v60, %v1494_v9  ;;  %v4881_v9 = vld [vmem:[#allocation48_spill] sm:$0xff]  ;;  %v4882_v60 = vld [vmem:[#allocation45_spill] sm:$0xff] }
 0x3d4   :  { %v1497_v37 = vmul.f32 0.00390625, %v1496_v40  ;;  %v4883_v40 = vld [vmem:[#allocation52_spill] sm:$0xff] }
 0x3d6   :  { %v1498_v58 = vadd.f32 1e-05, %v1497_v37  ;;  %v4884_v37 = vld [vmem:[#allocation49_spill] sm:$0xff] }
 0x3d8   :  { %v2950_v11 = vpop.eup %2949  ;;  %2951 = vrsqrt.f32 %v1498_v58 }
 0x3d9   :  { %v4548_v43 = vsel %vm65_vm2, %v2950_v11, 0.0 }
 0x3da   :  { %v466_v14 = vsel %vm458_vm0, %v4548_v43, 0.0 }
 0x3db   :  { %467 = vadd.xlane.f32.xlu1 %v466_v14 }
 0x3e2   :  { %v4552_v48 = vpop.eup %2951 }
 0x3e3   :  { %v1529_v29 = vmul.f32 %v4552_v48, %v4405_v55  ;;  %v1516_v62 = vmul.f32 %v4552_v48, %v4369_v8  ;;  %v1517_v15 = vmul.f32 %v4552_v48, %v4372_v54  ;;  %v1518_v24 = vmul.f32 %v4552_v48, %v4375_v38 }
 0x3e4   :  { %v1519_v5 = vmul.f32 %v4552_v48, %v4378_v63  ;;  %v1520_v59 = vmul.f32 %v4552_v48, %v4381_v27  ;;  %v1521_v4 = vmul.f32 %v4552_v48, %v4384_v10  ;;  %v1522_v55 = vmul.f32 %v4552_v48, %v4387_v44 }
 0x3e5   :  { %v1523_v8 = vmul.f32 %v4552_v48, %v4390_v6  ;;  %v1524_v54 = vmul.f32 %v4552_v48, %v4393_v18  ;;  %v1525_v38 = vmul.f32 %v4552_v48, %v4396_v3  ;;  %v1526_v63 = vmul.f32 %v4552_v48, %v4399_v45  ;;  %v4874_v3 = vld [vmem:[#allocation43_spill] sm:$0xff] }
 0x3e6   :  { %v1527_v27 = vmul.f32 %v4552_v48, %v4401_v2  ;;  %v1528_v10 = vmul.f32 %v4552_v48, %v4403_v12  ;;  %v1530_v44 = vmul.f32 %v4552_v48, %v4407_v56  ;;  %v1531_v6 = vmul.f32 %v4552_v48, %v4409_v1  ;;  %v4877_v2 = vld [vmem:[#allocation54_spill] sm:$0xff]  ;;  %v4880_v56 = vld [vmem:[#allocation41_spill] sm:$0xff] }
 0x3e7   :  { %v1644_v18 = vmul.f32 %v4872_v0, %v1516_v62  ;;  %v1645_v41 = vmul.f32 %v4873_v34, %v1517_v15  ;;  %v1646_v46 = vmul.f32 %v4874_v3, %v1518_v24  ;;  %v1647_v45 = vmul.f32 %v4875_v36, %v1519_v5  ;;  %v4885_v62 = vld [vmem:[#allocation56_spill] sm:$0xff]  ;;  %v4886_v24 = vld [vmem:[#allocation53_spill] sm:$0xff] }
 0x3e8   :  { %v1648_v23 = vmul.f32 %v4876_v51, %v1520_v59  ;;  %v1649_v61 = vmul.f32 %v4877_v2, %v1521_v4  ;;  %v1650_v12 = vmul.f32 %v4878_v33, %v1522_v55  ;;  %v1651_v19 = vmul.f32 %v4879_v22, %v1523_v8  ;;  %v4887_v59 = vld [vmem:[#allocation60_spill] sm:$0xff]  ;;  %v4888_v2 = vld [vmem:[#allocation55_spill] sm:$0xff]  ;;  %v4889_v33 = vld [vmem:[#allocation62_spill] sm:$0xff] }
 0x3e9   :  { %v1772_v26 = vadd.f32 %v4880_v56, %v1644_v18  ;;  %v1773_v1 = vadd.f32 %v4881_v9, %v1645_v41  ;;  %v1774_v11 = vadd.f32 %v4882_v60, %v1646_v46  ;;  %v1775_v14 = vadd.f32 %v4883_v40, %v1647_v45  ;;  %v4890_v56 = vld [vmem:[#allocation59_spill] sm:$0xff]  ;;  %v4891_v9 = vld [vmem:[#allocation66_spill] sm:$0xff]  ;;  %v4893_v60 = vld [vmem:[#allocation64_spill] sm:$0xff] }
 0x3ea   :  { %v1776_v58 = vadd.f32 %v4884_v37, %v1648_v23  ;;  %v1777_v15 = vadd.f32 %v4885_v62, %v1649_v61  ;;  %v1778_v5 = vadd.f32 %v4886_v24, %v1650_v12  ;;  %v1779_v4 = vadd.f32 %v4887_v59, %v1651_v19  ;;  %v4894_v40 = vld [vmem:[#allocation63_spill] sm:$0xff]  ;;  %v4895_v37 = vld [vmem:[#allocation70_spill] sm:$0xff]  ;;  %v4896_v62 = vld [vmem:[#allocation61_spill] sm:$0xff] }
 0x3eb   :  { %v1804_v0 = vmax.f32 %v1772_v26, 0.0  ;;  %v1805_v55 = vmax.f32 %v1773_v1, 0.0  ;;  %v1806_v34 = vmax.f32 %v1774_v11, 0.0  ;;  %v1807_v8 = vmax.f32 %v1775_v14, 0.0  ;;  %v4892_v26 = vld [vmem:[#allocation57_spill] sm:$0xff]  ;;  %v4898_v24 = vld [vmem:[#allocation67_spill] sm:$0xff] }
 0x3ec   :  { %v1808_v3 = vmax.f32 %v1776_v58, 0.0  ;;  %v1809_v18 = vmax.f32 %v1777_v15, 0.0  ;;  %v1810_v36 = vmax.f32 %v1778_v5, 0.0  ;;  %v1811_v41 = vmax.f32 %v1779_v4, 0.0  ;;  %v4897_v15 = vld [vmem:[#allocation68_spill] sm:$0xff]  ;;  %v4899_v59 = vld [vmem:[#allocation74_spill] sm:$0xff] }
 0x3ed   :  { %v1828_v51 = vpack.c.bf16 %v1805_v55, %v1804_v0  ;;  %v1829_v46 = vpack.c.bf16 %v1807_v8, %v1806_v34  ;;  %v1652_v45 = vmul.f32 %v4888_v2, %v1524_v54  ;;  %v1653_v23 = vmul.f32 %v4889_v33, %v1525_v38  ;;  %v4900_v0 = vld [vmem:[#allocation65_spill] sm:$0xff]  ;;  %v4901_v34 = vld [vmem:[#allocation72_spill] sm:$0xff] }
 0x3ee   :  { %v1830_v22 = vpack.c.bf16 %v1809_v18, %v1808_v3  ;;  %v1831_v61 = vpack.c.bf16 %v1811_v41, %v1810_v36  ;;  %v1654_v12 = vmul.f32 %v4890_v56, %v1526_v63  ;;  %v1655_v19 = vmul.f32 %v4891_v9, %v1527_v27  ;;  %v4902_v18 = vld [vmem:[#allocation69_spill] sm:$0xff]  ;;  %v4903_v36 = vld [vmem:[#allocation75_spill] sm:$0xff] }
 0x3ef   :  { %2738 = vmatprep.subr.bf16.mxu0 %v1828_v51  ;;  %v1780_v1 = vadd.f32 %v4892_v26, %v1652_v45  ;;  %v1781_v11 = vadd.f32 %v4893_v60, %v1653_v23  ;;  %v1656_v14 = vmul.f32 %v4894_v40, %v1528_v10  ;;  %v1657_v58 = vmul.f32 %v4895_v37, %v1529_v29  ;;  %v4904_v26 = vld [vmem:[#allocation71_spill] sm:$0xff]  ;;  %v4905_v60 = vld [vmem:[#allocation77_spill] sm:$0xff] }
 0x3f0   :  { %2739 = vmatpush3.bf16.msra.mxu0 %v1828_v51  ;;  %v1782_v54 = vadd.f32 %v4896_v62, %v1654_v12  ;;  %v1783_v38 = vadd.f32 %v4897_v15, %v1655_v19  ;;  %v1658_v5 = vmul.f32 %v4898_v24, %v1530_v44  ;;  %v1659_v63 = vmul.f32 %v4899_v59, %v1531_v6  ;;  %v4907_v40 = vld [vmem:[#allocation79_spill] sm:$0xff]  ;;  %v4912_v59 = vld [vmem:[#allocation78_spill] sm:$0xff] }
 0x3f1   :  { %2740 = vmatprep.subr.bf16.mxu0 %v1829_v46  ;;  %v1812_v27 = vmax.f32 %v1780_v1, 0.0  ;;  %v1813_v4 = vmax.f32 %v1781_v11, 0.0  ;;  %v1784_v55 = vadd.f32 %v4900_v0, %v1656_v14  ;;  %v1785_v8 = vadd.f32 %v4901_v34, %v1657_v58  ;;  %v4909_v58 = vld [vmem:[#allocation80_spill] sm:$0xff]  ;;  %v4915_v34 = vld [vmem:[#allocation85_spill] sm:$0xff] }
 0x3f2   :  { %v1814_v3 = vmax.f32 %v1782_v54, 0.0  ;;  %v1815_v10 = vmax.f32 %v1783_v38, 0.0  ;;  %v1786_v29 = vadd.f32 %v4902_v18, %v1658_v5  ;;  %v1787_v41 = vadd.f32 %v4903_v36, %v1659_v63  ;;  %v4911_v38 = vld [vmem:[#allocation84_spill] sm:$0xff] }
 0x3f3   :  { %v1832_v51 = vpack.c.bf16 %v1813_v4, %v1812_v27  ;;  %v1816_v2 = vmax.f32 %v1784_v55, 0.0  ;;  %v1817_v45 = vmax.f32 %v1785_v8, 0.0  ;;  %v1500_v12 = vmul.f32 %v4552_v48, %v4412_v53  ;;  %v4913_v27 = vld [vmem:[#allocation82_spill] sm:$0xff]  ;;  %v4914_v55 = vld [vmem:[#allocation83_spill] sm:$0xff] }
 0x3f4   :  { %2741 = vmatpush3.bf16.msra.mxu0 %v1829_v46  ;;  %v1833_v44 = vpack.c.bf16 %v1815_v10, %v1814_v3  ;;  %v1818_v33 = vmax.f32 %v1786_v29, 0.0  ;;  %v1819_v6 = vmax.f32 %v1787_v41, 0.0  ;;  %v1501_v9 = vmul.f32 %v4552_v48, %v4415_v20  ;;  %v4916_v3 = vld [vmem:[#allocation86_spill] sm:$0xff]  ;;  %v2922_v29 = vld [vmem:[#allocation5 + $0xd0] sm:$0xff]  }
 0x3f5   :  { %2742 = vmatprep.subr.bf16.mxu0 %v1830_v22  ;;  %v1834_v23 = vpack.c.bf16 %v1817_v45, %v1816_v2  ;;  %v1502_v19 = vmul.f32 %v4552_v48, %v4418_v13  ;;  %v1503_v46 = vmul.f32 %v4552_v48, %v4421_v42  ;;  %v1628_v1 = vmul.f32 %v4904_v26, %v1500_v12  ;;  %v4908_v13 = vld [vmem:[#allocation76_spill] sm:$0xff]  ;;  %v2923_v45 = vld [vmem:[#allocation5 + $0xd8] sm:$0xff]  }
 0x3f6   :  { %v1835_v56 = vpack.c.bf16 %v1819_v6, %v1818_v33  ;;  %v1629_v11 = vmul.f32 %v4905_v60, %v1501_v9  ;;  %v1504_v53 = vmul.f32 %v4552_v48, %v4428_v47  ;;  %v1505_v20 = vmul.f32 %v4552_v48, %v4433_v30  ;;  %v4910_v47 = vld [vmem:[#allocation81_spill] sm:$0xff]  ;;  %v4918_v33 = vld [vmem:[#allocation88_spill] sm:$0xff] }
 0x3f7   :  { %v1630_v37 = vmul.f32 %v4908_v13, %v1502_v19  ;;  %v1631_v42 = vmul.f32 %v4909_v58, %v1503_v46  ;;  %v1506_v62 = vmul.f32 %v4552_v48, %v4440_v17  ;;  %v1507_v54 = vmul.f32 %v4552_v48, %v4446_v28  ;;  %v4920_v46 = vld [vmem:[#allocation89_spill] sm:$0xff]  ;;  %v4924_v13 = vld [vmem:[#allocation94_spill] sm:$0xff]  ;;  %v4925_v58 = vld [vmem:[#allocation95_spill] sm:$0xff] }
 0x3f8   :  { %2743 = vmatpush3.bf16.msra.mxu0 %v1830_v22  ;;  %v4906_v22 = vld [vmem:[#allocation73_spill] sm:$0xff]  ;;  %v1757_v14 = vadd.f32 %v4907_v40, %v1629_v11  ;;  %v1632_v15 = vmul.f32 %v4910_v47, %v1504_v53  ;;  %v1633_v30 = vmul.f32 %v4911_v38, %v1505_v20  ;;  %v1508_v0 = vmul.f32 %v4552_v48, %v4452_v39  ;;  %v4922_v20 = vld [vmem:[#allocation92_spill] sm:$0xff]  ;;  %v4926_v47 = vld [vmem:[#allocation98_spill] sm:$0xff] }
 0x3f9   :  { %2744 = vmatprep.subr.bf16.mxu0 %v1831_v61  ;;  %v1758_v63 = vadd.f32 %v4912_v59, %v1630_v37  ;;  %v1759_v4 = vadd.f32 %v4913_v27, %v1631_v42  ;;  %v1509_v17 = vmul.f32 %v4552_v48, %v4351_v49  ;;  %v1634_v10 = vmul.f32 %v4916_v3, %v1506_v62  ;;  %v4923_v40 = vld [vmem:[#allocation93_spill] sm:$0xff]  ;;  %v2925_v62 = vld [vmem:[#allocation5 + $0xe8] sm:$0xff]  }
 0x3fa   :  { %v1789_v5 = vmax.f32 %v1757_v14, 0.0  ;;  %v1760_v28 = vadd.f32 %v4914_v55, %v1632_v15  ;;  %v1761_v8 = vadd.f32 %v4915_v34, %v1633_v30  ;;  %v1510_v39 = vmul.f32 %v4552_v48, %v4461_v31  ;;  %v4927_v38 = vld [vmem:[#allocation99_spill] sm:$0xff]  ;;  %v4928_v59 = vld [vmem:[#allocation96_spill] sm:$0xff]  ;;  %v4929_v27 = vld [vmem:[#allocation97_spill] sm:$0xff] }
 0x3fb   :  { %v1790_v36 = vmax.f32 %v1758_v63, 0.0  ;;  %v1791_v41 = vmax.f32 %v1759_v4, 0.0  ;;  %v1762_v6 = vadd.f32 %v4918_v33, %v1634_v10  ;;  %v1511_v9 = vmul.f32 %v4552_v48, %v4354_v25  ;;  %v2924_v25 = vld [vmem:[#allocation5 + $0xe0] sm:$0xff]   ;;  %v2926_v34 = vld [vmem:[#allocation5 + $0xf0] sm:$0xff]  }
 0x3fc   :  { %2745 = vmatpush3.bf16.msra.mxu0 %v1831_v61  ;;  %v1756_v61 = vadd.f32 %v4906_v22, %v1628_v1  ;;  %v1793_v49 = vmax.f32 %v1761_v8, 0.0  ;;  %v4921_v1 = vld [vmem:[#allocation91_spill] sm:$0xff]  ;;  %v1512_v31 = vmul.f32 %v4552_v48, %v4357_v35  ;;  %v1513_v60 = vmul.f32 %v4552_v48, %v4360_v50 }
 0x3fd   :  { %2746 = vmatprep.subr.bf16.mxu0 %v1832_v51  ;;  %v1821_v19 = vpack.c.bf16 %v1791_v41, %v1790_v36  ;;  %v1794_v53 = vmax.f32 %v1762_v6, 0.0  ;;  %v1638_v37 = vmul.f32 %v4924_v13, %v1510_v39  ;;  %v1639_v42 = vmul.f32 %v4925_v58, %v1511_v9  ;;  %v4933_v10 = vld [vmem:[#allocation103_spill] sm:$0xff]  ;;  %v4934_v36 = vld [vmem:[#allocation104_spill] sm:$0xff]  ;;  %v4935_v39 = vld [vmem:[#allocation105_spill] sm:$0xff] }
 0x3fe   :  { %v1788_v24 = vmax.f32 %v1756_v61, 0.0  ;;  %v1514_v35 = vmul.f32 %v4552_v48, %v4363_v32  ;;  %v1515_v50 = vmul.f32 %v4552_v48, %v4366_v21  ;;  %v1640_v15 = vmul.f32 %v4926_v47, %v1512_v31  ;;  %v4930_v32 = vld [vmem:[#allocation100_spill] sm:$0xff]  ;;  %v4932_v21 = vld [vmem:[#allocation102_spill] sm:$0xff]  ;;  %v4938_v13 = vld [vmem:[#allocation109_spill] sm:$0xff] }
 0x3ff   :  { %v1641_v30 = vmul.f32 %v4927_v38, %v1513_v60  ;;  %v1766_v63 = vadd.f32 %v4928_v59, %v1638_v37  ;;  %v1767_v4 = vadd.f32 %v4929_v27, %v1639_v42  ;;  %v2928_v33 = vld [vmem:[#allocation5 + $0x100] sm:$0xff]   ;;  %v2935_v31 = vld [vmem:[#allocation5 + $0xb8] sm:$0xff]  }
 0x400   :  { %2747 = vmatpush3.bf16.msra.mxu0 %v1832_v51  ;;  %v1820_v18 = vpack.c.bf16 %v1789_v5, %v1788_v24  ;;  %v4917_v51 = vld [vmem:[#allocation87_spill] sm:$0xff]  ;;  %v1642_v48 = vmul.f32 %v4932_v21, %v1514_v35 }
 0x401   :  { %2748 = vmatprep.subr.bf16.mxu0 %v1833_v44  ;;  %v1635_v2 = vmul.f32 %v4917_v51, %v1507_v54  ;;  %v1798_v8 = vmax.f32 %v1766_v63, 0.0  ;;  %v1799_v3 = vmax.f32 %v1767_v4, 0.0  ;;  %v2936_v60 = vld [vmem:[#allocation5 + $0xc0] sm:$0xff]  }
 0x402   :  { %v1770_v41 = vadd.f32 %v4934_v36, %v1642_v48  ;;  %v4939_v42 = vld [vmem:[#allocation107_spill] sm:$0xff]  ;;  %v4941_v63 = vld [vmem:[#allocation110_spill] sm:$0xff] }
 0x403   :  { %v1763_v26 = vadd.f32 %v4920_v46, %v1635_v2  ;;  %v1825_v51 = vpack.c.bf16 %v1799_v3, %v1798_v8  ;;  %v2931_v46 = vld [vmem:[#allocation5 + $0x98] sm:$0xff]  }
 0x404   :  { %2749 = vmatpush3.bf16.msra.mxu0 %v1833_v44  ;;  %v1792_v44 = vmax.f32 %v1760_v28, 0.0  ;;  %v1802_v6 = vmax.f32 %v1770_v41, 0.0 }
 0x405   :  { %2750 = vmatprep.subr.bf16.mxu0 %v1834_v23  ;;  %v1795_v61 = vmax.f32 %v1763_v26, 0.0  ;;  %v2932_v26 = vld [vmem:[#allocation5 + $0xa0] sm:$0xff]  }
 0x406   :  { %v1822_v11 = vpack.c.bf16 %v1793_v49, %v1792_v44 }
 0x407   :  { %v1823_v24 = vpack.c.bf16 %v1795_v61, %v1794_v53  ;;  %v4937_v61 = vld [vmem:[#allocation106_spill] sm:$0xff] }
 0x408   :  { %2751 = vmatpush3.bf16.msra.mxu0 %v1834_v23  ;;  %v4919_v23 = vld [vmem:[#allocation90_spill] sm:$0xff] }
 0x409   :  { %2752 = vmatprep.subr.bf16.mxu0 %v1835_v56  ;;  %v1636_v12 = vmul.f32 %v4919_v23, %v1508_v0  ;;  %v1768_v0 = vadd.f32 %v4930_v32, %v1640_v15  ;;  %v4942_v32 = vld [vmem:[#allocation113_spill] sm:$0xff] }
 0x40b   :  { %v1764_v22 = vadd.f32 %v4922_v20, %v1636_v12  ;;  %v1800_v2 = vmax.f32 %v1768_v0, 0.0  ;;  %v2929_v12 = vld [vmem:[#allocation5 + $0x88] sm:$0xff]  }
 0x40c   :  { %2753 = vmatpush3.bf16.msra.mxu0 %v1835_v56  ;;  %v1637_v56 = vmul.f32 %v4921_v1, %v1509_v17  ;;  %v4931_v17 = vld [vmem:[#allocation101_spill] sm:$0xff]  ;;  %v2933_v1 = vld [vmem:[#allocation5 + $0xa8] sm:$0xff]  }
 0x40d   :  { %2770 = vmatprep.subr.bf16.mxu0 %v1820_v18  ;;  %v1796_v54 = vmax.f32 %v1764_v22, 0.0  ;;  %v1769_v55 = vadd.f32 %v4931_v17, %v1641_v30  ;;  %v4936_v20 = vld [vmem:[#allocation108_spill] sm:$0xff] }
 0x40e   :  { %v1765_v14 = vadd.f32 %v4923_v40, %v1637_v56  ;;  %v2934_v56 = vld [vmem:[#allocation5 + $0xb0] sm:$0xff]  }
 0x40f   :  { %2755 = vmatmul.mubr.bf16.vlgmr.msra.gmra.mrb[4].mxu0 %v2922_v29  ;;  %v2927_v29 = vld [vmem:[#allocation5 + $0xf8] sm:$0xff]  }
 0x410   :  { %2771 = vmatpush3.bf16.msra.mxu0 %v1820_v18  ;;  %2758 = vmatprep.mubr.bf16.mxu0 %v2923_v45  ;;  %v1797_v5 = vmax.f32 %v1765_v14, 0.0  ;;  %v1643_v18 = vmul.f32 %v4933_v10, %v1515_v50  ;;  %v1801_v45 = vmax.f32 %v1769_v55, 0.0  ;;  %v4943_v55 = vld [vmem:[#allocation111_spill] sm:$0xff] }
 0x411   :  { %2772 = vmatprep.subr.bf16.mxu0 %v1821_v19 }
 0x412   :  { %v1824_v28 = vpack.c.bf16 %v1797_v5, %v1796_v54  ;;  %v1771_v44 = vadd.f32 %v4935_v39, %v1643_v18  ;;  %v1826_v49 = vpack.c.bf16 %v1801_v45, %v1800_v2  ;;  %v4946_v39 = vld [vmem:[#allocation117_spill] sm:$0xff] }
 0x414   :  { %2773 = vmatpush3.bf16.msra.mxu0 %v1821_v19  ;;  %v1803_v23 = vmax.f32 %v1771_v44, 0.0  ;;  %v2930_v19 = vld [vmem:[#allocation5 + $0x90] sm:$0xff]  }
 0x415   :  { %2774 = vmatprep.subr.bf16.mxu0 %v1822_v11 }
 0x416   :  { %v1827_v9 = vpack.c.bf16 %v1803_v23, %v1802_v6 }
 0x417   :  { %2759 = vmatmul.mubr.bf16.gmra.mrb[8].mxu0 %v2924_v25 }
 0x418   :  { %2775 = vmatpush3.bf16.msra.mxu0 %v1822_v11  ;;  %2762 = vmatprep.mubr.bf16.mxu0 %v2925_v62  ;;  %v2937_v11 = vld [vmem:[#allocation5 + $0x108] sm:$0xff]  }
 0x419   :  { %2776 = vmatprep.subr.bf16.mxu0 %v1823_v24  ;;  %2818 = vmatprep.mubr.bf16.mxu1 %v2937_v11  ;;  %v4949_v11 = vld [vmem:[#allocation118_spill] sm:$0xff] }
 0x41c   :  { %2777 = vmatpush3.bf16.msra.mxu0 %v1823_v24  ;;  %v4940_v24 = vld [vmem:[#allocation112_spill] sm:$0xff] }
 0x41d   :  { %2778 = vmatprep.subr.bf16.mxu0 %v1824_v28 }
 0x41f   :  { %2763 = vmatmul.mubr.bf16.gmra.mrb[12].mxu0 %v2926_v34 }
 0x420   :  { %2779 = vmatpush3.bf16.msra.mxu0 %v1824_v28  ;;  %2766 = vmatprep.mubr.bf16.mxu0 %v2927_v29  ;;  %v4944_v29 = vld [vmem:[#allocation116_spill] sm:$0xff] }
 0x421   :  { %2780 = vmatprep.subr.bf16.mxu0 %v1825_v51 }
 0x424   :  { %2781 = vmatpush3.bf16.msra.mxu0 %v1825_v51  ;;  %v4945_v51 = vld [vmem:[#allocation114_spill] sm:$0xff] }
 0x425   :  { %2782 = vmatprep.subr.bf16.mxu0 %v1826_v49 }
 0x427   :  { %2767 = vmatmul.mubr.bf16.gmra.mrb[16].mxu0 %v2928_v33  ;;  %v4947_v33 = vld [vmem:[#allocation115_spill] sm:$0xff] }
 0x428   :  { %2783 = vmatpush3.bf16.msra.mxu0 %v1826_v49  ;;  %2786 = vmatprep.mubr.bf16.mxu0 %v2929_v12 }
 0x429   :  { %2784 = vmatprep.subr.bf16.mxu0 %v1827_v9 }
 0x42c   :  { %2785 = vmatpush3.bf16.msra.mxu0 %v1827_v9 }
 0x42f   :  { %2787 = vmatmul.mubr.bf16.vlgmr.msra.gmra.mrb[4].mxu0 %v2930_v19 }
 0x430   :  { %2790 = vmatprep.mubr.bf16.mxu0 %v2931_v46 }
 0x437   :  { %2791 = vmatmul.mubr.bf16.gmra.mrb[8].mxu0 %v2932_v26 }
 0x438   :  { %2794 = vmatprep.mubr.bf16.mxu0 %v2933_v1 }
 0x43f   :  { %2795 = vmatmul.mubr.bf16.gmra.mrb[12].mxu0 %v2934_v56  ;;  %v4948_v56 = vld [vmem:[#allocation120_spill] sm:$0xff] }
 0x440   :  { %2798 = vmatprep.mubr.bf16.mxu0 %v2935_v31 }
 0x447   :  { %2799 = vmatmul.mubr.bf16.gmra.mrb[16].mxu0 %v2936_v60 }
 0x502   :  { %v2788_v53 = vpop.f32.mrb[4].mxu0 }
 0x503   :  { %v2240_v22 = vadd.f32 %v2788_v53, %v4936_v20  ;;  %v2095_v25 = vpop.f32.mrb[5].mxu0 }
 0x504   :  { %v2238_v40 = vadd.f32 %v4937_v61, %v2095_v25  ;;  %v2789_v14 = vpop.f32.mrb[6].mxu0 }
 0x505   :  { %v2241_v37 = vadd.f32 %v2789_v14, %v4938_v13  ;;  %v2098_v58 = vpop.f32.mrb[7].mxu0  ;;  %v2256_v35 = vmax.f32 %v2240_v22, 0.0  ;;  %v4950_v22 = vld [vmem:[#allocation121_spill] sm:$0xff] }
 0x506   :  { %v2239_v62 = vadd.f32 %v4939_v42, %v2098_v58  ;;  %v2254_v54 = vmax.f32 %v2238_v40, 0.0  ;;  %v4951_v40 = vld [vmem:[#allocation119_spill] sm:$0xff] }
 0x507   :  { %v2257_v50 = vmax.f32 %v2241_v37, 0.0 }
 0x508   :  { %v2255_v47 = vmax.f32 %v2239_v62, 0.0 }
 0x509   :  { %v2279_v15 = vpack.c.bf16 %v2257_v50, %v2256_v35  ;;  %v2938_v50 = vld [vmem:[#allocation5 + $0x110] sm:$0xff]  }
 0x50a   :  { %v2278_v38 = vpack.c.bf16 %v2255_v47, %v2254_v54  ;;  %v2792_v30 = vpop.f32.mrb[8].mxu0  ;;  %v2939_v54 = vld [vmem:[#allocation5 + $0x118] sm:$0xff]   ;;  %v2940_v47 = vld [vmem:[#allocation5 + $0x120] sm:$0xff]  }
 0x50b   :  { %v2244_v5 = vadd.f32 %v2792_v30, %v4940_v24  ;;  %v2111_v59 = vpop.f32.mrb[9].mxu0 }
 0x50c   :  { %v2242_v27 = vadd.f32 %v4941_v63, %v2111_v59  ;;  %v2793_v4 = vpop.f32.mrb[10].mxu0  ;;  %2802 = vmatprep.subr.bf16.mxu1 %v2278_v38 }
 0x50d   :  { %v2245_v0 = vadd.f32 %v2793_v4, %v4942_v32  ;;  %v2114_v17 = vpop.f32.mrb[11].mxu0  ;;  %2803 = vmatpush3.bf16.msra.mxu1 %v2278_v38  ;;  %v2260_v48 = vmax.f32 %v2244_v5, 0.0 }
 0x50e   :  { %v2243_v21 = vadd.f32 %v4943_v55, %v2114_v17  ;;  %2804 = vmatprep.subr.bf16.mxu1 %v2279_v15  ;;  %v2258_v34 = vmax.f32 %v2242_v27, 0.0 }
 0x50f   :  { %v2261_v28 = vmax.f32 %v2245_v0, 0.0 }
 0x510   :  { %v2259_v8 = vmax.f32 %v2243_v21, 0.0 }
 0x511   :  { %v2281_v3 = vpack.c.bf16 %v2261_v28, %v2260_v48  ;;  %2805 = vmatpush3.bf16.msra.mxu1 %v2279_v15  ;;  %v2313_v15 = vpop.permute.xlu0 %2312 }
 0x512   :  { %v2280_v10 = vpack.c.bf16 %v2259_v8, %v2258_v34  ;;  %v2796_v18 = vpop.f32.mrb[12].mxu0 }
 0x513   :  { %v2248_v36 = vadd.f32 %v2796_v18, %v4944_v29  ;;  %v2127_v41 = vpop.f32.mrb[13].mxu0 }
 0x514   :  { %v2246_v2 = vadd.f32 %v4945_v51, %v2127_v41  ;;  %v2797_v45 = vpop.f32.mrb[14].mxu0  ;;  %2806 = vmatprep.subr.bf16.mxu1 %v2280_v10 }
 0x515   :  { %v2249_v44 = vadd.f32 %v2797_v45, %v4946_v39  ;;  %v2130_v49 = vpop.f32.mrb[15].mxu0  ;;  %2807 = vmatpush3.bf16.msra.mxu1 %v2280_v10  ;;  %v2264_v23 = vmax.f32 %v2248_v36, 0.0  ;;  %v2317_v4 = vpop.permute.xlu0 %2316  ;;  %v2980_v45 = vld [vmem:[#allocation7] sm:$0x1] }
 0x516   :  { %v2247_v6 = vadd.f32 %v4947_v33, %v2130_v49  ;;  %2808 = vmatprep.subr.bf16.mxu1 %v2281_v3  ;;  %v2262_v9 = vmax.f32 %v2246_v2, 0.0  ;;  %v2981_v33 = vld [vmem:[#allocation7] sm:$0xff] }
 0x517   :  { %v2265_v12 = vmax.f32 %v2249_v44, 0.0 }
 0x518   :  { %v2263_v19 = vmax.f32 %v2247_v6, 0.0 }
 0x519   :  { %v2283_v46 = vpack.c.bf16 %v2265_v12, %v2264_v23  ;;  %2809 = vmatpush3.bf16.msra.mxu1 %v2281_v3  ;;  %v2982_v23 = vld [vmem:[#allocation7 + $0x8] sm:$0xff] }
 0x51a   :  { %v2282_v26 = vpack.c.bf16 %v2263_v19, %v2262_v9  ;;  %v2800_v1 = vpop.f32.mrb[16].mxu0  ;;  %v2983_v9 = vld [vmem:[#allocation7 + $0x10] sm:$0xff] }
 0x51b   :  { %v2252_v31 = vadd.f32 %v2800_v1, %v4948_v56  ;;  %v2143_v60 = vpop.f32.mrb[17].mxu0 }
 0x51c   :  { %v2250_v53 = vadd.f32 %v4949_v11, %v2143_v60  ;;  %v2801_v20 = vpop.f32.mrb[18].mxu0  ;;  %2810 = vmatprep.subr.bf16.mxu1 %v2282_v26  ;;  %v2984_v60 = vld [vmem:[#allocation7 + $0x18] sm:$0xff] }
 0x51d   :  { %v2253_v25 = vadd.f32 %v2801_v20, %v4950_v22  ;;  %v2146_v61 = vpop.f32.mrb[19].mxu0  ;;  %2811 = vmatpush3.bf16.msra.mxu1 %v2282_v26  ;;  %v2268_v13 = vmax.f32 %v2252_v31, 0.0  ;;  %v2985_v22 = vld [vmem:[#allocation7 + $0x20] sm:$0xff] }
 0x51e   :  { %v2251_v14 = vadd.f32 %v4951_v40, %v2146_v61  ;;  %2812 = vmatprep.subr.bf16.mxu1 %v2283_v46  ;;  %v2266_v58 = vmax.f32 %v2250_v53, 0.0 }
 0x51f   :  { %v2269_v37 = vmax.f32 %v2253_v25, 0.0 }
 0x520   :  { %v2267_v42 = vmax.f32 %v2251_v14, 0.0 }
 0x521   :  { %v2285_v62 = vpack.c.bf16 %v2269_v37, %v2268_v13  ;;  %2813 = vmatpush3.bf16.msra.mxu1 %v2283_v46  ;;  %v2986_v37 = vld [vmem:[#allocation7 + $0x30] sm:$0xff] }
 0x522   :  { %v2284_v35 = vpack.c.bf16 %v2267_v42, %v2266_v58  ;;  %v2987_v42 = vld [vmem:[#allocation7 + $0x28] sm:$0xff] }
 0x524   :  { %2814 = vmatprep.subr.bf16.mxu1 %v2284_v35 }
 0x525   :  { %2815 = vmatpush3.bf16.msra.mxu1 %v2284_v35 }
 0x526   :  { %2816 = vmatprep.subr.bf16.mxu1 %v2285_v62 }
 0x529   :  { %2817 = vmatpush3.bf16.msra.mxu1 %v2285_v62 }
 0x52c   :  { %2819 = vmatmul.mubr.bf16.vlgmr.msra.gmra.mrb[36].mxu1 %v2938_v50 }
 0x52d   :  { %2822 = vmatprep.mubr.bf16.mxu1 %v2939_v54 }
 0x534   :  { %2823 = vmatmul.mubr.bf16.gmra.mrb[40].mxu1 %v2940_v47 }
 0x5ff   :  { %v2820_v38 = vpop.f32.mrb[36].mxu1 }
 0x600   :  { %v2377_v30 = vadd.f32 %v2820_v38, %v4510_v7  ;;  %v2368_v24 = vpop.f32.mrb[37].mxu1  ;;  %v2988_v38 = vld [vmem:[#allocation7 + $0x38] sm:$0xff] }
 0x601   :  { %v2821_v5 = vpop.f32.mrb[38].mxu1  ;;  %v2369_v63 = vadd.f32 %v2368_v24, %v4499_v16  ;;  %v2321_v16 = vpop.permute.xlu0 %2320 }
 0x602   :  { %v2401_v59 = vmax.f32 %v2377_v30, 0.0  ;;  %v2371_v27 = vpop.f32.mrb[39].mxu1  ;;  %v2380_v0 = vadd.f32 %v2821_v5, %v2317_v4 }
 0x603   :  { %v2399_v32 = vmax.f32 %v2369_v63, 0.0  ;;  %v2372_v28 = vadd.f32 %v2371_v27, %v2313_v15 }
 0x604   :  { %2419 = vrot.lane.b32.xlu0 %v2401_v59, %s3102_s29  ;;  %v2402_v48 = vmax.f32 %v2380_v0, 0.0 }
 0x605   :  { %v2400_v8 = vmax.f32 %v2372_v28, 0.0  ;;  %v2325_v36 = vpop.permute.xlu0 %2324  ;;  %v4952_v28 = vlaneseq }
 0x607   :  { %v2824_v17 = vpop.f32.mrb[40].mxu1 }
 0x608   :  { %2415 = vrot.lane.b32.xlu0 %v2399_v32, %s3102_s29  ;;  %v2384_v55 = vpop.f32.mrb[41].mxu1  ;;  %v2393_v7 = vadd.f32 %v2824_v17, %v4532_v52  ;;  %v3103_v52 = vmov 7  }
 0x609   :  { %v2825_v21 = vpop.f32.mrb[42].mxu1  ;;  %v2385_v10 = vadd.f32 %v2384_v55, %v4521_v57  ;;  %2903 = vset.pattern.permute.xlu0 %v3103_v52 }
 0x60a   :  { %v2387_v34 = vpop.f32.mrb[43].mxu1  ;;  %v2405_v3 = vmax.f32 %v2393_v7, 0.0  ;;  %v2396_v51 = vadd.f32 %v2825_v21, %v2325_v36 }
 0x60b   :  { %v2403_v18 = vmax.f32 %v2385_v10, 0.0  ;;  %v2388_v29 = vadd.f32 %v2387_v34, %v2321_v16  ;;  %v2474_v34 = vand.u32 127, %v4952_v28 }
 0x60c   :  { %2421 = vrot.lane.b32.xlu0 %v2402_v48, %s3102_s29  ;;  %v2406_v2 = vmax.f32 %v2396_v51, 0.0  ;;  %v468_v48 = vpop.xlane.xlu1 %467 }
 0x60d   :  { %v2404_v41 = vmax.f32 %v2388_v29, 0.0  ;;  %2953 = vrcp.f32 %v468_v48  ;;  %vm2475_vm7 = vcmp.eq.s32.totalorder %v2474_v34, 127 }
 0x610   :  { %2417 = vrot.lane.b32.xlu0 %v2400_v8, %s3102_s29 }
 0x614   :  { %2427 = vrot.lane.b32.xlu0 %v2405_v3, %s3102_s29 }
 0x617   :  { %v2954_v7 = vpop.eup %2953 }
 0x618   :  { %2423 = vrot.lane.b32.xlu0 %v2403_v18, %s3102_s29  ;;  %v470_v8 = vmul.f32 %v2954_v7, %v4548_v43 }
 0x61c   :  { %2425 = vrot.lane.b32.xlu0 %v2404_v41, %s3102_s29 }
 0x620   :  { %2429 = vrot.lane.b32.xlu0 %v2406_v2, %s3102_s29 }
 0x624   :  { %2469 = vrot.lane.b32.xlu0 %v2980_v45, %s3100_s28 }
 0x676   :  { %v2420_v39 = vpop.permute.xlu0 %2419 }
 0x677   :  { %v2441_v19 = vmul.f32 %v2983_v9, %v2420_v39 }
 0x679   :  { %v2451_v31 = vsel %vm2447_vm6, %v2441_v19, 0.0 }
 0x67a   :  { %v2416_v44 = vpop.permute.xlu0 %2415 }
 0x67b   :  { %v2439_v57 = vmul.f32 %v2981_v33, %v2416_v44 }
 0x67d   :  { %v2448_v46 = vsel %vm2447_vm6, %v2439_v57, 0.0 }
 0x67e   :  { %v2422_v49 = vpop.permute.xlu0 %2421 }
 0x67f   :  { %v2442_v11 = vmul.f32 %v2984_v60, %v2422_v49 }
 0x681   :  { %v2453_v61 = vsel %vm2447_vm6, %v2442_v11, 0.0 }
 0x682   :  { %v2418_v6 = vpop.permute.xlu0 %2417 }
 0x683   :  { %v2440_v12 = vmul.f32 %v2982_v23, %v2418_v6 }
 0x685   :  { %v2449_v26 = vsel %vm2447_vm6, %v2440_v12, 0.0 }
 0x686   :  { %v2450_v1 = vadd.f32 %v2449_v26, %v2448_v46  ;;  %v2428_v56 = vpop.permute.xlu0 %2427 }
 0x687   :  { %v2445_v58 = vmul.f32 %v2986_v37, %v2428_v56 }
 0x688   :  { %v2452_v53 = vadd.f32 %v2451_v31, %v2450_v1 }
 0x689   :  { %v2459_v15 = vsel %vm2447_vm6, %v2445_v58, 0.0 }
 0x68a   :  { %v2424_v20 = vpop.permute.xlu0 %2423  ;;  %v2454_v14 = vadd.f32 %v2453_v61, %v2452_v53 }
 0x68b   :  { %v2443_v25 = vmul.f32 %v2985_v22, %v2424_v20 }
 0x68d   :  { %v2455_v40 = vsel %vm2447_vm6, %v2443_v25, 0.0 }
 0x68e   :  { %v2426_v13 = vpop.permute.xlu0 %2425  ;;  %v2456_v35 = vadd.f32 %v2455_v40, %v2454_v14 }
 0x68f   :  { %v2444_v62 = vmul.f32 %v2987_v42, %v2426_v13 }
 0x691   :  { %v2457_v50 = vsel %vm2447_vm6, %v2444_v62, 0.0 }
 0x692   :  { %v2458_v54 = vadd.f32 %v2457_v50, %v2456_v35  ;;  %v2430_v47 = vpop.permute.xlu0 %2429 }
 0x693   :  { %v2446_v30 = vmul.f32 %v2988_v38, %v2430_v47 }
 0x694   :  { %v2460_v24 = vadd.f32 %v2459_v15, %v2458_v54 }
 0x695   :  { %v2461_v5 = vsel %vm2447_vm6, %v2446_v30, 0.0 }
 0x696   :  { %v2462_v59 = vadd.f32 %v2461_v5, %v2460_v24  ;;  %v2470_v17 = vpop.permute.xlu0 %2469 }
 0x698   :  { %v2463_v63 = vrot.slane %v2462_v59, 4 }
 0x69a   :  { %v2464_v27 = vadd.f32 %v2463_v63, %v2462_v59 }
 0x69c   :  { %v2465_v4 = vrot.slane %v2464_v27, 2 }
 0x69e   :  { %v2466_v32 = vadd.f32 %v2465_v4, %v2464_v27 }
 0x6a0   :  { %v2467_v0 = vrot.slane %v2466_v32, 1 }
 0x6a2   :  { %v2468_v55 = vadd.f32 %v2467_v0, %v2466_v32 }
 0x6a4   :  { %v2472_v21 = vadd.f32 %v2470_v17, %v2468_v55 }
 0x6a6   :  { %2478 = vperm.xlu0 %2903, %v2472_v21  }
 0x725   :  { %v2479_v3 = vpop.permute.xlu0 %2478 }
 0x726   :  { %v2481_v16 = vsel %vm2475_vm7, %v2479_v3, %v470_v8 }
 0x727   :  { %2482 = vst [vmem:[#allocation8] sm:$0x1] %v2481_v16 }
 0x728   :  { %3066 = shalt.err (!%p3063_p0)
}
 0x729   :  { %s3067_s1 = scalar_lea.hbm %s4728_s3, 16 }
 0x72a   :  { %p3068_p1 = scmp.ne.s32.totalorder %s4728_s3, %s3067_s1  ;;  %p3071_p2 = scmp.lt.u32.totalorder %s3067_s1, %s4728_s3 }
 0x72c   :  { %p3073_p3 = pnand %p3071_p2, %p3068_p1 }
 0x72e   :  { %3076 = shalt.err (!%p3073_p3)
}
 0x72f   :  { %2492 = dma.vmem_to_hbm [thread:$0]  %s2490_s4, 16, %s4728_s3, [#allocation4]  }
 0x730   :  { %3081 = dma.done.wait [#allocation4], 16  }
 0x731   :  { %3082 = vsyncadd [#allocation4], 4294967280 }
 0x732   :  { %2496 = vsyncpa [#allocation3], 1 }
 0x733   :  { %2497 = vsyncpa [#allocation6], 1 }
 0x734   :  { %2498 = vsyncpa [#allocation4], 1 }

</bundles_post_ra>
